<compile_context>
chip_gen: v7x
topology: tpu7x:2x2x1
jax: 0.10.0
libtpu: 0.0.40
codegen_flags: <defaults>
</compile_context>

<pallas_src>
import jax
import jax.numpy as jnp
from jax.experimental import pallas as pl
from jax.experimental.pallas import tpu as pltpu

_BN_EPS = 1e-5
_COMPUTE_DTYPE = jnp.bfloat16   # MXU operand dtype (accumulation stays f32)

# ---- representative small timm-style backbone (static architecture) --------
_LAYER_CFG = [
    dict(cin=3,   cout=16,  k=3, stride=2, pad=1),   # stem       (conv 1)
    dict(cin=16,  cout=32,  k=3, stride=1, pad=1),   # block      (conv 2)
    dict(cin=32,  cout=64,  k=3, stride=2, pad=1),   # downsample (conv 3)
    dict(cin=64,  cout=128, k=1, stride=1, pad=0),   # 1x1 head   (conv 4)
]
NUM_FEATURES = 128  # == backbone.num_features == backbone.num_head_features


# --------------------------------------------------------------------------
# In-kernel helpers (traced inside the Pallas kernel body)
# --------------------------------------------------------------------------
def _store_phase_blocks(ref, a_val, nr, nc):
    """Scatter a phase-ordered activation into a zero-padded, phase-split scratch.

    a_val: (4*nr*nc, C) f32; rows grouped by interior phase (pr, pc) in order
           (0,0),(0,1),(1,0),(1,1), raster (k,l) inside each block; the row of
           block (pr,pc) at (k,l) is spatial position (2k+pr, 2l+pc).
    ref:   (4, nr+1, nc+1, C) VMEM scratch with
           ref[2*qr+qc, u, v, :] == zero_pad(act, 1)[2u+qr, 2v+qc, :].
    Every element of `ref` is rewritten on every call (zero halo included), so
    nothing stale can leak across grid steps or TensorCores.
    """
    C = ref.shape[-1]
    m = nr * nc
    dt = ref.dtype
    zrow = jnp.zeros((1, nc, C), dt)
    zcol = jnp.zeros((nr + 1, 1, C), dt)
    # (dest q = 2*qr+qc, source phase block, zero-halo row on top?, halo col left?)
    specs = ((0, 3, True, True), (1, 2, True, False),
             (2, 1, False, True), (3, 0, False, False))
    for dest, src, top, left in specs:
        blk = a_val[src * m:(src + 1) * m].reshape(nr, nc, C).astype(dt)
        blk = jnp.concatenate((zrow, blk) if top else (blk, zrow), axis=0)
        if left:
            ref[dest, :, 1:nc + 1, :] = blk
            ref[dest, :, 0:1, :] = zcol
        else:
            ref[dest, :, 0:nc, :] = blk
            ref[dest, :, nc:nc + 1, :] = zcol


def _gather_patches(ref, pr, pc, nr, nc):
    """Im2col rows for a 3x3 conv read through the phase-split padded scratch.

    Returns (nr*nc, 9*C): row (k,l) holds pad(act)[2k+pr+di, 2l+pc+dj, :] for
    (di,dj) in row-major 3x3 order.  (pr,pc) selects a stride-1 output-phase
    block; (pr,pc)=(0,0) is exactly the patch set of a stride-2 conv.
    All slices are static and unstrided.
    """
    pieces = []
    for di in range(3):
        for dj in range(3):
            q = 2 * ((pr + di) % 2) + ((pc + dj) % 2)
            u0 = (pr + di) // 2
            v0 = (pc + dj) // 2
            pieces.append(ref[q, u0:u0 + nr, v0:v0 + nc, :])
    cat = jnp.concatenate(pieces, axis=-1)                # (nr, nc, 9*C)
    return cat.reshape(nr * nc, cat.shape[-1])


# --------------------------------------------------------------------------
# Fully fused 4-layer kernel: one grid step == one image, one matmul per conv.
# --------------------------------------------------------------------------
def _make_fused_kernel(nr, nc):
    def kernel(x_ref, w1_ref, b1_ref, w2_ref, b2_ref, w3_ref, b3_ref,
               w4_ref, b4_ref, o_ref, a1p_ref, a2p_ref):
        # ---- layer 1: 3x3/s2 stem; im2col built in the wrapper -> one matmul.
        y1 = jnp.dot(x_ref[0], w1_ref[...],
                     preferred_element_type=jnp.float32) + b1_ref[...]
        a1 = y1 * jax.nn.sigmoid(y1)                      # SiLU, f32 (EUP)
        _store_phase_blocks(a1p_ref, a1, nr, nc)

        # ---- layer 2: 3x3/s1; in-VMEM im2col (4 phase blocks) -> one matmul.
        p2 = jnp.concatenate(
            [_gather_patches(a1p_ref, pr, pc, nr, nc)
             for pr in (0, 1) for pc in (0, 1)], axis=0)  # (4*nr*nc, 9*C1) f32
        y2 = jnp.dot(p2.astype(w2_ref.dtype), w2_ref[...],
                     preferred_element_type=jnp.float32) + b2_ref[...]
        a2 = y2 * jax.nn.sigmoid(y2)
        _store_phase_blocks(a2p_ref, a2, nr, nc)

        # ---- layer 3: 3x3/s2; same gather with (pr,pc)=(0,0) -> one matmul.
        p3 = _gather_patches(a2p_ref, 0, 0, nr, nc)       # (nr*nc, 9*C2) f32
        y3 = jnp.dot(p3.astype(w3_ref.dtype), w3_ref[...],
                     preferred_element_type=jnp.float32) + b3_ref[...]
        a3 = y3 * jax.nn.sigmoid(y3)

        # ---- layer 4: 1x1 head -> one matmul; output lane-dense (128 ch).
        y4 = jnp.dot(a3.astype(w4_ref.dtype), w4_ref[...],
                     preferred_element_type=jnp.float32) + b4_ref[...]
        o_ref[0] = (y4 * jax.nn.sigmoid(y4)).astype(o_ref.dtype)

    return kernel


def _fused_backbone(xcol, weights, biases, nr, nc):
    """Run the 4 fused conv-BN-SiLU layers. xcol: (B, M1, K1) bf16 stem im2col."""
    B, M1, K1 = xcol.shape
    w1, w2, w3, w4 = weights
    b1, b2, b3, b4 = biases
    C1, C2, C3, C4 = (w.shape[-1] for w in weights)
    M2 = nr * nc

    flops = 2 * B * (M1 * K1 * C1 + M1 * 9 * C1 * C2
                     + M2 * 9 * C2 * C3 + M2 * C3 * C4)
    transcendentals = B * (M1 * C1 + M1 * C2 + M2 * C3 + M2 * C4)
    bytes_accessed = int(
        xcol.size * xcol.dtype.itemsize
        + sum(w.size * w.dtype.itemsize for w in weights)
        + sum(b.size * 4 for b in biases)
        + B * M2 * C4 * 4)

    return pl.pallas_call(
        _make_fused_kernel(nr, nc),
        out_shape=jax.ShapeDtypeStruct((B, M2, C4), jnp.float32),
        grid_spec=pltpu.PrefetchScalarGridSpec(
            num_scalar_prefetch=0,
            grid=(B,),                       # one image per step; "parallel" lets
                                             # the two v7x TCs split the batch.
            in_specs=[
                pl.BlockSpec((1, M1, K1), lambda b: (b, 0, 0)),
                pl.BlockSpec(w1.shape, lambda b: (0, 0)),
                pl.BlockSpec(b1.shape, lambda b: (0, 0)),
                pl.BlockSpec(w2.shape, lambda b: (0, 0)),
                pl.BlockSpec(b2.shape, lambda b: (0, 0)),
                pl.BlockSpec(w3.shape, lambda b: (0, 0)),
                pl.BlockSpec(b3.shape, lambda b: (0, 0)),
                pl.BlockSpec(w4.shape, lambda b: (0, 0)),
                pl.BlockSpec(b4.shape, lambda b: (0, 0)),
            ],
            out_specs=pl.BlockSpec((1, M2, C4), lambda b: (b, 0, 0)),
            scratch_shapes=[
                pltpu.VMEM((4, nr + 1, nc + 1, C1), jnp.float32),
                pltpu.VMEM((4, nr + 1, nc + 1, C2), jnp.float32),
            ],
        ),
        compiler_params=pltpu.CompilerParams(
            dimension_semantics=("parallel",),
            vmem_limit_bytes=32 * 1024 * 1024,
        ),
        cost_estimate=pl.CostEstimate(
            flops=flops,
            transcendentals=transcendentals,
            bytes_accessed=bytes_accessed,
        ),
    )(xcol, w1, b1, w2, b2, w3, b3, w4, b4)


# --------------------------------------------------------------------------
# Wrapper-side glue (all static-shape XLA ops, traced once)
# --------------------------------------------------------------------------
def _fold_bn(layer):
    """Fold eval-mode BatchNorm into the conv: bf16 scaled weights + f32 bias."""
    w, gamma, beta = layer["w"], layer["gamma"], layer["beta"]
    mean, var = layer["mean"], layer["var"]
    scale = gamma * jax.lax.rsqrt(var + _BN_EPS)                 # (Cout,)
    w_folded = (w * scale).astype(_COMPUTE_DTYPE)                # (kh,kw,cin,cout)
    bias = (beta - mean * scale).reshape(1, -1).astype(jnp.float32)
    return w_folded, bias


def _pad_stem_channels(x_nhwc, w1_hwio):
    """Zero-pad the 3-channel stem input (and w1's K dim) to 8 channels (exact)."""
    cin = x_nhwc.shape[-1]
    if cin % 8:
        extra = 8 - cin % 8
        x_nhwc = jnp.pad(x_nhwc, ((0, 0), (0, 0), (0, 0), (0, extra)))
        w1_hwio = jnp.pad(w1_hwio, ((0, 0), (0, 0), (0, extra), (0, 0)))
    return x_nhwc, w1_hwio


def _stem_im2col_phase(x_nhwc):
    """im2col for the 3x3 / stride-2 / pad-1 stem conv, rows in 2x2 phase order.

    Output (B, Ho*Wo, 9*C): row blocks are the stem-output phases
    (0,0),(0,1),(1,0),(1,1) (raster within each 8x8-style block), matching the
    activation layout the kernel's phase-split scratches expect.
    """
    B, H, W, C = x_nhwc.shape
    Ho, Wo = H // 2, W // 2
    xp = jnp.pad(x_nhwc, ((0, 0), (1, 1), (1, 1), (0, 0)))
    cols = [xp[:, di:di + H:2, dj:dj + W:2, :]
            for di in range(3) for dj in range(3)]
    pat = jnp.concatenate(cols, axis=-1)                         # (B, Ho, Wo, 9C)
    blocks = [pat[:, pr::2, pc::2, :].reshape(B, (Ho // 2) * (Wo // 2), 9 * C)
              for pr in (0, 1) for pc in (0, 1)]
    return jnp.concatenate(blocks, axis=1)                       # (B, Ho*Wo, 9C)


def timm_backbone_forward(params, x_nchw):
    """Equivalent of TimmBackbone.forward: returns (model.forward_features(x),)."""
    B, _, H, W = x_nchw.shape
    assert H % 4 == 0 and W % 4 == 0, "spatial size must be a multiple of 4"
    x = jnp.transpose(x_nchw, (0, 2, 3, 1))                      # NCHW -> NHWC

    folded = [_fold_bn(p) for p in params]
    x, w1_hwio = _pad_stem_channels(x, folded[0][0])
    x = x.astype(_COMPUTE_DTYPE)

    # Weights reshaped to (kh*kw*cin, cout) once in the wrapper.
    weights = (
        w1_hwio.reshape(-1, w1_hwio.shape[-1]),                  # (72,  16)
        folded[1][0].reshape(-1, folded[1][0].shape[-1]),        # (144, 32)
        folded[2][0].reshape(-1, folded[2][0].shape[-1]),        # (288, 64)
        folded[3][0].reshape(-1, folded[3][0].shape[-1]),        # (64, 128)
    )
    biases = tuple(b for _, b in folded)

    Ho1, Wo1 = H // 2, W // 2
    nr, nc = Ho1 // 2, Wo1 // 2                                  # final spatial size
    xcol = _stem_im2col_phase(x)                                 # (B, Ho1*Wo1, 9*cin)

    y = _fused_backbone(xcol, weights, biases, nr, nc)           # (B, nr*nc, 128)
    y = y.reshape(B, nr, nc, -1)
    return (jnp.transpose(y, (0, 3, 1, 2)),)                     # NCHW features


# --------------------------------------------------------------------------
# Pure-XLA reference (same mixed-precision policy) and synthetic parameters
# --------------------------------------------------------------------------
def _reference_forward(params, x_nchw):
    x = jnp.transpose(x_nchw, (0, 2, 3, 1))
    folded = [_fold_bn(p) for p in params]
    x, w1 = _pad_stem_channels(x, folded[0][0])
    folded[0] = (w1, folded[0][1])
    a = x.astype(_COMPUTE_DTYPE)
    for idx, ((w, b), cfg) in enumerate(zip(folded, _LAYER_CFG)):
        s, p = cfg["stride"], cfg["pad"]
        y = jax.lax.conv_general_dilated(
            a, w, window_strides=(s, s), padding=[(p, p), (p, p)],
            dimension_numbers=("NHWC", "HWIO", "NHWC"),
            preferred_element_type=jnp.float32)
        y = y + b.reshape(1, 1, 1, -1)
        y = y * jax.nn.sigmoid(y)
        a = y if idx == len(folded) - 1 else y.astype(_COMPUTE_DTYPE)
    return jnp.transpose(a, (0, 3, 1, 2))


def init_params(key):
    """Deterministic synthetic weights (arrays only; no static config inside)."""
    params = []
    for cfg in _LAYER_CFG:
        key, kw_, kg, kb_ = jax.random.split(key, 4)
        fan_in = cfg["k"] * cfg["k"] * cfg["cin"]
        w = jax.random.normal(
            kw_, (cfg["k"], cfg["k"], cfg["cin"], cfg["cout"]),
            dtype=jnp.float32) * (2.0 / fan_in) ** 0.5
        params.append(dict(
            w=w,
            gamma=1.0 + 0.1 * jax.random.normal(kg, (cfg["cout"],), jnp.float32),
            beta=0.1 * jax.random.normal(kb_, (cfg["cout"],), jnp.float32),
            mean=jnp.zeros((cfg["cout"],), jnp.float32),
            var=jnp.ones((cfg["cout"],), jnp.float32),
        ))
    return params


if __name__ == "__main__":
    key = jax.random.PRNGKey(0)
    kx, kp = jax.random.split(key)
    x = jax.random.normal(kx, (2, 3, 32, 32), dtype=jnp.float32)   # NCHW input
    params = init_params(kp)

    (y,) = jax.jit(timm_backbone_forward)(params, x)
    jax.block_until_ready(y)

    assert y.shape == (2, NUM_FEATURES, 8, 8), y.shape
    assert y.dtype == jnp.float32
    assert bool(jnp.all(jnp.isfinite(y)))

    y_ref = jax.jit(_reference_forward)(params, x)
    jax.block_until_ready(y_ref)
    max_err = float(jnp.max(jnp.abs(y - y_ref)))
    assert bool(jnp.allclose(y, y_ref, rtol=5e-2, atol=5e-2)), max_err

    print("KERNEL_OK")
</pallas_src>

<mosaic_0001>
module attributes {stable_mosaic.version = 11 : i64} {
  func.func @kernel(%arg0: i32, %arg1: memref<1x256x72xbf16, #tpu.memory_space<vmem>>, %arg2: memref<72x16xbf16, #tpu.memory_space<vmem>>, %arg3: memref<1x16xf32, #tpu.memory_space<vmem>>, %arg4: memref<144x32xbf16, #tpu.memory_space<vmem>>, %arg5: memref<1x32xf32, #tpu.memory_space<vmem>>, %arg6: memref<288x64xbf16, #tpu.memory_space<vmem>>, %arg7: memref<1x64xf32, #tpu.memory_space<vmem>>, %arg8: memref<64x128xbf16, #tpu.memory_space<vmem>>, %arg9: memref<1x128xf32, #tpu.memory_space<vmem>>, %arg10: memref<1x64x128xf32, #tpu.memory_space<vmem>>, %arg11: memref<4x9x9x16xf32, #tpu.memory_space<vmem>>, %arg12: memref<4x9x9x32xf32, #tpu.memory_space<vmem>>) attributes {dimension_semantics = [#tpu.dimension_semantics<parallel>], iteration_bounds = array<i64: 2>, scalar_prefetch = 0 : i64, scratch_operands = 2 : i64, tpu.core_type = #tpu.core_type<tc>, window_params = [{transform_indices = @transform_0, window_bounds = array<i64: 1, 256, 72>}, {pipeline_mode = #tpu.pipeline_mode<synchronous>, transform_indices = @transform_1, window_bounds = array<i64: 72, 16>}, {pipeline_mode = #tpu.pipeline_mode<synchronous>, transform_indices = @transform_2, window_bounds = array<i64: 1, 16>}, {pipeline_mode = #tpu.pipeline_mode<synchronous>, transform_indices = @transform_3, window_bounds = array<i64: 144, 32>}, {pipeline_mode = #tpu.pipeline_mode<synchronous>, transform_indices = @transform_4, window_bounds = array<i64: 1, 32>}, {pipeline_mode = #tpu.pipeline_mode<synchronous>, transform_indices = @transform_5, window_bounds = array<i64: 288, 64>}, {pipeline_mode = #tpu.pipeline_mode<synchronous>, transform_indices = @transform_6, window_bounds = array<i64: 1, 64>}, {pipeline_mode = #tpu.pipeline_mode<synchronous>, transform_indices = @transform_7, window_bounds = array<i64: 64, 128>}, {pipeline_mode = #tpu.pipeline_mode<synchronous>, transform_indices = @transform_8, window_bounds = array<i64: 1, 128>}, {transform_indices = @transform_9, window_bounds = array<i64: 1, 64, 128>}]} {
    %c0 = arith.constant 0 : index
    %c0_0 = arith.constant 0 : index
    %c0_1 = arith.constant 0 : index
    %0 = vector.load %arg1[%c0, %c0_0, %c0_1] : memref<1x256x72xbf16, #tpu.memory_space<vmem>>, vector<1x256x72xbf16>
    %1 = vector.shape_cast %0 : vector<1x256x72xbf16> to vector<256x72xbf16>
    %c0_2 = arith.constant 0 : index
    %c0_3 = arith.constant 0 : index
    %2 = vector.load %arg2[%c0_2, %c0_3] : memref<72x16xbf16, #tpu.memory_space<vmem>>, vector<72x16xbf16>
    %cst = arith.constant dense<0.000000e+00> : vector<256x16xf32>
    %3 = tpu.matmul %1, %2, %cst {dimension_numbers = #tpu.dot_dimension_numbers<[1], [0], [0], [1], [0, 0, 1, 1], [], []>} : vector<256x72xbf16>, vector<72x16xbf16>, vector<256x16xf32> -> vector<256x16xf32>
    %c0_4 = arith.constant 0 : index
    %c0_5 = arith.constant 0 : index
    %4 = vector.load %arg3[%c0_4, %c0_5] : memref<1x16xf32, #tpu.memory_space<vmem>>, vector<1x16xf32>
    %5 = vector.broadcast %4 : vector<1x16xf32> to vector<256x16xf32>
    %6 = arith.addf %3, %5 : vector<256x16xf32>
    %7 = arith.negf %6 : vector<256x16xf32>
    %8 = math.exp %7 : vector<256x16xf32>
    %cst_6 = arith.constant 1.000000e+00 : f32
    %9 = vector.broadcast %cst_6 : f32 to vector<256x16xf32>
    %10 = arith.addf %9, %8 : vector<256x16xf32>
    %11 = arith.divf %9, %10 : vector<256x16xf32>
    %12 = arith.mulf %6, %11 : vector<256x16xf32>
    %cst_7 = arith.constant 0.000000e+00 : f32
    %13 = vector.broadcast %cst_7 : f32 to vector<1x8x16xf32>
    %cst_8 = arith.constant 0.000000e+00 : f32
    %14 = vector.broadcast %cst_8 : f32 to vector<9x1x16xf32>
    %15 = vector.extract_strided_slice %12 {offsets = [192, 0], sizes = [64, 16], strides = [1, 1]} : vector<256x16xf32> to vector<64x16xf32>
    %16 = vector.shape_cast %15 : vector<64x16xf32> to vector<8x8x16xf32>
    %17 = tpu.concatenate %13, %16 in 0 : vector<1x8x16xf32>, vector<8x8x16xf32> -> vector<9x8x16xf32>
    %c0_9 = arith.constant 0 : index
    %c0_10 = arith.constant 0 : index
    %c1 = arith.constant 1 : index
    %c0_11 = arith.constant 0 : index
    %18 = vector.load %arg11[%c0_9, %c0_10, %c1, %c0_11] : memref<4x9x9x16xf32, #tpu.memory_space<vmem>>, vector<1x9x8x16xf32>
    %19 = vector.shape_cast %18 : vector<1x9x8x16xf32> to vector<9x8x16xf32>
    %20 = vector.shape_cast %17 : vector<9x8x16xf32> to vector<1x9x8x16xf32>
    tpu.vector_store %arg11[%c0_9, %c0_10, %c1, %c0_11], %20 {strides = array<i32>} : memref<4x9x9x16xf32, #tpu.memory_space<vmem>>, vector<1x9x8x16xf32>,
    %c0_12 = arith.constant 0 : index
    %c0_13 = arith.constant 0 : index
    %c0_14 = arith.constant 0 : index
    %c0_15 = arith.constant 0 : index
    %21 = vector.load %arg11[%c0_12, %c0_13, %c0_14, %c0_15] : memref<4x9x9x16xf32, #tpu.memory_space<vmem>>, vector<1x9x1x16xf32>
    %22 = vector.shape_cast %21 : vector<1x9x1x16xf32> to vector<9x1x16xf32>
    %23 = vector.shape_cast %14 : vector<9x1x16xf32> to vector<1x9x1x16xf32>
    tpu.vector_store %arg11[%c0_12, %c0_13, %c0_14, %c0_15], %23 {strides = array<i32>} : memref<4x9x9x16xf32, #tpu.memory_space<vmem>>, vector<1x9x1x16xf32>,
    %24 = vector.extract_strided_slice %12 {offsets = [128, 0], sizes = [64, 16], strides = [1, 1]} : vector<256x16xf32> to vector<64x16xf32>
    %25 = vector.shape_cast %24 : vector<64x16xf32> to vector<8x8x16xf32>
    %26 = tpu.concatenate %13, %25 in 0 : vector<1x8x16xf32>, vector<8x8x16xf32> -> vector<9x8x16xf32>
    %c1_16 = arith.constant 1 : index
    %c0_17 = arith.constant 0 : index
    %c0_18 = arith.constant 0 : index
    %c0_19 = arith.constant 0 : index
    %27 = vector.load %arg11[%c1_16, %c0_17, %c0_18, %c0_19] : memref<4x9x9x16xf32, #tpu.memory_space<vmem>>, vector<1x9x8x16xf32>
    %28 = vector.shape_cast %27 : vector<1x9x8x16xf32> to vector<9x8x16xf32>
    %29 = vector.shape_cast %26 : vector<9x8x16xf32> to vector<1x9x8x16xf32>
    tpu.vector_store %arg11[%c1_16, %c0_17, %c0_18, %c0_19], %29 {strides = array<i32>} : memref<4x9x9x16xf32, #tpu.memory_space<vmem>>, vector<1x9x8x16xf32>,
    %c1_20 = arith.constant 1 : index
    %c0_21 = arith.constant 0 : index
    %c8 = arith.constant 8 : index
    %c0_22 = arith.constant 0 : index
    %30 = vector.load %arg11[%c1_20, %c0_21, %c8, %c0_22] : memref<4x9x9x16xf32, #tpu.memory_space<vmem>>, vector<1x9x1x16xf32>
    %31 = vector.shape_cast %30 : vector<1x9x1x16xf32> to vector<9x1x16xf32>
    %32 = vector.shape_cast %14 : vector<9x1x16xf32> to vector<1x9x1x16xf32>
    tpu.vector_store %arg11[%c1_20, %c0_21, %c8, %c0_22], %32 {strides = array<i32>} : memref<4x9x9x16xf32, #tpu.memory_space<vmem>>, vector<1x9x1x16xf32>,
    %33 = vector.extract_strided_slice %12 {offsets = [64, 0], sizes = [64, 16], strides = [1, 1]} : vector<256x16xf32> to vector<64x16xf32>
    %34 = vector.shape_cast %33 : vector<64x16xf32> to vector<8x8x16xf32>
    %35 = tpu.concatenate %34, %13 in 0 : vector<8x8x16xf32>, vector<1x8x16xf32> -> vector<9x8x16xf32>
    %c2 = arith.constant 2 : index
    %c0_23 = arith.constant 0 : index
    %c1_24 = arith.constant 1 : index
    %c0_25 = arith.constant 0 : index
    %36 = vector.load %arg11[%c2, %c0_23, %c1_24, %c0_25] : memref<4x9x9x16xf32, #tpu.memory_space<vmem>>, vector<1x9x8x16xf32>
    %37 = vector.shape_cast %36 : vector<1x9x8x16xf32> to vector<9x8x16xf32>
    %38 = vector.shape_cast %35 : vector<9x8x16xf32> to vector<1x9x8x16xf32>
    tpu.vector_store %arg11[%c2, %c0_23, %c1_24, %c0_25], %38 {strides = array<i32>} : memref<4x9x9x16xf32, #tpu.memory_space<vmem>>, vector<1x9x8x16xf32>,
    %c2_26 = arith.constant 2 : index
    %c0_27 = arith.constant 0 : index
    %c0_28 = arith.constant 0 : index
    %c0_29 = arith.constant 0 : index
    %39 = vector.load %arg11[%c2_26, %c0_27, %c0_28, %c0_29] : memref<4x9x9x16xf32, #tpu.memory_space<vmem>>, vector<1x9x1x16xf32>
    %40 = vector.shape_cast %39 : vector<1x9x1x16xf32> to vector<9x1x16xf32>
    %41 = vector.shape_cast %14 : vector<9x1x16xf32> to vector<1x9x1x16xf32>
    tpu.vector_store %arg11[%c2_26, %c0_27, %c0_28, %c0_29], %41 {strides = array<i32>} : memref<4x9x9x16xf32, #tpu.memory_space<vmem>>, vector<1x9x1x16xf32>,
    %42 = vector.extract_strided_slice %12 {offsets = [0, 0], sizes = [64, 16], strides = [1, 1]} : vector<256x16xf32> to vector<64x16xf32>
    %43 = vector.shape_cast %42 : vector<64x16xf32> to vector<8x8x16xf32>
    %44 = tpu.concatenate %43, %13 in 0 : vector<8x8x16xf32>, vector<1x8x16xf32> -> vector<9x8x16xf32>
    %c3 = arith.constant 3 : index
    %c0_30 = arith.constant 0 : index
    %c0_31 = arith.constant 0 : index
    %c0_32 = arith.constant 0 : index
    %45 = vector.load %arg11[%c3, %c0_30, %c0_31, %c0_32] : memref<4x9x9x16xf32, #tpu.memory_space<vmem>>, vector<1x9x8x16xf32>
    %46 = vector.shape_cast %45 : vector<1x9x8x16xf32> to vector<9x8x16xf32>
    %47 = vector.shape_cast %44 : vector<9x8x16xf32> to vector<1x9x8x16xf32>
    tpu.vector_store %arg11[%c3, %c0_30, %c0_31, %c0_32], %47 {strides = array<i32>} : memref<4x9x9x16xf32, #tpu.memory_space<vmem>>, vector<1x9x8x16xf32>,
    %c3_33 = arith.constant 3 : index
    %c0_34 = arith.constant 0 : index
    %c8_35 = arith.constant 8 : index
    %c0_36 = arith.constant 0 : index
    %48 = vector.load %arg11[%c3_33, %c0_34, %c8_35, %c0_36] : memref<4x9x9x16xf32, #tpu.memory_space<vmem>>, vector<1x9x1x16xf32>
    %49 = vector.shape_cast %48 : vector<1x9x1x16xf32> to vector<9x1x16xf32>
    %50 = vector.shape_cast %14 : vector<9x1x16xf32> to vector<1x9x1x16xf32>
    tpu.vector_store %arg11[%c3_33, %c0_34, %c8_35, %c0_36], %50 {strides = array<i32>} : memref<4x9x9x16xf32, #tpu.memory_space<vmem>>, vector<1x9x1x16xf32>,
    %c0_37 = arith.constant 0 : index
    %c0_38 = arith.constant 0 : index
    %c0_39 = arith.constant 0 : index
    %c0_40 = arith.constant 0 : index
    %51 = vector.load %arg11[%c0_37, %c0_38, %c0_39, %c0_40] : memref<4x9x9x16xf32, #tpu.memory_space<vmem>>, vector<1x8x8x16xf32>
    %52 = vector.shape_cast %51 : vector<1x8x8x16xf32> to vector<8x8x16xf32>
    %c1_41 = arith.constant 1 : index
    %c0_42 = arith.constant 0 : index
    %c0_43 = arith.constant 0 : index
    %c0_44 = arith.constant 0 : index
    %53 = vector.load %arg11[%c1_41, %c0_42, %c0_43, %c0_44] : memref<4x9x9x16xf32, #tpu.memory_space<vmem>>, vector<1x8x8x16xf32>
    %54 = vector.shape_cast %53 : vector<1x8x8x16xf32> to vector<8x8x16xf32>
    %c0_45 = arith.constant 0 : index
    %c0_46 = arith.constant 0 : index
    %c1_47 = arith.constant 1 : index
    %c0_48 = arith.constant 0 : index
    %55 = vector.load %arg11[%c0_45, %c0_46, %c1_47, %c0_48] : memref<4x9x9x16xf32, #tpu.memory_space<vmem>>, vector<1x8x8x16xf32>
    %56 = vector.shape_cast %55 : vector<1x8x8x16xf32> to vector<8x8x16xf32>
    %c2_49 = arith.constant 2 : index
    %c0_50 = arith.constant 0 : index
    %c0_51 = arith.constant 0 : index
    %c0_52 = arith.constant 0 : index
    %57 = vector.load %arg11[%c2_49, %c0_50, %c0_51, %c0_52] : memref<4x9x9x16xf32, #tpu.memory_space<vmem>>, vector<1x8x8x16xf32>
    %58 = vector.shape_cast %57 : vector<1x8x8x16xf32> to vector<8x8x16xf32>
    %c3_53 = arith.constant 3 : index
    %c0_54 = arith.constant 0 : index
    %c0_55 = arith.constant 0 : index
    %c0_56 = arith.constant 0 : index
    %59 = vector.load %arg11[%c3_53, %c0_54, %c0_55, %c0_56] : memref<4x9x9x16xf32, #tpu.memory_space<vmem>>, vector<1x8x8x16xf32>
    %60 = vector.shape_cast %59 : vector<1x8x8x16xf32> to vector<8x8x16xf32>
    %c2_57 = arith.constant 2 : index
    %c0_58 = arith.constant 0 : index
    %c1_59 = arith.constant 1 : index
    %c0_60 = arith.constant 0 : index
    %61 = vector.load %arg11[%c2_57, %c0_58, %c1_59, %c0_60] : memref<4x9x9x16xf32, #tpu.memory_space<vmem>>, vector<1x8x8x16xf32>
    %62 = vector.shape_cast %61 : vector<1x8x8x16xf32> to vector<8x8x16xf32>
    %c0_61 = arith.constant 0 : index
    %c1_62 = arith.constant 1 : index
    %c0_63 = arith.constant 0 : index
    %c0_64 = arith.constant 0 : index
    %63 = vector.load %arg11[%c0_61, %c1_62, %c0_63, %c0_64] : memref<4x9x9x16xf32, #tpu.memory_space<vmem>>, vector<1x8x8x16xf32>
    %64 = vector.shape_cast %63 : vector<1x8x8x16xf32> to vector<8x8x16xf32>
    %c1_65 = arith.constant 1 : index
    %c1_66 = arith.constant 1 : index
    %c0_67 = arith.constant 0 : index
    %c0_68 = arith.constant 0 : index
    %65 = vector.load %arg11[%c1_65, %c1_66, %c0_67, %c0_68] : memref<4x9x9x16xf32, #tpu.memory_space<vmem>>, vector<1x8x8x16xf32>
    %66 = vector.shape_cast %65 : vector<1x8x8x16xf32> to vector<8x8x16xf32>
    %c0_69 = arith.constant 0 : index
    %c1_70 = arith.constant 1 : index
    %c1_71 = arith.constant 1 : index
    %c0_72 = arith.constant 0 : index
    %67 = vector.load %arg11[%c0_69, %c1_70, %c1_71, %c0_72] : memref<4x9x9x16xf32, #tpu.memory_space<vmem>>, vector<1x8x8x16xf32>
    %68 = vector.shape_cast %67 : vector<1x8x8x16xf32> to vector<8x8x16xf32>
    %69 = tpu.concatenate %52, %54, %56, %58, %60, %62, %64, %66, %68 in 2 : vector<8x8x16xf32>, vector<8x8x16xf32>, vector<8x8x16xf32>, vector<8x8x16xf32>, vector<8x8x16xf32>, vector<8x8x16xf32>, vector<8x8x16xf32>, vector<8x8x16xf32>, vector<8x8x16xf32> -> vector<8x8x144xf32>
    %70 = vector.shape_cast %69 : vector<8x8x144xf32> to vector<64x144xf32>
    %c1_73 = arith.constant 1 : index
    %c0_74 = arith.constant 0 : index
    %c0_75 = arith.constant 0 : index
    %c0_76 = arith.constant 0 : index
    %71 = vector.load %arg11[%c1_73, %c0_74, %c0_75, %c0_76] : memref<4x9x9x16xf32, #tpu.memory_space<vmem>>, vector<1x8x8x16xf32>
    %72 = vector.shape_cast %71 : vector<1x8x8x16xf32> to vector<8x8x16xf32>
    %c0_77 = arith.constant 0 : index
    %c0_78 = arith.constant 0 : index
    %c1_79 = arith.constant 1 : index
    %c0_80 = arith.constant 0 : index
    %73 = vector.load %arg11[%c0_77, %c0_78, %c1_79, %c0_80] : memref<4x9x9x16xf32, #tpu.memory_space<vmem>>, vector<1x8x8x16xf32>
    %74 = vector.shape_cast %73 : vector<1x8x8x16xf32> to vector<8x8x16xf32>
    %c1_81 = arith.constant 1 : index
    %c0_82 = arith.constant 0 : index
    %c1_83 = arith.constant 1 : index
    %c0_84 = arith.constant 0 : index
    %75 = vector.load %arg11[%c1_81, %c0_82, %c1_83, %c0_84] : memref<4x9x9x16xf32, #tpu.memory_space<vmem>>, vector<1x8x8x16xf32>
    %76 = vector.shape_cast %75 : vector<1x8x8x16xf32> to vector<8x8x16xf32>
    %c3_85 = arith.constant 3 : index
    %c0_86 = arith.constant 0 : index
    %c0_87 = arith.constant 0 : index
    %c0_88 = arith.constant 0 : index
    %77 = vector.load %arg11[%c3_85, %c0_86, %c0_87, %c0_88] : memref<4x9x9x16xf32, #tpu.memory_space<vmem>>, vector<1x8x8x16xf32>
    %78 = vector.shape_cast %77 : vector<1x8x8x16xf32> to vector<8x8x16xf32>
    %c2_89 = arith.constant 2 : index
    %c0_90 = arith.constant 0 : index
    %c1_91 = arith.constant 1 : index
    %c0_92 = arith.constant 0 : index
    %79 = vector.load %arg11[%c2_89, %c0_90, %c1_91, %c0_92] : memref<4x9x9x16xf32, #tpu.memory_space<vmem>>, vector<1x8x8x16xf32>
    %80 = vector.shape_cast %79 : vector<1x8x8x16xf32> to vector<8x8x16xf32>
    %c3_93 = arith.constant 3 : index
    %c0_94 = arith.constant 0 : index
    %c1_95 = arith.constant 1 : index
    %c0_96 = arith.constant 0 : index
    %81 = vector.load %arg11[%c3_93, %c0_94, %c1_95, %c0_96] : memref<4x9x9x16xf32, #tpu.memory_space<vmem>>, vector<1x8x8x16xf32>
    %82 = vector.shape_cast %81 : vector<1x8x8x16xf32> to vector<8x8x16xf32>
    %c1_97 = arith.constant 1 : index
    %c1_98 = arith.constant 1 : index
    %c0_99 = arith.constant 0 : index
    %c0_100 = arith.constant 0 : index
    %83 = vector.load %arg11[%c1_97, %c1_98, %c0_99, %c0_100] : memref<4x9x9x16xf32, #tpu.memory_space<vmem>>, vector<1x8x8x16xf32>
    %84 = vector.shape_cast %83 : vector<1x8x8x16xf32> to vector<8x8x16xf32>
    %c0_101 = arith.constant 0 : index
    %c1_102 = arith.constant 1 : index
    %c1_103 = arith.constant 1 : index
    %c0_104 = arith.constant 0 : index
    %85 = vector.load %arg11[%c0_101, %c1_102, %c1_103, %c0_104] : memref<4x9x9x16xf32, #tpu.memory_space<vmem>>, vector<1x8x8x16xf32>
    %86 = vector.shape_cast %85 : vector<1x8x8x16xf32> to vector<8x8x16xf32>
    %c1_105 = arith.constant 1 : index
    %c1_106 = arith.constant 1 : index
    %c1_107 = arith.constant 1 : index
    %c0_108 = arith.constant 0 : index
    %87 = vector.load %arg11[%c1_105, %c1_106, %c1_107, %c0_108] : memref<4x9x9x16xf32, #tpu.memory_space<vmem>>, vector<1x8x8x16xf32>
    %88 = vector.shape_cast %87 : vector<1x8x8x16xf32> to vector<8x8x16xf32>
    %89 = tpu.concatenate %72, %74, %76, %78, %80, %82, %84, %86, %88 in 2 : vector<8x8x16xf32>, vector<8x8x16xf32>, vector<8x8x16xf32>, vector<8x8x16xf32>, vector<8x8x16xf32>, vector<8x8x16xf32>, vector<8x8x16xf32>, vector<8x8x16xf32>, vector<8x8x16xf32> -> vector<8x8x144xf32>
    %90 = vector.shape_cast %89 : vector<8x8x144xf32> to vector<64x144xf32>
    %c2_109 = arith.constant 2 : index
    %c0_110 = arith.constant 0 : index
    %c0_111 = arith.constant 0 : index
    %c0_112 = arith.constant 0 : index
    %91 = vector.load %arg11[%c2_109, %c0_110, %c0_111, %c0_112] : memref<4x9x9x16xf32, #tpu.memory_space<vmem>>, vector<1x8x8x16xf32>
    %92 = vector.shape_cast %91 : vector<1x8x8x16xf32> to vector<8x8x16xf32>
    %c3_113 = arith.constant 3 : index
    %c0_114 = arith.constant 0 : index
    %c0_115 = arith.constant 0 : index
    %c0_116 = arith.constant 0 : index
    %93 = vector.load %arg11[%c3_113, %c0_114, %c0_115, %c0_116] : memref<4x9x9x16xf32, #tpu.memory_space<vmem>>, vector<1x8x8x16xf32>
    %94 = vector.shape_cast %93 : vector<1x8x8x16xf32> to vector<8x8x16xf32>
    %c2_117 = arith.constant 2 : index
    %c0_118 = arith.constant 0 : index
    %c1_119 = arith.constant 1 : index
    %c0_120 = arith.constant 0 : index
    %95 = vector.load %arg11[%c2_117, %c0_118, %c1_119, %c0_120] : memref<4x9x9x16xf32, #tpu.memory_space<vmem>>, vector<1x8x8x16xf32>
    %96 = vector.shape_cast %95 : vector<1x8x8x16xf32> to vector<8x8x16xf32>
    %c0_121 = arith.constant 0 : index
    %c1_122 = arith.constant 1 : index
    %c0_123 = arith.constant 0 : index
    %c0_124 = arith.constant 0 : index
    %97 = vector.load %arg11[%c0_121, %c1_122, %c0_123, %c0_124] : memref<4x9x9x16xf32, #tpu.memory_space<vmem>>, vector<1x8x8x16xf32>
    %98 = vector.shape_cast %97 : vector<1x8x8x16xf32> to vector<8x8x16xf32>
    %c1_125 = arith.constant 1 : index
    %c1_126 = arith.constant 1 : index
    %c0_127 = arith.constant 0 : index
    %c0_128 = arith.constant 0 : index
    %99 = vector.load %arg11[%c1_125, %c1_126, %c0_127, %c0_128] : memref<4x9x9x16xf32, #tpu.memory_space<vmem>>, vector<1x8x8x16xf32>
    %100 = vector.shape_cast %99 : vector<1x8x8x16xf32> to vector<8x8x16xf32>
    %c0_129 = arith.constant 0 : index
    %c1_130 = arith.constant 1 : index
    %c1_131 = arith.constant 1 : index
    %c0_132 = arith.constant 0 : index
    %101 = vector.load %arg11[%c0_129, %c1_130, %c1_131, %c0_132] : memref<4x9x9x16xf32, #tpu.memory_space<vmem>>, vector<1x8x8x16xf32>
    %102 = vector.shape_cast %101 : vector<1x8x8x16xf32> to vector<8x8x16xf32>
    %c2_133 = arith.constant 2 : index
    %c1_134 = arith.constant 1 : index
    %c0_135 = arith.constant 0 : index
    %c0_136 = arith.constant 0 : index
    %103 = vector.load %arg11[%c2_133, %c1_134, %c0_135, %c0_136] : memref<4x9x9x16xf32, #tpu.memory_space<vmem>>, vector<1x8x8x16xf32>
    %104 = vector.shape_cast %103 : vector<1x8x8x16xf32> to vector<8x8x16xf32>
    %c3_137 = arith.constant 3 : index
    %c1_138 = arith.constant 1 : index
    %c0_139 = arith.constant 0 : index
    %c0_140 = arith.constant 0 : index
    %105 = vector.load %arg11[%c3_137, %c1_138, %c0_139, %c0_140] : memref<4x9x9x16xf32, #tpu.memory_space<vmem>>, vector<1x8x8x16xf32>
    %106 = vector.shape_cast %105 : vector<1x8x8x16xf32> to vector<8x8x16xf32>
    %c2_141 = arith.constant 2 : index
    %c1_142 = arith.constant 1 : index
    %c1_143 = arith.constant 1 : index
    %c0_144 = arith.constant 0 : index
    %107 = vector.load %arg11[%c2_141, %c1_142, %c1_143, %c0_144] : memref<4x9x9x16xf32, #tpu.memory_space<vmem>>, vector<1x8x8x16xf32>
    %108 = vector.shape_cast %107 : vector<1x8x8x16xf32> to vector<8x8x16xf32>
    %109 = tpu.concatenate %92, %94, %96, %98, %100, %102, %104, %106, %108 in 2 : vector<8x8x16xf32>, vector<8x8x16xf32>, vector<8x8x16xf32>, vector<8x8x16xf32>, vector<8x8x16xf32>, vector<8x8x16xf32>, vector<8x8x16xf32>, vector<8x8x16xf32>, vector<8x8x16xf32> -> vector<8x8x144xf32>
    %110 = vector.shape_cast %109 : vector<8x8x144xf32> to vector<64x144xf32>
    %c3_145 = arith.constant 3 : index
    %c0_146 = arith.constant 0 : index
    %c0_147 = arith.constant 0 : index
    %c0_148 = arith.constant 0 : index
    %111 = vector.load %arg11[%c3_145, %c0_146, %c0_147, %c0_148] : memref<4x9x9x16xf32, #tpu.memory_space<vmem>>, vector<1x8x8x16xf32>
    %112 = vector.shape_cast %111 : vector<1x8x8x16xf32> to vector<8x8x16xf32>
    %c2_149 = arith.constant 2 : index
    %c0_150 = arith.constant 0 : index
    %c1_151 = arith.constant 1 : index
    %c0_152 = arith.constant 0 : index
    %113 = vector.load %arg11[%c2_149, %c0_150, %c1_151, %c0_152] : memref<4x9x9x16xf32, #tpu.memory_space<vmem>>, vector<1x8x8x16xf32>
    %114 = vector.shape_cast %113 : vector<1x8x8x16xf32> to vector<8x8x16xf32>
    %c3_153 = arith.constant 3 : index
    %c0_154 = arith.constant 0 : index
    %c1_155 = arith.constant 1 : index
    %c0_156 = arith.constant 0 : index
    %115 = vector.load %arg11[%c3_153, %c0_154, %c1_155, %c0_156] : memref<4x9x9x16xf32, #tpu.memory_space<vmem>>, vector<1x8x8x16xf32>
    %116 = vector.shape_cast %115 : vector<1x8x8x16xf32> to vector<8x8x16xf32>
    %c1_157 = arith.constant 1 : index
    %c1_158 = arith.constant 1 : index
    %c0_159 = arith.constant 0 : index
    %c0_160 = arith.constant 0 : index
    %117 = vector.load %arg11[%c1_157, %c1_158, %c0_159, %c0_160] : memref<4x9x9x16xf32, #tpu.memory_space<vmem>>, vector<1x8x8x16xf32>
    %118 = vector.shape_cast %117 : vector<1x8x8x16xf32> to vector<8x8x16xf32>
    %c0_161 = arith.constant 0 : index
    %c1_162 = arith.constant 1 : index
    %c1_163 = arith.constant 1 : index
    %c0_164 = arith.constant 0 : index
    %119 = vector.load %arg11[%c0_161, %c1_162, %c1_163, %c0_164] : memref<4x9x9x16xf32, #tpu.memory_space<vmem>>, vector<1x8x8x16xf32>
    %120 = vector.shape_cast %119 : vector<1x8x8x16xf32> to vector<8x8x16xf32>
    %c1_165 = arith.constant 1 : index
    %c1_166 = arith.constant 1 : index
    %c1_167 = arith.constant 1 : index
    %c0_168 = arith.constant 0 : index
    %121 = vector.load %arg11[%c1_165, %c1_166, %c1_167, %c0_168] : memref<4x9x9x16xf32, #tpu.memory_space<vmem>>, vector<1x8x8x16xf32>
    %122 = vector.shape_cast %121 : vector<1x8x8x16xf32> to vector<8x8x16xf32>
    %c3_169 = arith.constant 3 : index
    %c1_170 = arith.constant 1 : index
    %c0_171 = arith.constant 0 : index
    %c0_172 = arith.constant 0 : index
    %123 = vector.load %arg11[%c3_169, %c1_170, %c0_171, %c0_172] : memref<4x9x9x16xf32, #tpu.memory_space<vmem>>, vector<1x8x8x16xf32>
    %124 = vector.shape_cast %123 : vector<1x8x8x16xf32> to vector<8x8x16xf32>
    %c2_173 = arith.constant 2 : index
    %c1_174 = arith.constant 1 : index
    %c1_175 = arith.constant 1 : index
    %c0_176 = arith.constant 0 : index
    %125 = vector.load %arg11[%c2_173, %c1_174, %c1_175, %c0_176] : memref<4x9x9x16xf32, #tpu.memory_space<vmem>>, vector<1x8x8x16xf32>
    %126 = vector.shape_cast %125 : vector<1x8x8x16xf32> to vector<8x8x16xf32>
    %c3_177 = arith.constant 3 : index
    %c1_178 = arith.constant 1 : index
    %c1_179 = arith.constant 1 : index
    %c0_180 = arith.constant 0 : index
    %127 = vector.load %arg11[%c3_177, %c1_178, %c1_179, %c0_180] : memref<4x9x9x16xf32, #tpu.memory_space<vmem>>, vector<1x8x8x16xf32>
    %128 = vector.shape_cast %127 : vector<1x8x8x16xf32> to vector<8x8x16xf32>
    %129 = tpu.concatenate %112, %114, %116, %118, %120, %122, %124, %126, %128 in 2 : vector<8x8x16xf32>, vector<8x8x16xf32>, vector<8x8x16xf32>, vector<8x8x16xf32>, vector<8x8x16xf32>, vector<8x8x16xf32>, vector<8x8x16xf32>, vector<8x8x16xf32>, vector<8x8x16xf32> -> vector<8x8x144xf32>
    %130 = vector.shape_cast %129 : vector<8x8x144xf32> to vector<64x144xf32>
    %131 = tpu.concatenate %70, %90, %110, %130 in 0 : vector<64x144xf32>, vector<64x144xf32>, vector<64x144xf32>, vector<64x144xf32> -> vector<256x144xf32>
    %132 = arith.truncf %131 : vector<256x144xf32> to vector<256x144xbf16>
    %c0_181 = arith.constant 0 : index
    %c0_182 = arith.constant 0 : index
    %133 = vector.load %arg4[%c0_181, %c0_182] : memref<144x32xbf16, #tpu.memory_space<vmem>>, vector<144x32xbf16>
    %cst_183 = arith.constant dense<0.000000e+00> : vector<256x32xf32>
    %134 = tpu.matmul %132, %133, %cst_183 {dimension_numbers = #tpu.dot_dimension_numbers<[1], [0], [0], [1], [0, 0, 1, 1], [], []>} : vector<256x144xbf16>, vector<144x32xbf16>, vector<256x32xf32> -> vector<256x32xf32>
    %c0_184 = arith.constant 0 : index
    %c0_185 = arith.constant 0 : index
    %135 = vector.load %arg5[%c0_184, %c0_185] : memref<1x32xf32, #tpu.memory_space<vmem>>, vector<1x32xf32>
    %136 = vector.broadcast %135 : vector<1x32xf32> to vector<256x32xf32>
    %137 = arith.addf %134, %136 : vector<256x32xf32>
    %138 = arith.negf %137 : vector<256x32xf32>
    %139 = math.exp %138 : vector<256x32xf32>
    %cst_186 = arith.constant 1.000000e+00 : f32
    %140 = vector.broadcast %cst_186 : f32 to vector<256x32xf32>
    %141 = arith.addf %140, %139 : vector<256x32xf32>
    %142 = arith.divf %140, %141 : vector<256x32xf32>
    %143 = arith.mulf %137, %142 : vector<256x32xf32>
    %cst_187 = arith.constant 0.000000e+00 : f32
    %144 = vector.broadcast %cst_187 : f32 to vector<1x8x32xf32>
    %cst_188 = arith.constant 0.000000e+00 : f32
    %145 = vector.broadcast %cst_188 : f32 to vector<9x1x32xf32>
    %146 = vector.extract_strided_slice %143 {offsets = [192, 0], sizes = [64, 32], strides = [1, 1]} : vector<256x32xf32> to vector<64x32xf32>
    %147 = vector.shape_cast %146 : vector<64x32xf32> to vector<8x8x32xf32>
    %148 = tpu.concatenate %144, %147 in 0 : vector<1x8x32xf32>, vector<8x8x32xf32> -> vector<9x8x32xf32>
    %c0_189 = arith.constant 0 : index
    %c0_190 = arith.constant 0 : index
    %c1_191 = arith.constant 1 : index
    %c0_192 = arith.constant 0 : index
    %149 = vector.load %arg12[%c0_189, %c0_190, %c1_191, %c0_192] : memref<4x9x9x32xf32, #tpu.memory_space<vmem>>, vector<1x9x8x32xf32>
    %150 = vector.shape_cast %149 : vector<1x9x8x32xf32> to vector<9x8x32xf32>
    %151 = vector.shape_cast %148 : vector<9x8x32xf32> to vector<1x9x8x32xf32>
    tpu.vector_store %arg12[%c0_189, %c0_190, %c1_191, %c0_192], %151 {strides = array<i32>} : memref<4x9x9x32xf32, #tpu.memory_space<vmem>>, vector<1x9x8x32xf32>,
    %c0_193 = arith.constant 0 : index
    %c0_194 = arith.constant 0 : index
    %c0_195 = arith.constant 0 : index
    %c0_196 = arith.constant 0 : index
    %152 = vector.load %arg12[%c0_193, %c0_194, %c0_195, %c0_196] : memref<4x9x9x32xf32, #tpu.memory_space<vmem>>, vector<1x9x1x32xf32>
    %153 = vector.shape_cast %152 : vector<1x9x1x32xf32> to vector<9x1x32xf32>
    %154 = vector.shape_cast %145 : vector<9x1x32xf32> to vector<1x9x1x32xf32>
    tpu.vector_store %arg12[%c0_193, %c0_194, %c0_195, %c0_196], %154 {strides = array<i32>} : memref<4x9x9x32xf32, #tpu.memory_space<vmem>>, vector<1x9x1x32xf32>,
    %155 = vector.extract_strided_slice %143 {offsets = [128, 0], sizes = [64, 32], strides = [1, 1]} : vector<256x32xf32> to vector<64x32xf32>
    %156 = vector.shape_cast %155 : vector<64x32xf32> to vector<8x8x32xf32>
    %157 = tpu.concatenate %144, %156 in 0 : vector<1x8x32xf32>, vector<8x8x32xf32> -> vector<9x8x32xf32>
    %c1_197 = arith.constant 1 : index
    %c0_198 = arith.constant 0 : index
    %c0_199 = arith.constant 0 : index
    %c0_200 = arith.constant 0 : index
    %158 = vector.load %arg12[%c1_197, %c0_198, %c0_199, %c0_200] : memref<4x9x9x32xf32, #tpu.memory_space<vmem>>, vector<1x9x8x32xf32>
    %159 = vector.shape_cast %158 : vector<1x9x8x32xf32> to vector<9x8x32xf32>
    %160 = vector.shape_cast %157 : vector<9x8x32xf32> to vector<1x9x8x32xf32>
    tpu.vector_store %arg12[%c1_197, %c0_198, %c0_199, %c0_200], %160 {strides = array<i32>} : memref<4x9x9x32xf32, #tpu.memory_space<vmem>>, vector<1x9x8x32xf32>,
    %c1_201 = arith.constant 1 : index
    %c0_202 = arith.constant 0 : index
    %c8_203 = arith.constant 8 : index
    %c0_204 = arith.constant 0 : index
    %161 = vector.load %arg12[%c1_201, %c0_202, %c8_203, %c0_204] : memref<4x9x9x32xf32, #tpu.memory_space<vmem>>, vector<1x9x1x32xf32>
    %162 = vector.shape_cast %161 : vector<1x9x1x32xf32> to vector<9x1x32xf32>
    %163 = vector.shape_cast %145 : vector<9x1x32xf32> to vector<1x9x1x32xf32>
    tpu.vector_store %arg12[%c1_201, %c0_202, %c8_203, %c0_204], %163 {strides = array<i32>} : memref<4x9x9x32xf32, #tpu.memory_space<vmem>>, vector<1x9x1x32xf32>,
    %164 = vector.extract_strided_slice %143 {offsets = [64, 0], sizes = [64, 32], strides = [1, 1]} : vector<256x32xf32> to vector<64x32xf32>
    %165 = vector.shape_cast %164 : vector<64x32xf32> to vector<8x8x32xf32>
    %166 = tpu.concatenate %165, %144 in 0 : vector<8x8x32xf32>, vector<1x8x32xf32> -> vector<9x8x32xf32>
    %c2_205 = arith.constant 2 : index
    %c0_206 = arith.constant 0 : index
    %c1_207 = arith.constant 1 : index
    %c0_208 = arith.constant 0 : index
    %167 = vector.load %arg12[%c2_205, %c0_206, %c1_207, %c0_208] : memref<4x9x9x32xf32, #tpu.memory_space<vmem>>, vector<1x9x8x32xf32>
    %168 = vector.shape_cast %167 : vector<1x9x8x32xf32> to vector<9x8x32xf32>
    %169 = vector.shape_cast %166 : vector<9x8x32xf32> to vector<1x9x8x32xf32>
    tpu.vector_store %arg12[%c2_205, %c0_206, %c1_207, %c0_208], %169 {strides = array<i32>} : memref<4x9x9x32xf32, #tpu.memory_space<vmem>>, vector<1x9x8x32xf32>,
    %c2_209 = arith.constant 2 : index
    %c0_210 = arith.constant 0 : index
    %c0_211 = arith.constant 0 : index
    %c0_212 = arith.constant 0 : index
    %170 = vector.load %arg12[%c2_209, %c0_210, %c0_211, %c0_212] : memref<4x9x9x32xf32, #tpu.memory_space<vmem>>, vector<1x9x1x32xf32>
    %171 = vector.shape_cast %170 : vector<1x9x1x32xf32> to vector<9x1x32xf32>
    %172 = vector.shape_cast %145 : vector<9x1x32xf32> to vector<1x9x1x32xf32>
    tpu.vector_store %arg12[%c2_209, %c0_210, %c0_211, %c0_212], %172 {strides = array<i32>} : memref<4x9x9x32xf32, #tpu.memory_space<vmem>>, vector<1x9x1x32xf32>,
    %173 = vector.extract_strided_slice %143 {offsets = [0, 0], sizes = [64, 32], strides = [1, 1]} : vector<256x32xf32> to vector<64x32xf32>
    %174 = vector.shape_cast %173 : vector<64x32xf32> to vector<8x8x32xf32>
    %175 = tpu.concatenate %174, %144 in 0 : vector<8x8x32xf32>, vector<1x8x32xf32> -> vector<9x8x32xf32>
    %c3_213 = arith.constant 3 : index
    %c0_214 = arith.constant 0 : index
    %c0_215 = arith.constant 0 : index
    %c0_216 = arith.constant 0 : index
    %176 = vector.load %arg12[%c3_213, %c0_214, %c0_215, %c0_216] : memref<4x9x9x32xf32, #tpu.memory_space<vmem>>, vector<1x9x8x32xf32>
    %177 = vector.shape_cast %176 : vector<1x9x8x32xf32> to vector<9x8x32xf32>
    %178 = vector.shape_cast %175 : vector<9x8x32xf32> to vector<1x9x8x32xf32>
    tpu.vector_store %arg12[%c3_213, %c0_214, %c0_215, %c0_216], %178 {strides = array<i32>} : memref<4x9x9x32xf32, #tpu.memory_space<vmem>>, vector<1x9x8x32xf32>,
    %c3_217 = arith.constant 3 : index
    %c0_218 = arith.constant 0 : index
    %c8_219 = arith.constant 8 : index
    %c0_220 = arith.constant 0 : index
    %179 = vector.load %arg12[%c3_217, %c0_218, %c8_219, %c0_220] : memref<4x9x9x32xf32, #tpu.memory_space<vmem>>, vector<1x9x1x32xf32>
    %180 = vector.shape_cast %179 : vector<1x9x1x32xf32> to vector<9x1x32xf32>
    %181 = vector.shape_cast %145 : vector<9x1x32xf32> to vector<1x9x1x32xf32>
    tpu.vector_store %arg12[%c3_217, %c0_218, %c8_219, %c0_220], %181 {strides = array<i32>} : memref<4x9x9x32xf32, #tpu.memory_space<vmem>>, vector<1x9x1x32xf32>,
    %c0_221 = arith.constant 0 : index
    %c0_222 = arith.constant 0 : index
    %c0_223 = arith.constant 0 : index
    %c0_224 = arith.constant 0 : index
    %182 = vector.load %arg12[%c0_221, %c0_222, %c0_223, %c0_224] : memref<4x9x9x32xf32, #tpu.memory_space<vmem>>, vector<1x8x8x32xf32>
    %183 = vector.shape_cast %182 : vector<1x8x8x32xf32> to vector<8x8x32xf32>
    %c1_225 = arith.constant 1 : index
    %c0_226 = arith.constant 0 : index
    %c0_227 = arith.constant 0 : index
    %c0_228 = arith.constant 0 : index
    %184 = vector.load %arg12[%c1_225, %c0_226, %c0_227, %c0_228] : memref<4x9x9x32xf32, #tpu.memory_space<vmem>>, vector<1x8x8x32xf32>
    %185 = vector.shape_cast %184 : vector<1x8x8x32xf32> to vector<8x8x32xf32>
    %c0_229 = arith.constant 0 : index
    %c0_230 = arith.constant 0 : index
    %c1_231 = arith.constant 1 : index
    %c0_232 = arith.constant 0 : index
    %186 = vector.load %arg12[%c0_229, %c0_230, %c1_231, %c0_232] : memref<4x9x9x32xf32, #tpu.memory_space<vmem>>, vector<1x8x8x32xf32>
    %187 = vector.shape_cast %186 : vector<1x8x8x32xf32> to vector<8x8x32xf32>
    %c2_233 = arith.constant 2 : index
    %c0_234 = arith.constant 0 : index
    %c0_235 = arith.constant 0 : index
    %c0_236 = arith.constant 0 : index
    %188 = vector.load %arg12[%c2_233, %c0_234, %c0_235, %c0_236] : memref<4x9x9x32xf32, #tpu.memory_space<vmem>>, vector<1x8x8x32xf32>
    %189 = vector.shape_cast %188 : vector<1x8x8x32xf32> to vector<8x8x32xf32>
    %c3_237 = arith.constant 3 : index
    %c0_238 = arith.constant 0 : index
    %c0_239 = arith.constant 0 : index
    %c0_240 = arith.constant 0 : index
    %190 = vector.load %arg12[%c3_237, %c0_238, %c0_239, %c0_240] : memref<4x9x9x32xf32, #tpu.memory_space<vmem>>, vector<1x8x8x32xf32>
    %191 = vector.shape_cast %190 : vector<1x8x8x32xf32> to vector<8x8x32xf32>
    %c2_241 = arith.constant 2 : index
    %c0_242 = arith.constant 0 : index
    %c1_243 = arith.constant 1 : index
    %c0_244 = arith.constant 0 : index
    %192 = vector.load %arg12[%c2_241, %c0_242, %c1_243, %c0_244] : memref<4x9x9x32xf32, #tpu.memory_space<vmem>>, vector<1x8x8x32xf32>
    %193 = vector.shape_cast %192 : vector<1x8x8x32xf32> to vector<8x8x32xf32>
    %c0_245 = arith.constant 0 : index
    %c1_246 = arith.constant 1 : index
    %c0_247 = arith.constant 0 : index
    %c0_248 = arith.constant 0 : index
    %194 = vector.load %arg12[%c0_245, %c1_246, %c0_247, %c0_248] : memref<4x9x9x32xf32, #tpu.memory_space<vmem>>, vector<1x8x8x32xf32>
    %195 = vector.shape_cast %194 : vector<1x8x8x32xf32> to vector<8x8x32xf32>
    %c1_249 = arith.constant 1 : index
    %c1_250 = arith.constant 1 : index
    %c0_251 = arith.constant 0 : index
    %c0_252 = arith.constant 0 : index
    %196 = vector.load %arg12[%c1_249, %c1_250, %c0_251, %c0_252] : memref<4x9x9x32xf32, #tpu.memory_space<vmem>>, vector<1x8x8x32xf32>
    %197 = vector.shape_cast %196 : vector<1x8x8x32xf32> to vector<8x8x32xf32>
    %c0_253 = arith.constant 0 : index
    %c1_254 = arith.constant 1 : index
    %c1_255 = arith.constant 1 : index
    %c0_256 = arith.constant 0 : index
    %198 = vector.load %arg12[%c0_253, %c1_254, %c1_255, %c0_256] : memref<4x9x9x32xf32, #tpu.memory_space<vmem>>, vector<1x8x8x32xf32>
    %199 = vector.shape_cast %198 : vector<1x8x8x32xf32> to vector<8x8x32xf32>
    %200 = tpu.concatenate %183, %185, %187, %189, %191, %193, %195, %197, %199 in 2 : vector<8x8x32xf32>, vector<8x8x32xf32>, vector<8x8x32xf32>, vector<8x8x32xf32>, vector<8x8x32xf32>, vector<8x8x32xf32>, vector<8x8x32xf32>, vector<8x8x32xf32>, vector<8x8x32xf32> -> vector<8x8x288xf32>
    %201 = vector.shape_cast %200 : vector<8x8x288xf32> to vector<64x288xf32>
    %202 = arith.truncf %201 : vector<64x288xf32> to vector<64x288xbf16>
    %c0_257 = arith.constant 0 : index
    %c0_258 = arith.constant 0 : index
    %203 = vector.load %arg6[%c0_257, %c0_258] : memref<288x64xbf16, #tpu.memory_space<vmem>>, vector<288x64xbf16>
    %cst_259 = arith.constant dense<0.000000e+00> : vector<64x64xf32>
    %204 = tpu.matmul %202, %203, %cst_259 {dimension_numbers = #tpu.dot_dimension_numbers<[1], [0], [0], [1], [0, 0, 1, 1], [], []>} : vector<64x288xbf16>, vector<288x64xbf16>, vector<64x64xf32> -> vector<64x64xf32>
    %c0_260 = arith.constant 0 : index
    %c0_261 = arith.constant 0 : index
    %205 = vector.load %arg7[%c0_260, %c0_261] : memref<1x64xf32, #tpu.memory_space<vmem>>, vector<1x64xf32>
    %206 = vector.broadcast %205 : vector<1x64xf32> to vector<64x64xf32>
    %207 = arith.addf %204, %206 : vector<64x64xf32>
    %208 = arith.negf %207 : vector<64x64xf32>
    %209 = math.exp %208 : vector<64x64xf32>
    %cst_262 = arith.constant 1.000000e+00 : f32
    %210 = vector.broadcast %cst_262 : f32 to vector<64x64xf32>
    %211 = arith.addf %210, %209 : vector<64x64xf32>
    %212 = arith.divf %210, %211 : vector<64x64xf32>
    %213 = arith.mulf %207, %212 : vector<64x64xf32>
    %214 = arith.truncf %213 : vector<64x64xf32> to vector<64x64xbf16>
    %c0_263 = arith.constant 0 : index
    %c0_264 = arith.constant 0 : index
    %215 = vector.load %arg8[%c0_263, %c0_264] : memref<64x128xbf16, #tpu.memory_space<vmem>>, vector<64x128xbf16>
    %cst_265 = arith.constant dense<0.000000e+00> : vector<64x128xf32>
    %216 = tpu.matmul %214, %215, %cst_265 {dimension_numbers = #tpu.dot_dimension_numbers<[1], [0], [0], [1], [0, 0, 1, 1], [], []>} : vector<64x64xbf16>, vector<64x128xbf16>, vector<64x128xf32> -> vector<64x128xf32>
    %c0_266 = arith.constant 0 : index
    %c0_267 = arith.constant 0 : index
    %217 = vector.load %arg9[%c0_266, %c0_267] : memref<1x128xf32, #tpu.memory_space<vmem>>, vector<1x128xf32>
    %218 = vector.broadcast %217 : vector<1x128xf32> to vector<64x128xf32>
    %219 = arith.addf %216, %218 : vector<64x128xf32>
    %220 = arith.negf %219 : vector<64x128xf32>
    %221 = math.exp %220 : vector<64x128xf32>
    %cst_268 = arith.constant 1.000000e+00 : f32
    %222 = vector.broadcast %cst_268 : f32 to vector<64x128xf32>
    %223 = arith.addf %222, %221 : vector<64x128xf32>
    %224 = arith.divf %222, %223 : vector<64x128xf32>
    %225 = arith.mulf %219, %224 : vector<64x128xf32>
    %c0_269 = arith.constant 0 : index
    %c0_270 = arith.constant 0 : index
    %c0_271 = arith.constant 0 : index
    %226 = vector.load %arg10[%c0_269, %c0_270, %c0_271] : memref<1x64x128xf32, #tpu.memory_space<vmem>>, vector<1x64x128xf32>
    %227 = vector.shape_cast %226 : vector<1x64x128xf32> to vector<64x128xf32>
    %228 = vector.shape_cast %225 : vector<64x128xf32> to vector<1x64x128xf32>
    tpu.vector_store %arg10[%c0_269, %c0_270, %c0_271], %228 {strides = array<i32>} : memref<1x64x128xf32, #tpu.memory_space<vmem>>, vector<1x64x128xf32>,
    return
  }
  func.func @transform_0(%arg0: i32) -> (i32, i32, i32) {
    %c0_i32 = arith.constant 0 : i32
    %c0_i32_0 = arith.constant 0 : i32
    %c0_i32_1 = arith.constant 0 : i32
    return %arg0, %c0_i32, %c0_i32_0 : i32, i32, i32
  }
  func.func @transform_1(%arg0: i32) -> (i32, i32) {
    %c0_i32 = arith.constant 0 : i32
    %c0_i32_0 = arith.constant 0 : i32
    %c0_i32_1 = arith.constant 0 : i32
    return %c0_i32, %c0_i32_0 : i32, i32
  }
  func.func @transform_2(%arg0: i32) -> (i32, i32) {
    %c0_i32 = arith.constant 0 : i32
    %c0_i32_0 = arith.constant 0 : i32
    %c0_i32_1 = arith.constant 0 : i32
    return %c0_i32, %c0_i32_0 : i32, i32
  }
  func.func @transform_3(%arg0: i32) -> (i32, i32) {
    %c0_i32 = arith.constant 0 : i32
    %c0_i32_0 = arith.constant 0 : i32
    %c0_i32_1 = arith.constant 0 : i32
    return %c0_i32, %c0_i32_0 : i32, i32
  }
  func.func @transform_4(%arg0: i32) -> (i32, i32) {
    %c0_i32 = arith.constant 0 : i32
    %c0_i32_0 = arith.constant 0 : i32
    %c0_i32_1 = arith.constant 0 : i32
    return %c0_i32, %c0_i32_0 : i32, i32
  }
  func.func @transform_5(%arg0: i32) -> (i32, i32) {
    %c0_i32 = arith.constant 0 : i32
    %c0_i32_0 = arith.constant 0 : i32
    %c0_i32_1 = arith.constant 0 : i32
    return %c0_i32, %c0_i32_0 : i32, i32
  }
  func.func @transform_6(%arg0: i32) -> (i32, i32) {
    %c0_i32 = arith.constant 0 : i32
    %c0_i32_0 = arith.constant 0 : i32
    %c0_i32_1 = arith.constant 0 : i32
    return %c0_i32, %c0_i32_0 : i32, i32
  }
  func.func @transform_7(%arg0: i32) -> (i32, i32) {
    %c0_i32 = arith.constant 0 : i32
    %c0_i32_0 = arith.constant 0 : i32
    %c0_i32_1 = arith.constant 0 : i32
    return %c0_i32, %c0_i32_0 : i32, i32
  }
  func.func @transform_8(%arg0: i32) -> (i32, i32) {
    %c0_i32 = arith.constant 0 : i32
    %c0_i32_0 = arith.constant 0 : i32
    %c0_i32_1 = arith.constant 0 : i32
    return %c0_i32, %c0_i32_0 : i32, i32
  }
  func.func @transform_9(%arg0: i32) -> (i32, i32, i32) {
    %c0_i32 = arith.constant 0 : i32
    %c0_i32_0 = arith.constant 0 : i32
    %c0_i32_1 = arith.constant 0 : i32
    return %arg0, %c0_i32, %c0_i32_0 : i32, i32, i32
  }
}

</mosaic_0001>

<bundles_post_ra>
// kernel: timm_backbone_forward.1
= control target key start
LH: loop header
LB: loop body
LE: loop exit
PB: predicated region body
PF: predicated region fallthrough
CT: control target
= control target key end

     0   :  { %14 = vsyncpa [#allocation5], 0  ;;  %s7304_s0 = inlined_call_operand.vmem [shape: bf16[2,256,72], index: 0, kind: input, shape index: {}]   ;;  %s7305_s1 = inlined_call_operand.vmem [shape: bf16[72,16], index: 1, kind: input, shape index: {}]   ;;  %s7306_s2 = inlined_call_operand.vmem [shape: f32[1,16], index: 2, kind: input, shape index: {}]   ;;  %s7307_s3 = inlined_call_operand.vmem [shape: bf16[144,32], index: 3, kind: input, shape index: {}]   ;;  %s7308_s4 = inlined_call_operand.vmem [shape: f32[1,32], index: 4, kind: input, shape index: {}]   ;;  %s7309_s5 = inlined_call_operand.vmem [shape: bf16[288,64], index: 5, kind: input, shape index: {}]   ;;  %s7310_s6 = inlined_call_operand.vmem [shape: f32[1,64], index: 6, kind: input, shape index: {}]   ;;  %s7311_s7 = inlined_call_operand.vmem [shape: bf16[64,128], index: 7, kind: input, shape index: {}]   ;;  %s7312_s8 = inlined_call_operand.vmem [shape: f32[1,128], index: 8, kind: input, shape index: {}]   ;;  %s7313_s9 = inlined_call_operand.hbm [shape: f32[2,64,128], index: 9, kind: output, shape index: {}]  }
   0x1   :  { %16 = vsyncpa [#allocation5 + $0x1], 0  ;;  %s5283_s30 = smov 0   ;;  %s5285_s10 = smov 0  }
   0x2   :  { %s5287_s11 = smov 0   ;;  %s5289_s12 = smov 0  }
   0x3 LB: > { %s5304_s13 = sadd.s32 4294967295, %s5219_s12   ;;  %s3703_s14 = sadd.s32 4294967294, %s5219_s12   ;;  %s5219_s12 = sphi %s5289_s12, %s7449_s12   ;;  %s5215_s11 = sphi %s5287_s11, %s7448_s11   ;;  %s5211_s10 = sphi %s5285_s10, %s7447_s10   ;;  %s5207_s30 = sphi %s5283_s30, %s7446_s30  }
   0x4   : > { %s5308_s15 = sadd.s32 1, %s5219_s12   ;;  %s223_s16 = sadd.s32 1, %s5215_s11 }
   0x5   : > { %s220_s17 = ssub.s32 %s5219_s12, %s5308_s15  ;;  %p233_p0 = scmp.ne.s32.totalorder %s5215_s11, %s5211_s10 }
   0x6   : > { %p221_p1 = scmp.eq.s32.totalorder %s220_s17, 0  ;;  %p234_p2 = scmp.eq.s32.totalorder %s5304_s13, 1 }
   0x7   : > { %p239_p3 = scmp.ne.s32.totalorder %s5211_s10, %s5207_s30  ;;  %p240_p4 = scmp.eq.s32.totalorder %s3703_s14, 1 }
   0x8   : > { %s5319_s18 = scalar_select %p221_p1, %s5215_s11, %s223_s16  }
   0x9   : > { %p5321_p5 = por %p234_p2, %p233_p0  ;;  %p5325_p6 = por %p240_p4, %p239_p3 }
   0xa   : > { %p3706_p7 = scmp.ge.s32.totalorder %s5219_s12, 1  ;;  %p290_p8 = scmp.lt.s32.totalorder %s5219_s12, 3 }
   0xc   : > { %p291_p9 = pnand %p3706_p7, %p290_p8 }
   0xe   : > { %294 = sbr.rel (%p291_p9) target bundleno = 1540 (0x604), region = 56 }
  0x15   : > { %v4769_v0 = vld [vmem:[%s7305_s1] sm:$0xff]   ;;  %v4770_v1 = vld [vmem:[%s7305_s1 + $0x8] sm:$0xff]   ;;  %p326_p10 = scmp.lt.s32.totalorder %s5304_s13, 1  ;;  %v4771_v2 = vld [vmem:[%s7305_s1 + $0x10] sm:$0xff]   ;;  %vm487_vm0 = vcmask 588800   ;;  %vm536_vm1 = vcmask 1043456  }
  0x16   : > { %3968 = vmatprep.subr.bf16.mxu0 %v4769_v0  ;;  %v4772_v4 = vld [vmem:[%s7305_s1 + $0x18] sm:$0xff]   ;;  %v4773_v5 = vld [vmem:[%s7305_s1 + $0x20] ss:$0 sps:$4 sm:$0xff]   ;;  %vm925_vm2 = vcmask 130048   ;;  %vm935_vm3 = vcmask 122880   ;;  %v7314_v22 = vmov 0.0  }
  0x17   : > { %3969 = vmatpush3.bf16.msra.mxu0 %v4769_v0  ;;  %s327_s25 = scalar_select %p326_p10, %s5304_s13, 1  ;;  %v538_v6 = vsel %vm536_vm1, %v4773_v5, 0  ;;  %995 = vst.msk [vmem:[#allocation2 + $0x1d8] sm:$0x1] %vm935_vm3, %v7314_v22  ;;  %996 = vst.msk [vmem:[#allocation2 + $0x1e8] sm:$0x1] %vm935_vm3, %v7314_v22 }
  0x18   : > { %3970 = vmatprep.subr.bf16.mxu0 %v4770_v1  ;;  %926 = vst.msk [vmem:[#allocation2 + $0x1] sm:$0xff] %vm925_vm2, %v7314_v22  ;;  %946 = vst.msk [vmem:[#allocation2 + $0x90] sm:$0xff] %vm925_vm2, %v7314_v22  ;;  %v5468_v23 = vld [vmem:[%s7306_s2] ss:$0 sm:$0xff]  ;;  %s5222_s26 = smov 48   ;;  %s5223_s27 = smov 64  }
  0x19   : > { %s3891_s28 = sshll.u32 %s327_s25, 7  ;;  %936 = vst.msk [vmem:[#allocation2] sm:$0x1] %vm935_vm3, %v7314_v22  ;;  %937 = vst.msk [vmem:[#allocation2 + $0x10] sm:$0x1] %vm935_vm3, %v7314_v22  ;;  %s5225_s29 = smov 16  }
  0x1a   : > { %s5345_s16 = scalar_lea.vmem %s7304_s0, %s3891_s28  ;;  %938 = vst.msk [vmem:[#allocation2 + $0x20] sm:$0x1] %vm935_vm3, %v7314_v22  ;;  %939 = vst.msk [vmem:[#allocation2 + $0x30] sm:$0x1] %vm935_vm3, %v7314_v22  ;;  %s5224_s28 = smov 80   ;;  %vm1308_vm4 = vcmask 261120  }
  0x1b   : > { %3971 = vmatpush3.bf16.msra.mxu0 %v4770_v1  ;;  %v4774_v3 = vld [vmem:[%s5345_s16] sm:$0xff]   ;;  %v4775_v7 = vld [vmem:[%s5345_s16 + $0x8] sm:$0xff]   ;;  %v4776_v8 = vld [vmem:[%s5345_s16 + $0x10] sm:$0xff]   ;;  %940 = vst.msk [vmem:[#allocation2 + $0x40] sm:$0x1] %vm935_vm3, %v7314_v22  ;;  %s5226_s14 = smov 32  }
  0x1c   : > { %3972 = vmatprep.subr.bf16.mxu0 %v4771_v2  ;;  %3978 = vmatprep.mubr.msk.bf16.mxu0 %vm487_vm0, %v4774_v3  ;;  %v4777_v9 = vld [vmem:[%s5345_s16 + $0x18] sm:$0xff]   ;;  %v4778_v10 = vld [vmem:[%s5345_s16 + $0x20] sm:$0xff]   ;;  %v4779_v11 = vld [vmem:[%s5345_s16 + $0x28] sm:$0xff]   ;;  %941 = vst.msk [vmem:[#allocation2 + $0x50] sm:$0x1] %vm935_vm3, %v7314_v22  ;;  %s5229_s22 = smov 112  }
  0x1d   : > { %v4780_v12 = vld [vmem:[%s5345_s16 + $0x30] sm:$0xff]   ;;  %v4781_v13 = vld [vmem:[%s5345_s16 + $0x38] sm:$0xff]   ;;  %v4782_v14 = vld [vmem:[%s5345_s16 + $0x40] sm:$0xff]   ;;  %942 = vst.msk [vmem:[#allocation2 + $0x60] sm:$0x1] %vm935_vm3, %v7314_v22  ;;  %vm1317_vm5 = vcmask 392192  }
  0x1e   : > { %v4783_v15 = vld [vmem:[%s5345_s16 + $0x48] sm:$0xff]   ;;  %v4784_v16 = vld [vmem:[%s5345_s16 + $0x50] sm:$0xff]   ;;  %v4785_v17 = vld [vmem:[%s5345_s16 + $0x58] sm:$0xff]   ;;  %943 = vst.msk [vmem:[#allocation2 + $0x70] sm:$0x1] %vm935_vm3, %v7314_v22  ;;  %vm1326_vm6 = vcmask 523264  }
  0x1f   : > { %3973 = vmatpush3.bf16.msra.mxu0 %v4771_v2  ;;  %v4786_v18 = vld [vmem:[%s5345_s16 + $0x60] sm:$0xff]   ;;  %v4787_v19 = vld [vmem:[%s5345_s16 + $0x68] sm:$0xff]   ;;  %v4788_v20 = vld [vmem:[%s5345_s16 + $0x70] sm:$0xff]   ;;  %944 = vst.msk [vmem:[#allocation2 + $0x80] sm:$0x1] %vm935_vm3, %v7314_v22  ;;  %vm1335_vm7 = vcmask 654336  }
  0x20   : > { %3974 = vmatprep.subr.bf16.mxu0 %v4772_v4  ;;  %v4789_v21 = vld [vmem:[%s5345_s16 + $0x78] sm:$0xff]   ;;  %955 = vst.msk [vmem:[#allocation2 + $0x98] sm:$0x1] %vm935_vm3, %v7314_v22  ;;  %956 = vst.msk [vmem:[#allocation2 + $0xa8] sm:$0x1] %vm935_vm3, %v7314_v22  ;;  %s5227_s16 = smov 96  }
  0x21   : > { %957 = vst.msk [vmem:[#allocation2 + $0xb8] sm:$0x1] %vm935_vm3, %v7314_v22  ;;  %958 = vst.msk [vmem:[#allocation2 + $0xc8] sm:$0x1] %vm935_vm3, %v7314_v22  ;;  %vm1344_vm8 = vcmask 785408   ;;  %vm1353_vm9 = vcmask 916480  }
  0x22   : > { %959 = vst.msk [vmem:[#allocation2 + $0xd8] sm:$0x1] %vm935_vm3, %v7314_v22  ;;  %960 = vst.msk [vmem:[#allocation2 + $0xe8] sm:$0x1] %vm935_vm3, %v7314_v22  ;;  %vm2701_vm10 = vcmask 253952   ;;  %s5230_s23 = smov [#allocation4]  }
  0x23   : > { %3975 = vmatpush3.bf16.msra.mxu0 %v4772_v4  ;;  %961 = vst.msk [vmem:[#allocation2 + $0xf8] sm:$0x1] %vm935_vm3, %v7314_v22  ;;  %962 = vst.msk [vmem:[#allocation2 + $0x108] sm:$0x1] %vm935_vm3, %v7314_v22 }
  0x24   : > { %4038 = vmatprep.subr.msk.bf16.mxu0 %vm536_vm1, %v4773_v5  ;;  %963 = vst.msk [vmem:[#allocation2 + $0x118] sm:$0x1] %vm935_vm3, %v7314_v22  ;;  %974 = vst.msk [vmem:[#allocation2 + $0x120] sm:$0x1] %vm935_vm3, %v7314_v22 }
  0x25   : > { %973 = vst.msk [vmem:[#allocation2 + $0x1a1] sm:$0xff] %vm925_vm2, %v7314_v22  ;;  %992 = vst.msk [vmem:[#allocation2 + $0x230] sm:$0xff] %vm925_vm2, %v7314_v22 }
  0x26   : > { %975 = vst.msk [vmem:[#allocation2 + $0x130] sm:$0x1] %vm935_vm3, %v7314_v22  ;;  %976 = vst.msk [vmem:[#allocation2 + $0x140] sm:$0x1] %vm935_vm3, %v7314_v22 }
  0x27   : > { %3977 = vmatpush3.bf16.msra.mxu0 %v538_v6  ;;  %977 = vst.msk [vmem:[#allocation2 + $0x150] sm:$0x1] %vm935_vm3, %v7314_v22  ;;  %978 = vst.msk [vmem:[#allocation2 + $0x160] sm:$0x1] %vm935_vm3, %v7314_v22 }
  0x28   : > { %979 = vst.msk [vmem:[#allocation2 + $0x170] sm:$0x1] %vm935_vm3, %v7314_v22  ;;  %980 = vst.msk [vmem:[#allocation2 + $0x180] sm:$0x1] %vm935_vm3, %v7314_v22 }
  0x29   : > { %981 = vst.msk [vmem:[#allocation2 + $0x190] sm:$0x1] %vm935_vm3, %v7314_v22  ;;  %982 = vst.msk [vmem:[#allocation2 + $0x1a0] sm:$0x1] %vm935_vm3, %v7314_v22 }
  0x2a   : > { %3979 = vmatmul.mubr.msk.bf16.vlgmr.msra.gmra.mrb[0].mxu0 %vm487_vm0, %v4775_v7  ;;  %993 = vst.msk [vmem:[#allocation2 + $0x1b8] sm:$0x1] %vm935_vm3, %v7314_v22  ;;  %994 = vst.msk [vmem:[#allocation2 + $0x1c8] sm:$0x1] %vm935_vm3, %v7314_v22 }
  0x2b   : > { %3982 = vmatprep.mubr.msk.bf16.mxu0 %vm487_vm0, %v4776_v8  ;;  %997 = vst.msk [vmem:[#allocation2 + $0x1f8] sm:$0x1] %vm935_vm3, %v7314_v22  ;;  %998 = vst.msk [vmem:[#allocation2 + $0x208] sm:$0x1] %vm935_vm3, %v7314_v22 }
  0x2c   : > { %999 = vst.msk [vmem:[#allocation2 + $0x218] sm:$0x1] %vm935_vm3, %v7314_v22  ;;  %1000 = vst.msk [vmem:[#allocation2 + $0x228] sm:$0x1] %vm935_vm3, %v7314_v22 }
  0x2d   : > { %1001 = vst.msk [vmem:[#allocation2 + $0x238] sm:$0x1] %vm935_vm3, %v7314_v22 }
  0x2e   : > { %2692 = vst.msk [vmem:[#allocation3 + $0x1] sm:$0xff] %vm1308_vm4, %v7314_v22  ;;  %2712 = vst.msk [vmem:[#allocation3 + $0x90] sm:$0xff] %vm1308_vm4, %v7314_v22 }
  0x32   : > { %3983 = vmatmul.mubr.msk.bf16.gmra.mrb[4].mxu0 %vm487_vm0, %v4777_v9 }
  0x33   : > { %3986 = vmatprep.mubr.msk.bf16.mxu0 %vm487_vm0, %v4778_v10 }
  0x3a   : > { %3987 = vmatmul.mubr.msk.bf16.gmra.mrb[8].mxu0 %vm487_vm0, %v4779_v11 }
  0x3b   : > { %3990 = vmatprep.mubr.msk.bf16.mxu0 %vm487_vm0, %v4780_v12 }
  0x42   : > { %3991 = vmatmul.mubr.msk.bf16.gmra.mrb[12].mxu0 %vm487_vm0, %v4781_v13 }
  0x43   : > { %3994 = vmatprep.mubr.msk.bf16.mxu0 %vm487_vm0, %v4782_v14 }
  0x4a   : > { %3995 = vmatmul.mubr.msk.bf16.gmra.mrb[16].mxu0 %vm487_vm0, %v4783_v15 }
  0x4b   : > { %3998 = vmatprep.mubr.msk.bf16.mxu0 %vm487_vm0, %v4784_v16 }
  0x52   : > { %3999 = vmatmul.mubr.msk.bf16.gmra.mrb[20].mxu0 %vm487_vm0, %v4785_v17 }
  0x53   : > { %4002 = vmatprep.mubr.msk.bf16.mxu0 %vm487_vm0, %v4786_v18 }
  0x5a   : > { %4003 = vmatmul.mubr.msk.bf16.gmra.mrb[24].mxu0 %vm487_vm0, %v4787_v19 }
  0x5b   : > { %4006 = vmatprep.mubr.msk.bf16.mxu0 %vm487_vm0, %v4788_v20 }
  0x62   : > { %4007 = vmatmul.mubr.msk.bf16.gmra.mrb[28].mxu0 %vm487_vm0, %v4789_v21 }
  0xfd   : > { %v3980_v24 = vpop.f32.mrb[0].mxu0 }
  0xfe   : > { %v5471_v25 = vadd.f32 %v3980_v24, %v5468_v23  ;;  %v574_v26 = vpop.f32.mrb[1].mxu0 }
  0xff   : > { %v5474_v27 = vadd.f32 %v5468_v23, %v574_v26  ;;  %v3981_v28 = vpop.f32.mrb[2].mxu0 }
 0x100   : > { %v3750_v29 = vmul.f32 -1.442695, %v5471_v25  ;;  %v5478_v30 = vadd.f32 %v3981_v28, %v5468_v23  ;;  %v577_v31 = vpop.f32.mrb[3].mxu0 }
 0x101   : > { %v3748_v32 = vmul.f32 -1.442695, %v5474_v27  ;;  %v5482_v33 = vadd.f32 %v5468_v23, %v577_v31 }
 0x102   : > { %4821 = vpow2.f32 %v3750_v29  ;;  %v3751_v34 = vmul.f32 -1.442695, %v5478_v30 }
 0x103   : > { %4823 = vpow2.f32 %v3748_v32  ;;  %v3749_v35 = vmul.f32 -1.442695, %v5482_v33 }
 0x104   : > { %4825 = vpow2.f32 %v3751_v34 }
 0x105   : > { %4827 = vpow2.f32 %v3749_v35  ;;  %v3984_v36 = vpop.f32.mrb[4].mxu0 }
 0x106   : > { %v5487_v37 = vadd.f32 %v3984_v36, %v5468_v23  ;;  %v590_v38 = vpop.f32.mrb[5].mxu0 }
 0x107   : > { %v5490_v39 = vadd.f32 %v5468_v23, %v590_v38  ;;  %v3985_v40 = vpop.f32.mrb[6].mxu0 }
 0x108   : > { %v3754_v41 = vmul.f32 -1.442695, %v5487_v37  ;;  %v5494_v42 = vadd.f32 %v3985_v40, %v5468_v23  ;;  %v593_v43 = vpop.f32.mrb[7].mxu0 }
 0x109   : > { %v3752_v44 = vmul.f32 -1.442695, %v5490_v39  ;;  %v5498_v45 = vadd.f32 %v5468_v23, %v593_v43 }
 0x10a   : > { %4829 = vpow2.f32 %v3754_v41  ;;  %v3755_v46 = vmul.f32 -1.442695, %v5494_v42 }
 0x10b   : > { %4831 = vpow2.f32 %v3752_v44  ;;  %v3753_v47 = vmul.f32 -1.442695, %v5498_v45 }
 0x10c   : > { %v4822_v48 = vpop.eup %4821  ;;  %4833 = vpow2.f32 %v3755_v46 }
 0x10d   : > { %v4824_v49 = vpop.eup %4823  ;;  %v799_v50 = vadd.f32 1.0, %v4822_v48  ;;  %4835 = vpow2.f32 %v3753_v47  ;;  %v3988_v51 = vpop.f32.mrb[8].mxu0 }
 0x10e   : > { %v4826_v52 = vpop.eup %4825  ;;  %v797_v53 = vadd.f32 1.0, %v4824_v49  ;;  %v5503_v54 = vadd.f32 %v3988_v51, %v5468_v23  ;;  %v606_v55 = vpop.f32.mrb[9].mxu0 }
 0x10f   : > { %v4828_v56 = vpop.eup %4827  ;;  %4837 = vrcp.f32 %v799_v50  ;;  %v800_v57 = vadd.f32 1.0, %v4826_v52  ;;  %v5506_v58 = vadd.f32 %v5468_v23, %v606_v55  ;;  %v3989_v59 = vpop.f32.mrb[10].mxu0 }
 0x110   : > { %4839 = vrcp.f32 %v797_v53  ;;  %v798_v60 = vadd.f32 1.0, %v4828_v56  ;;  %v3758_v61 = vmul.f32 -1.442695, %v5503_v54  ;;  %v5510_v62 = vadd.f32 %v3989_v59, %v5468_v23  ;;  %v609_v63 = vpop.f32.mrb[11].mxu0 }
 0x111   : > { %4841 = vrcp.f32 %v800_v57  ;;  %v3756_v0 = vmul.f32 -1.442695, %v5506_v58  ;;  %v5514_v1 = vadd.f32 %v5468_v23, %v609_v63 }
 0x112   : > { %4843 = vrcp.f32 %v798_v60  ;;  %v3759_v2 = vmul.f32 -1.442695, %v5510_v62 }
 0x113   : > { %4845 = vpow2.f32 %v3758_v61  ;;  %v3757_v3 = vmul.f32 -1.442695, %v5514_v1 }
 0x114   : > { %v4830_v4 = vpop.eup %4829  ;;  %4847 = vpow2.f32 %v3756_v0 }
 0x115   : > { %v4832_v5 = vpop.eup %4831  ;;  %v803_v6 = vadd.f32 1.0, %v4830_v4  ;;  %4849 = vpow2.f32 %v3759_v2  ;;  %v3992_v7 = vpop.f32.mrb[12].mxu0 }
 0x116   : > { %v4834_v8 = vpop.eup %4833  ;;  %v801_v9 = vadd.f32 1.0, %v4832_v5  ;;  %4851 = vpow2.f32 %v3757_v3  ;;  %v5519_v10 = vadd.f32 %v3992_v7, %v5468_v23  ;;  %v622_v11 = vpop.f32.mrb[13].mxu0 }
 0x117   : > { %v4836_v12 = vpop.eup %4835  ;;  %4853 = vrcp.f32 %v803_v6  ;;  %v804_v13 = vadd.f32 1.0, %v4834_v8  ;;  %v5522_v14 = vadd.f32 %v5468_v23, %v622_v11  ;;  %v3993_v15 = vpop.f32.mrb[14].mxu0 }
 0x118   : > { %4855 = vrcp.f32 %v801_v9  ;;  %v802_v16 = vadd.f32 1.0, %v4836_v12  ;;  %v3762_v17 = vmul.f32 -1.442695, %v5519_v10  ;;  %v5526_v18 = vadd.f32 %v3993_v15, %v5468_v23  ;;  %v625_v19 = vpop.f32.mrb[15].mxu0 }
 0x119   : > { %v4838_v20 = vpop.eup %4837  ;;  %4857 = vrcp.f32 %v804_v13  ;;  %v3760_v21 = vmul.f32 -1.442695, %v5522_v14  ;;  %v5530_v24 = vadd.f32 %v5468_v23, %v625_v19 }
 0x11a   : > { %v4840_v26 = vpop.eup %4839  ;;  %v895_v28 = vmul.f32 %v4838_v20, %v5471_v25  ;;  %4859 = vrcp.f32 %v802_v16  ;;  %v3763_v29 = vmul.f32 -1.442695, %v5526_v18 }
 0x11b   : > { %v4842_v31 = vpop.eup %4841  ;;  %v893_v32 = vmul.f32 %v4840_v26, %v5474_v27  ;;  %4861 = vpow2.f32 %v3762_v17  ;;  %v3761_v34 = vmul.f32 -1.442695, %v5530_v24 }
 0x11c   : > { %v4844_v35 = vpop.eup %4843  ;;  %986 = vst.msk [vmem:[#allocation2 + $0x1d0] sm:$0xff] %vm925_vm2, %v895_v28  ;;  %v896_v36 = vmul.f32 %v4842_v31, %v5478_v30  ;;  %4863 = vpow2.f32 %v3760_v21 }
 0x11d   : > { %v4846_v38 = vpop.eup %4845  ;;  %984 = vst.msk [vmem:[#allocation2 + $0x1b0] sm:$0xff] %vm925_vm2, %v893_v32  ;;  %v894_v25 = vmul.f32 %v4844_v35, %v5482_v33  ;;  %4865 = vpow2.f32 %v3763_v29  ;;  %v3996_v40 = vpop.f32.mrb[16].mxu0 }
 0x11e   : > { %v4848_v41 = vpop.eup %4847  ;;  %987 = vst.msk [vmem:[#allocation2 + $0x1e0] sm:$0xff] %vm925_vm2, %v896_v36  ;;  %v807_v27 = vadd.f32 1.0, %v4846_v38  ;;  %4867 = vpow2.f32 %v3761_v34  ;;  %v5542_v43 = vadd.f32 %v3996_v40, %v5468_v23  ;;  %v638_v44 = vpop.f32.mrb[17].mxu0 }
 0x11f   : > { %v4850_v46 = vpop.eup %4849  ;;  %985 = vst.msk [vmem:[#allocation2 + $0x1c0] sm:$0xff] %vm925_vm2, %v894_v25  ;;  %v805_v30 = vadd.f32 1.0, %v4848_v41  ;;  %v5546_v47 = vadd.f32 %v5468_v23, %v638_v44  ;;  %v3997_v48 = vpop.f32.mrb[18].mxu0 }
 0x120   : > { %v4852_v33 = vpop.eup %4851  ;;  %4869 = vrcp.f32 %v807_v27  ;;  %v808_v49 = vadd.f32 1.0, %v4850_v46  ;;  %v3766_v50 = vmul.f32 -1.442695, %v5542_v43  ;;  %v5550_v51 = vadd.f32 %v3997_v48, %v5468_v23  ;;  %v641_v52 = vpop.f32.mrb[19].mxu0 }
 0x121   : > { %v4854_v53 = vpop.eup %4853  ;;  %4871 = vrcp.f32 %v805_v30  ;;  %v806_v55 = vadd.f32 1.0, %v4852_v33  ;;  %v3764_v56 = vmul.f32 -1.442695, %v5546_v47  ;;  %v5554_v57 = vadd.f32 %v5468_v23, %v641_v52 }
 0x122   : > { %v4856_v59 = vpop.eup %4855  ;;  %v899_v60 = vmul.f32 %v4854_v53, %v5487_v37  ;;  %4873 = vrcp.f32 %v808_v49  ;;  %v3767_v61 = vmul.f32 -1.442695, %v5550_v51 }
 0x123   : > { %v4858_v63 = vpop.eup %4857  ;;  %v897_v0 = vmul.f32 %v4856_v59, %v5490_v39  ;;  %4875 = vrcp.f32 %v806_v55  ;;  %v3765_v2 = vmul.f32 -1.442695, %v5554_v57  ;;  %v5564_v7 = vld [vmem:[#allocation2 + $0x1d0] sm:$0xff] }
 0x124   : > { %v4860_v3 = vpop.eup %4859  ;;  %990 = vst.msk [vmem:[#allocation2 + $0x210] sm:$0xff] %vm925_vm2, %v899_v60  ;;  %v900_v4 = vmul.f32 %v4858_v63, %v5494_v42  ;;  %4877 = vpow2.f32 %v3766_v50  ;;  %v1372_v35 = vld [vmem:[#allocation2 + $0x1d1] sm:$0xff] }
 0x125   : > { %v4862_v5 = vpop.eup %4861  ;;  %988 = vst.msk [vmem:[#allocation2 + $0x1f0] sm:$0xff] %vm925_vm2, %v897_v0  ;;  %v898_v37 = vmul.f32 %v4860_v3, %v5498_v45  ;;  %4879 = vpow2.f32 %v3764_v56  ;;  %v4000_v6 = vpop.f32.mrb[20].mxu0  ;;  %v5566_v8 = vld [vmem:[#allocation2 + $0x1e0] sm:$0xff]  ;;  %v1034_v36 = vld [vmem:[#allocation2 + $0x1b0] sm:$0xff] }
 0x126   : > { %v4864_v39 = vpop.eup %4863  ;;  %991 = vst.msk [vmem:[#allocation2 + $0x220] sm:$0xff] %vm925_vm2, %v900_v4  ;;  %v811_v9 = vadd.f32 1.0, %v4862_v5  ;;  %4881 = vpow2.f32 %v3767_v61  ;;  %v5570_v11 = vadd.f32 %v4000_v6, %v5468_v23  ;;  %v654_v42 = vpop.f32.mrb[21].mxu0  ;;  %v5574_v12 = vpack.i.bf16 %v5566_v8, %v5564_v7  ;;  %v1373_v17 = vld [vmem:[#allocation2 + $0x1e1] sm:$0xff]  ;;  %v1370_v48 = vld [vmem:[#allocation2 + $0x1b1] sm:$0xff] }
 0x127   : > { %v4866_v45 = vpop.eup %4865  ;;  %989 = vst.msk [vmem:[#allocation2 + $0x200] sm:$0xff] %vm925_vm2, %v898_v37  ;;  %v809_v13 = vadd.f32 1.0, %v4864_v39  ;;  %4883 = vpow2.f32 %v3765_v2  ;;  %v5578_v15 = vadd.f32 %v5468_v23, %v654_v42  ;;  %v4001_v16 = vpop.f32.mrb[22].mxu0  ;;  %v5580_v19 = vld [vmem:[#allocation2 + $0x1c0] sm:$0xff]  ;;  %v5595_v41 = vpack.i.bf16 %v1373_v17, %v1372_v35 }
 0x128   : > { %v4868_v20 = vpop.eup %4867  ;;  %4885 = vrcp.f32 %v811_v9  ;;  %v812_v21 = vadd.f32 1.0, %v4866_v45  ;;  %v3770_v26 = vmul.f32 -1.442695, %v5570_v11  ;;  %v5584_v28 = vadd.f32 %v4001_v16, %v5468_v23  ;;  %4095 = vrot.lane.b32.xlu1 %v5574_v12, %s5222_s26  ;;  %4090 = vrot.lane.b32.xlu0 %v5574_v12, %s5223_s27  ;;  %v657_v29 = vpop.f32.mrb[23].mxu0  ;;  %v1371_v38 = vld [vmem:[#allocation2 + $0x1c1] sm:$0xff] }
 0x129   : > { %4887 = vrcp.f32 %v809_v13  ;;  %v810_v31 = vadd.f32 1.0, %v4868_v20  ;;  %v3768_v32 = vmul.f32 -1.442695, %v5578_v15  ;;  %v5592_v34 = vadd.f32 %v5468_v23, %v657_v29 }
 0x12a   : > { %v4870_v25 = vpop.eup %4869  ;;  %4889 = vrcp.f32 %v812_v21  ;;  %v3771_v40 = vmul.f32 -1.442695, %v5584_v28  ;;  %v5598_v27 = vpack.i.bf16 %v5580_v19, %v1034_v36  ;;  %v5607_v50 = vpack.i.bf16 %v1371_v38, %v1370_v48 }
 0x12b   : > { %v4872_v44 = vpop.eup %4871  ;;  %v903_v46 = vmul.f32 %v4870_v25, %v5503_v54  ;;  %4891 = vrcp.f32 %v810_v31  ;;  %v3769_v30 = vmul.f32 -1.442695, %v5592_v34  ;;  %v1376_v61 = vld [vmem:[#allocation2 + $0x211] sm:$0xff] }
 0x12c   : > { %v4874_v33 = vpop.eup %4873  ;;  %v901_v49 = vmul.f32 %v4872_v44, %v5506_v58  ;;  %4893 = vpow2.f32 %v3770_v26  ;;  %4100 = vrot.lane.b32.xlu1 %v5595_v41, %s5224_s28  ;;  %4110 = vrot.lane.b32.xlu0 %v5598_v27, %s5222_s26  ;;  %v5636_v16 = vld [vmem:[#allocation2 + $0x210] sm:$0xff] }
 0x12d   : > { %v4876_v52 = vpop.eup %4875  ;;  %967 = vst.msk [vmem:[#allocation2 + $0x141] sm:$0xff] %vm925_vm2, %v903_v46  ;;  %v904_v54 = vmul.f32 %v4874_v33, %v5510_v62  ;;  %4895 = vpow2.f32 %v3768_v32  ;;  %v4004_v53 = vpop.f32.mrb[24].mxu0  ;;  %v1377_v55 = vld [vmem:[#allocation2 + $0x221] sm:$0xff]  ;;  %v1374_v29 = vld [vmem:[#allocation2 + $0x1f1] sm:$0xff] }
 0x12e   : > { %v4878_v56 = vpop.eup %4877  ;;  %965 = vst.msk [vmem:[#allocation2 + $0x121] sm:$0xff] %vm925_vm2, %v901_v49  ;;  %v902_v58 = vmul.f32 %v4876_v52, %v5514_v1  ;;  %4897 = vpow2.f32 %v3771_v40  ;;  %v5614_v59 = vadd.f32 %v4004_v53, %v5468_v23  ;;  %v670_v60 = vpop.f32.mrb[25].mxu0  ;;  %v5620_v3 = vld [vmem:[#allocation2 + $0x220] sm:$0xff]  ;;  %v5622_v4 = vpack.i.bf16 %v1377_v55, %v1376_v61  ;;  %v5671_v55 = vld [vmem:[#allocation2 + $0x1f0] sm:$0xff] }
 0x12f   : > { %v4880_v63 = vpop.eup %4879  ;;  %968 = vst.msk [vmem:[#allocation2 + $0x151] sm:$0xff] %vm925_vm2, %v904_v54  ;;  %v815_v0 = vadd.f32 1.0, %v4878_v56  ;;  %4899 = vpow2.f32 %v3769_v30  ;;  %v5618_v62 = vadd.f32 %v5468_v23, %v670_v60  ;;  %v4005_v2 = vpop.f32.mrb[26].mxu0  ;;  %v1375_v39 = vld [vmem:[#allocation2 + $0x201] sm:$0xff]  ;;  %v5641_v26 = vpack.i.bf16 %v5620_v3, %v5636_v16 }
 0x130   : > { %v4882_v1 = vpop.eup %4881  ;;  %966 = vst.msk [vmem:[#allocation2 + $0x131] sm:$0xff] %vm925_vm2, %v902_v58  ;;  %v813_v5 = vadd.f32 1.0, %v4880_v63  ;;  %4115 = vrot.lane.b32.xlu0 %v5607_v50, %s5224_s28  ;;  %4105 = vrot.lane.b32.xlu1 %v5598_v27, %s5223_s27  ;;  %v5630_v37 = vadd.f32 %v4005_v2, %v5468_v23  ;;  %v673_v6 = vpop.f32.mrb[27].mxu0  ;;  %v3774_v45 = vmul.f32 -1.442695, %v5614_v59  ;;  %v5645_v36 = vpack.i.bf16 %v1375_v39, %v1374_v29  ;;  %v5660_v33 = vld [vmem:[#allocation2 + $0x200] sm:$0xff] }
 0x131   : > { %v4884_v9 = vpop.eup %4883  ;;  %4901 = vrcp.f32 %v815_v0  ;;  %v816_v42 = vadd.f32 1.0, %v4882_v1  ;;  %v5634_v13 = vadd.f32 %v5468_v23, %v673_v6  ;;  %v3772_v21 = vmul.f32 -1.442695, %v5618_v62 }
 0x132   : > { %v4886_v17 = vpop.eup %4885  ;;  %4903 = vrcp.f32 %v813_v5  ;;  %v814_v20 = vadd.f32 1.0, %v4884_v9  ;;  %v3775_v35 = vmul.f32 -1.442695, %v5630_v37  ;;  %v5678_v0 = vpack.i.bf16 %v5660_v33, %v5671_v55 }
 0x133   : > { %v4888_v31 = vpop.eup %4887  ;;  %v907_v32 = vmul.f32 %v4886_v17, %v5519_v10  ;;  %4905 = vrcp.f32 %v816_v42  ;;  %v3773_v40 = vmul.f32 -1.442695, %v5634_v13 }
 0x134   : > { %v4890_v38 = vpop.eup %4889  ;;  %v905_v25 = vmul.f32 %v4888_v31, %v5522_v14  ;;  %4907 = vrcp.f32 %v814_v20  ;;  %4120 = vrot.lane.b32.xlu0 %v5598_v27, %s5225_s29  ;;  %4130 = vrot.lane.b32.xlu1 %v5641_v26, %s5222_s26  ;;  %v5681_v5 = vld [vmem:[#allocation2 + $0x141] sm:$0xff] }
 0x135   : > { %v4892_v44 = vpop.eup %4891  ;;  %971 = vst.msk [vmem:[#allocation2 + $0x181] sm:$0xff] %vm925_vm2, %v907_v32  ;;  %v908_v10 = vmul.f32 %v4890_v38, %v5526_v18  ;;  %4909 = vpow2.f32 %v3774_v45  ;;  %v4008_v46 = vpop.f32.mrb[28].mxu0  ;;  %7356 = vst [vmem:[#allocation8_spill] sm:$0xff] %v5681_v5  ;;  %v5702_v32 = vld [vmem:[#allocation2 + $0x140] sm:$0xff] }
 0x136   : > { %v4894_v30 = vpop.eup %4893  ;;  %969 = vst.msk [vmem:[#allocation2 + $0x161] sm:$0xff] %vm925_vm2, %v905_v25  ;;  %v906_v14 = vmul.f32 %v4892_v44, %v5530_v24  ;;  %4911 = vpow2.f32 %v3772_v21  ;;  %v5658_v48 = vadd.f32 %v4008_v46, %v5468_v23  ;;  %v686_v27 = vpop.f32.mrb[29].mxu0  ;;  %v5686_v9 = vld [vmem:[#allocation2 + $0x150] sm:$0xff] }
 0x137   : > { %v4896_v49 = vpop.eup %4895  ;;  %972 = vst.msk [vmem:[#allocation2 + $0x191] sm:$0xff] %vm925_vm2, %v908_v10  ;;  %v819_v52 = vadd.f32 1.0, %v4894_v30  ;;  %4913 = vpow2.f32 %v3775_v35  ;;  %v5664_v18 = vadd.f32 %v5468_v23, %v686_v27  ;;  %v4009_v54 = vpop.f32.mrb[30].mxu0  ;;  %v5673_v56 = vld [vmem:[#allocation2 + $0x131] sm:$0xff]  ;;  %v4154_v44 = vpack.i.bf16 %v5686_v9, %v5702_v32 }
 0x138   : > { %v4898_v53 = vpop.eup %4897  ;;  %970 = vst.msk [vmem:[#allocation2 + $0x171] sm:$0xff] %vm925_vm2, %v906_v14  ;;  %v817_v24 = vadd.f32 1.0, %v4896_v49  ;;  %4915 = vpow2.f32 %v3773_v40  ;;  %4125 = vrot.lane.b32.xlu0 %v5641_v26, %s5223_s27  ;;  %4135 = vrot.lane.b32.xlu1 %v5622_v4, %s5224_s28  ;;  %7355 = vst [vmem:[#allocation7_spill] sm:$0xff] %v5673_v56  ;;  %v689_v58 = vpop.f32.mrb[31].mxu0  ;;  %v3778_v63 = vmul.f32 -1.442695, %v5658_v48  ;;  %v5684_v6 = vadd.f32 %v4009_v54, %v5468_v23 }
 0x139   : > { %v4900_v60 = vpop.eup %4899  ;;  %4917 = vrcp.f32 %v819_v52  ;;  %v820_v61 = vadd.f32 1.0, %v4898_v53  ;;  %v3776_v1 = vmul.f32 -1.442695, %v5664_v18  ;;  %v5689_v42 = vadd.f32 %v5468_v23, %v689_v58  ;;  %v5704_v35 = vld [vmem:[#allocation2 + $0x151] sm:$0xff]  ;;  %v5730_v53 = vld [vmem:[#allocation2 + $0x1a1] sm:$0xff] }
 0x13a   : > { %4919 = vrcp.f32 %v817_v24  ;;  %v818_v2 = vadd.f32 1.0, %v4900_v60  ;;  %v3779_v21 = vmul.f32 -1.442695, %v5684_v6  ;;  %7357 = vst [vmem:[#allocation9_spill] sm:$0xff] %v5704_v35  ;;  %v5734_v60 = vpack.i.bf16 %v5704_v35, %v5681_v5 }
 0x13b   : > { %v4902_v39 = vpop.eup %4901  ;;  %4921 = vrcp.f32 %v820_v61 }
 0x13c   : > { %v4904_v17 = vpop.eup %4903  ;;  %v911_v20 = vmul.f32 %v4902_v39, %v5542_v43  ;;  %4923 = vrcp.f32 %v818_v2  ;;  %4145 = vrot.lane.b32.xlu0 %v5678_v0, %s5222_s26  ;;  %4140 = vrot.lane.b32.xlu1 %v5678_v0, %s5223_s27  ;;  %v3777_v43 = vmul.f32 -1.442695, %v5689_v42  ;;  %v5724_v52 = vld [vmem:[#allocation2 + $0x181] sm:$0xff] }
 0x13d   : > { %v4906_v23 = vpop.eup %4905  ;;  %v909_v31 = vmul.f32 %v4904_v17, %v5546_v47  ;;  %4925 = vpow2.f32 %v3778_v63  ;;  %v5707_v38 = vld [vmem:[#allocation2 + $0x161] sm:$0xff]  ;;  %v4792_v47 = vld [vmem:[%s7307_s3 + $0x10] sm:$0xff]  }
 0x13e   : > { %7358 = vst [vmem:[#allocation10_spill] sm:$0xff] %v5707_v38  ;;  %v4908_v25 = vpop.eup %4907  ;;  %949 = vst.msk [vmem:[#allocation2 + $0xc0] sm:$0xff] %vm925_vm2, %v911_v20  ;;  %v912_v40 = vmul.f32 %v4906_v23, %v5550_v51  ;;  %4927 = vpow2.f32 %v3776_v1  ;;  %v5728_v54 = vld [vmem:[#allocation2 + $0x191] sm:$0xff] }
 0x13f   : > { %v4910_v10 = vpop.eup %4909  ;;  %947 = vst.msk [vmem:[#allocation2 + $0xa0] sm:$0xff] %vm925_vm2, %v909_v31  ;;  %v910_v46 = vmul.f32 %v4908_v25, %v5554_v57  ;;  %4929 = vpow2.f32 %v3779_v21  ;;  %v5717_v30 = vld [vmem:[#allocation2 + $0x171] sm:$0xff] }
 0x140   : > { %v4912_v14 = vpop.eup %4911  ;;  %950 = vst.msk [vmem:[#allocation2 + $0xd0] sm:$0xff] %vm925_vm2, %v912_v40  ;;  %v823_v27 = vadd.f32 1.0, %v4910_v10  ;;  %4150 = vrot.lane.b32.xlu0 %v5645_v36, %s5224_s28  ;;  %4155 = vrot.lane.b32.xlu1 %v4154_v44, %s5222_s26  ;;  %4931 = vpow2.f32 %v3777_v43  ;;  %v5738_v1 = vld [vmem:[#allocation2 + $0x130] sm:$0xff]  ;;  %v1026_v43 = vld [vmem:[#allocation2 + $0x120] sm:$0xff] }
 0x141   : > { %v4914_v51 = vpop.eup %4913  ;;  %948 = vst.msk [vmem:[#allocation2 + $0xb0] sm:$0xff] %vm925_vm2, %v910_v46  ;;  %v821_v49 = vadd.f32 1.0, %v4912_v14  ;;  %v4169_v10 = vpack.i.bf16 %v5738_v1, %v1026_v43  ;;  %v1049_v46 = vld [vmem:[#allocation2 + $0x191] sm:$0xff]  ;;  %v4791_v43 = vld [vmem:[%s7307_s3 + $0x8] sm:$0xff]  }
 0x142   : > { %v4916_v24 = vpop.eup %4915  ;;  %4933 = vrcp.f32 %v823_v27  ;;  %v824_v58 = vadd.f32 1.0, %v4914_v51 }
 0x143   : > { %v4918_v63 = vpop.eup %4917  ;;  %4935 = vrcp.f32 %v821_v49  ;;  %v822_v2 = vadd.f32 1.0, %v4916_v24 }
 0x144   : > { %v4920_v17 = vpop.eup %4919  ;;  %v915_v20 = vmul.f32 %v4918_v63, %v5570_v11  ;;  %4937 = vrcp.f32 %v824_v58  ;;  %4165 = vrot.lane.b32.xlu0 %v5734_v60, %s5223_s27  ;;  %4160 = vrot.lane.b32.xlu1 %v5734_v60, %s5224_s28  ;;  %v1042_v11 = vld [vmem:[#allocation2 + $0x121] sm:$0xff] }
 0x145   : > { %v4922_v23 = vpop.eup %4921  ;;  %v913_v31 = vmul.f32 %v4920_v17, %v5578_v15  ;;  %4939 = vrcp.f32 %v822_v2  ;;  %v5757_v44 = vpack.i.bf16 %v5673_v56, %v1042_v11  ;;  %v5762_v15 = vld [vmem:[#allocation2 + $0xc1] sm:$0xff]  ;;  %v5778_v17 = vpack.i.bf16 %v1049_v46, %v5724_v52 }
 0x146   : > { %v4924_v25 = vpop.eup %4923  ;;  %953 = vst.msk [vmem:[#allocation2 + $0x100] sm:$0xff] %vm925_vm2, %v915_v20  ;;  %v916_v40 = vmul.f32 %v4922_v23, %v5584_v28  ;;  %7359 = vst [vmem:[#allocation11_spill] sm:$0xff] %v5762_v15  ;;  %v5780_v20 = vld [vmem:[#allocation2 + $0xa1] sm:$0xff] }
 0x147   : > { %v4926_v14 = vpop.eup %4925  ;;  %951 = vst.msk [vmem:[#allocation2 + $0xe0] sm:$0xff] %vm925_vm2, %v913_v31  ;;  %v914_v27 = vmul.f32 %v4924_v25, %v5592_v34  ;;  %v5764_v51 = vld [vmem:[#allocation2 + $0xd1] sm:$0xff] }
 0x148   : > { %7360 = vst [vmem:[#allocation12_spill] sm:$0xff] %v5764_v51  ;;  %v4928_v49 = vpop.eup %4927  ;;  %954 = vst.msk [vmem:[#allocation2 + $0x110] sm:$0xff] %vm925_vm2, %v916_v40  ;;  %v827_v24 = vadd.f32 1.0, %v4926_v14  ;;  %4175 = vrot.lane.b32.xlu0 %v5757_v44, %s5224_s28  ;;  %4170 = vrot.lane.b32.xlu1 %v4169_v10, %s5222_s26  ;;  %v5770_v28 = vld [vmem:[#allocation2 + $0xb1] sm:$0xff] }
 0x149   : > { %v4930_v63 = vpop.eup %4929  ;;  %952 = vst.msk [vmem:[#allocation2 + $0xf0] sm:$0xff] %vm925_vm2, %v914_v27  ;;  %v825_v2 = vadd.f32 1.0, %v4928_v49  ;;  %v5786_v40 = vld [vmem:[#allocation2 + $0x170] sm:$0xff]  ;;  %v5793_v27 = vld [vmem:[#allocation2 + $0x160] sm:$0xff]  ;;  %v4254_v61 = vpack.i.bf16 %v5762_v15, %v5770_v28 }
 0x14a   : > { %v4932_v23 = vpop.eup %4931  ;;  %4941 = vrcp.f32 %v827_v24  ;;  %v828_v31 = vadd.f32 1.0, %v4930_v63  ;;  %v4204_v63 = vpack.i.bf16 %v5786_v40, %v5793_v27 }
 0x14b   : > { %4943 = vrcp.f32 %v825_v2  ;;  %v826_v25 = vadd.f32 1.0, %v4932_v23 }
 0x14c   : > { %v4934_v10 = vpop.eup %4933  ;;  %4945 = vrcp.f32 %v828_v31  ;;  %4200 = vrot.lane.b32.xlu0 %v5778_v17, %s5223_s27  ;;  %4180 = vrot.lane.b32.xlu1 %v5757_v44, %s5223_s27  ;;  %v5800_v31 = vld [vmem:[#allocation2 + $0x190] sm:$0xff] }
 0x14d   : > { %v4936_v46 = vpop.eup %4935  ;;  %v919_v14 = vmul.f32 %v4934_v10, %v5614_v59  ;;  %4947 = vrcp.f32 %v826_v25  ;;  %v5812_v10 = vld [vmem:[#allocation2 + $0x180] sm:$0xff] }
 0x14e   : > { %v4938_v49 = vpop.eup %4937  ;;  %v917_v24 = vmul.f32 %v4936_v46, %v5618_v62  ;;  %v5809_v25 = vld [vmem:[#allocation2 + $0xe1] sm:$0xff]  ;;  %v4189_v46 = vpack.i.bf16 %v5800_v31, %v5812_v10 }
 0x14f   : > { %v4940_v2 = vpop.eup %4939  ;;  %929 = vst.msk [vmem:[#allocation2 + $0x31] sm:$0xff] %vm925_vm2, %v919_v14  ;;  %v920_v23 = vmul.f32 %v4938_v49, %v5630_v37  ;;  %7362 = vst [vmem:[#allocation14_spill] sm:$0xff] %v5809_v25  ;;  %v5825_v49 = vld [vmem:[#allocation2 + $0x90] sm:$0xff]  ;;  %v5902_v37 = vld [vmem:[#allocation2 + $0xe0] sm:$0xff] }
 0x150   : > { %927 = vst.msk [vmem:[#allocation2 + $0x11] sm:$0xff] %vm925_vm2, %v917_v24  ;;  %v918_v59 = vmul.f32 %v4940_v2, %v5634_v13  ;;  %4205 = vrot.lane.b32.xlu0 %v4204_v63, %s5222_s26  ;;  %4185 = vrot.lane.b32.xlu1 %v5757_v44, %s5226_s14  ;;  %v5807_v62 = vld [vmem:[#allocation2 + $0xf1] sm:$0xff]  ;;  %v5819_v13 = vpack.i.bf16 %v5717_v30, %v5707_v38  ;;  %7363 = vst [vmem:[#allocation15_spill] sm:$0xff] %v5825_v49  ;;  %v5827_v24 = vld [vmem:[#allocation2 + $0xa0] sm:$0xff] }
 0x151   : > { %7361 = vst [vmem:[#allocation13_spill] sm:$0xff] %v5807_v62  ;;  %930 = vst.msk [vmem:[#allocation2 + $0x41] sm:$0xff] %vm925_vm2, %v920_v23  ;;  %v4219_v21 = vpack.i.bf16 %v5827_v24, %v5825_v49  ;;  %v5840_v14 = vld [vmem:[#allocation2 + $0xd0] sm:$0xff] }
 0x152   : > { %928 = vst.msk [vmem:[#allocation2 + $0x21] sm:$0xff] %vm925_vm2, %v918_v59  ;;  %7364 = vst [vmem:[#allocation16_spill] sm:$0xff] %v5827_v24  ;;  %v1067_v58 = vld [vmem:[#allocation2 + $0x110] sm:$0xff] }
 0x153   : > { %7366 = vst [vmem:[#allocation18_spill] sm:$0xff] %v5840_v14  ;;  %7373 = vst [vmem:[#allocation25_spill] sm:$0xff] %v5902_v37  ;;  %v5926_v11 = vld [vmem:[#allocation2 + $0xf0] sm:$0xff] }
 0x154   : > { %v4942_v63 = vpop.eup %4941  ;;  %4210 = vrot.lane.b32.xlu0 %v5819_v13, %s5224_s28  ;;  %4190 = vrot.lane.b32.xlu1 %v4189_v46, %s5222_s26  ;;  %v5852_v46 = vld [vmem:[#allocation2 + $0xc0] sm:$0xff]  ;;  %7375 = vst [vmem:[#allocation27_spill] sm:$0xff] %v5926_v11 }
 0x155   : > { %v4944_v2 = vpop.eup %4943  ;;  %v923_v23 = vmul.f32 %v4942_v63, %v5658_v48  ;;  %7368 = vst [vmem:[#allocation20_spill] sm:$0xff] %v5852_v46 }
 0x156   : > { %v4946_v59 = vpop.eup %4945  ;;  %v921_v22 = vmul.f32 %v4944_v2, %v5664_v18  ;;  %v5836_v39 = vld [vmem:[#allocation2 + $0x31] sm:$0xff] }
 0x157   : > { %7365 = vst [vmem:[#allocation17_spill] sm:$0xff] %v5836_v39  ;;  %v4948_v57 = vpop.eup %4947  ;;  %933 = vst.msk [vmem:[#allocation2 + $0x71] sm:$0xff] %vm925_vm2, %v923_v23  ;;  %v924_v29 = vmul.f32 %v4946_v59, %v5684_v6  ;;  %v5842_v34 = vld [vmem:[#allocation2 + $0x11] sm:$0xff] }
 0x158   : > { %931 = vst.msk [vmem:[#allocation2 + $0x51] sm:$0xff] %vm925_vm2, %v921_v22  ;;  %v922_v48 = vmul.f32 %v4948_v57, %v5689_v42  ;;  %4220 = vrot.lane.b32.xlu0 %v4219_v21, %s5225_s29  ;;  %4195 = vrot.lane.b32.xlu1 %v5778_v17, %s5224_s28  ;;  %v5849_v18 = vld [vmem:[#allocation2 + $0x41] sm:$0xff]  ;;  %v5861_v22 = vpack.i.bf16 %v5840_v14, %v5852_v46  ;;  %v5865_v57 = vld [vmem:[#allocation2 + $0xb0] sm:$0xff] }
 0x159   : > { %7367 = vst [vmem:[#allocation19_spill] sm:$0xff] %v5849_v18  ;;  %934 = vst.msk [vmem:[#allocation2 + $0x81] sm:$0xff] %vm925_vm2, %v924_v29  ;;  %v5854_v6 = vld [vmem:[#allocation2 + $0x21] sm:$0xff]  ;;  %v1362_v21 = vld [vmem:[#allocation2 + $0x91] sm:$0xff]  ;;  %v5877_v2 = vpack.i.bf16 %v5865_v57, %v5827_v24 }
 0x15a   : > { %932 = vst.msk [vmem:[#allocation2 + $0x61] sm:$0xff] %vm925_vm2, %v922_v48  ;;  %v2149_v42 = vpack.c.bf16 %v5854_v6, %v5842_v34  ;;  %7369 = vst [vmem:[#allocation21_spill] sm:$0xff] %v5865_v57  ;;  %v4790_v29 = vld [vmem:[%s7307_s3] sm:$0xff]   ;;  %v4224_v23 = vpack.i.bf16 %v5780_v20, %v1362_v21  ;;  %v5228_v48 = vmov 0  }
 0x15b   : > { %2307 = vmatprep.subr.bf16.mxu1 %v5228_v48 }
 0x15c   : > { %4235 = vrot.lane.b32.xlu0 %v5861_v22, %s5227_s16  ;;  %4215 = vrot.lane.b32.xlu1 %v5819_v13, %s5223_s27 }
 0x15d   : > { %3790 = vmatprep.mubr.msk.bf16.mxu1 %vm925_vm2, %v2149_v42  ;;  %2308 = vmatpush1.bf16.msra.mxu1 %v4790_v29  ;;  %v4264_v29 = vpack.i.bf16 %v5902_v37, %v5840_v14  ;;  %v1018_v14 = vld [vmem:[#allocation2 + $0x1] sm:$0xff] }
 0x15e   : > { %v5880_v59 = vld [vmem:[#allocation2 + $0x71] sm:$0xff]  ;;  %2309 = vmatprep.subr.bf16.mxu1 %v5228_v48 }
 0x15f   : > { %7370 = vst [vmem:[#allocation22_spill] sm:$0xff] %v5880_v59  ;;  %v5891_v63 = vld [vmem:[#allocation2 + $0x51] sm:$0xff] }
 0x160   : > { %4240 = vrot.lane.b32.xlu0 %v5877_v2, %s5229_s22  ;;  %4225 = vrot.lane.b32.xlu1 %v4224_v23, %s5226_s14  ;;  %v5886_v42 = vld [vmem:[#allocation2 + $0x81] sm:$0xff]  ;;  %7372 = vst [vmem:[#allocation24_spill] sm:$0xff] %v5891_v63  ;;  %v4244_v23 = vpack.i.bf16 %v5852_v46, %v5865_v57  ;;  %v4304_v57 = vpack.i.bf16 %v5842_v34, %v1018_v14  ;;  %v4797_v14 = vld [vmem:[%s7307_s3 + $0x38] sm:$0xff]   ;;  %v6020_v24 = vld [vmem:[#allocation2 + $0x50] sm:$0xff] }
 0x161   : > { %7371 = vst [vmem:[#allocation23_spill] sm:$0xff] %v5886_v42  ;;  %v5893_v21 = vld [vmem:[#allocation2 + $0x61] sm:$0xff]  ;;  %2310 = vmatpush1.bf16.msra.mxu1 %v4791_v43  ;;  %v4354_v46 = vpack.i.bf16 %v5891_v63, %v5849_v18 }
 0x162   : > { %2311 = vmatprep.subr.bf16.mxu1 %v5228_v48  ;;  %v5920_v43 = vld [vmem:[#allocation2 + $0x100] sm:$0xff] }
 0x163   : > { %7374 = vst [vmem:[#allocation26_spill] sm:$0xff] %v5920_v43  ;;  %v5924_v45 = vpack.i.bf16 %v1067_v58, %v5920_v43  ;;  %v4794_v58 = vld [vmem:[%s7307_s3 + $0x20] sm:$0xff]  }
 0x164   : > { %4255 = vrot.lane.b32.xlu0 %v4254_v61, %s5226_s14  ;;  %4230 = vrot.lane.b32.xlu1 %v5861_v22, %s5229_s22  ;;  %v4793_v61 = vld [vmem:[%s7307_s3 + $0x18] sm:$0xff]   ;;  %v1058_v49 = vld [vmem:[#allocation2 + $0x80] sm:$0xff] }
 0x165   : > { %2312 = vmatpush1.bf16.msra.mxu1 %v4792_v47  ;;  %v5935_v47 = vpack.i.bf16 %v5926_v11, %v5902_v37  ;;  %v4795_v37 = vld [vmem:[%s7307_s3 + $0x28] sm:$0xff]  }
 0x166   : > { %2313 = vmatprep.subr.bf16.mxu1 %v5228_v48 }
 0x168   : > { %4265 = vrot.lane.b32.xlu0 %v4264_v29, %s5225_s29  ;;  %4245 = vrot.lane.b32.xlu1 %v4244_v23, %s5225_s29  ;;  %v5944_v29 = vld [vmem:[#allocation2 + $0x101] sm:$0xff] }
 0x169   : > { %2314 = vmatpush1.bf16.msra.mxu1 %v4793_v61  ;;  %v4299_v23 = vpack.i.bf16 %v5944_v29, %v5807_v62  ;;  %v4269_v61 = vpack.i.bf16 %v5809_v25, %v5764_v51 }
 0x16a   : > { %2315 = vmatprep.subr.bf16.mxu1 %v5228_v48 }
 0x16c   : > { %4280 = vrot.lane.b32.xlu0 %v5924_v45, %s5227_s16  ;;  %4250 = vrot.lane.b32.xlu1 %v5877_v2, %s5227_s16 }
 0x16d   : > { %2316 = vmatpush1.bf16.msra.mxu1 %v4794_v58  ;;  %v4796_v58 = vld [vmem:[%s7307_s3 + $0x30] sm:$0xff]  }
 0x16e   : > { %2317 = vmatprep.subr.bf16.mxu1 %v5228_v48 }
 0x170   : > { %4285 = vrot.lane.b32.xlu0 %v5935_v47, %s5229_s22  ;;  %4260 = vrot.lane.b32.xlu1 %v5877_v2, %s5223_s27 }
 0x171   : > { %2318 = vmatpush1.bf16.msra.mxu1 %v4795_v37  ;;  %v5967_v37 = vld [vmem:[#allocation2 + $0x30] sm:$0xff] }
 0x172   : > { %2319 = vmatprep.subr.bf16.mxu1 %v5228_v48 }
 0x174   : > { %4300 = vrot.lane.b32.xlu0 %v4299_v23, %s5226_s14  ;;  %4270 = vrot.lane.b32.xlu1 %v4269_v61, %s5226_s14  ;;  %v4289_v23 = vpack.i.bf16 %v5920_v43, %v5926_v11  ;;  %v5969_v61 = vld [vmem:[#allocation2 + $0x40] sm:$0xff]  ;;  %v6000_v43 = vpack.i.bf16 %v5854_v6, %v5842_v34  ;;  %v6016_v34 = vpack.i.bf16 %v5886_v42, %v5880_v59 }
 0x175   : > { %2320 = vmatpush1.bf16.msra.mxu1 %v4796_v58  ;;  %v4314_v58 = vpack.i.bf16 %v5969_v61, %v5967_v37  ;;  %v4798_v11 = vld [vmem:[%s7307_s3 + $0x40] sm:$0xff]  }
 0x176   : > { %2321 = vmatprep.subr.bf16.mxu1 %v5228_v48 }
 0x178   : > { %4305 = vrot.lane.b32.xlu0 %v4304_v57, %s5226_s14  ;;  %4275 = vrot.lane.b32.xlu1 %v5924_v45, %s5229_s22 }
 0x179   : > { %2322 = vmatpush1.bf16.msra.mxu1 %v4797_v14  ;;  %v5991_v14 = vld [vmem:[#allocation2 + $0x10] sm:$0xff] }
 0x17a   : > { %2323 = vmatprep.subr.bf16.mxu1 %v5228_v48  ;;  %v5993_v48 = vld [vmem:[#allocation2 + $0x20] sm:$0xff] }
 0x17c   : > { %4310 = vrot.lane.b32.xlu0 %v4304_v57, %s5225_s29  ;;  %4290 = vrot.lane.b32.xlu1 %v4289_v23, %s5225_s29  ;;  %v4329_v57 = vpack.i.bf16 %v5836_v39, %v5854_v6  ;;  %v5989_v23 = vpack.i.bf16 %v5849_v18, %v5836_v39  ;;  %v6018_v6 = vld [vmem:[#allocation2 + $0x70] sm:$0xff] }
 0x17d   : > { %2324 = vmatpush1.bf16.msra.mxu1 %v4798_v11  ;;  %v4324_v11 = vpack.i.bf16 %v5993_v48, %v5991_v14  ;;  %7376 = vst [vmem:[#allocation28_spill] sm:$0xff] %v6018_v6 }
 0x180   : > { %4315 = vrot.lane.b32.xlu0 %v4314_v58, %s5227_s16  ;;  %4295 = vrot.lane.b32.xlu1 %v5935_v47, %s5227_s16 }
 0x184   : > { %4330 = vrot.lane.b32.xlu0 %v4329_v57, %s5226_s14  ;;  %4320 = vrot.lane.b32.xlu1 %v5989_v23, %s5229_s22 }
 0x188   : > { %4335 = vrot.lane.b32.xlu0 %v6000_v43, %s5229_s22  ;;  %4325 = vrot.lane.b32.xlu1 %v4324_v11, %s5227_s16 }
 0x18c   : > { %4345 = vrot.lane.b32.xlu0 %v4324_v11, %s5222_s26  ;;  %4340 = vrot.lane.b32.xlu1 %v4329_v57, %s5225_s29  ;;  %v6022_v11 = vld [vmem:[#allocation2 + $0x60] sm:$0xff]  ;;  %v4364_v57 = vpack.i.bf16 %v1058_v49, %v6018_v6  ;;  %v4379_v49 = vpack.i.bf16 %v5702_v32, %v5738_v1 }
 0x18d   : > { %7377 = vst [vmem:[#allocation29_spill] sm:$0xff] %v6022_v11  ;;  %v6030_v39 = vpack.i.bf16 %v6022_v11, %v6020_v24 }
 0x190   : > { %4350 = vrot.lane.b32.xlu0 %v6000_v43, %s5224_s28  ;;  %4355 = vrot.lane.b32.xlu1 %v4354_v46, %s5226_s14 }
 0x194   : > { %4360 = vrot.lane.b32.xlu0 %v4354_v46, %s5225_s29  ;;  %4370 = vrot.lane.b32.xlu1 %v6016_v34, %s5229_s22  ;;  %v6041_v46 = vpack.i.bf16 %v5564_v7, %v5580_v19 }
 0x198   : > { %4365 = vrot.lane.b32.xlu0 %v4364_v57, %s5227_s16  ;;  %4375 = vrot.lane.b32.xlu1 %v6030_v39, %s5227_s16 }
 0x19a   : > { %v6035_v42 = vpop.permute.xlu1 %4095  ;;  %v6037_v18 = vpop.permute.xlu0 %4090 }
 0x19b   : > { %7378 = vst [vmem:[#allocation30_spill] sm:$0xff] %v6035_v42  ;;  %v4394_v42 = vpack.i.bf16 %v5880_v59, %v5893_v21  ;;  %v1651_v59 = vld [vmem:[#allocation2 + $0x230] sm:$0xff] }
 0x19c   : > { %4385 = vrot.lane.b32.xlu0 %v6041_v46, %s5229_s22  ;;  %4380 = vrot.lane.b32.xlu1 %v4379_v49, %s5227_s16 }
 0x19e   : > { %v6048_v11 = vpop.permute.xlu1 %4100  ;;  %v6050_v6 = vpop.permute.xlu0 %4110 }
 0x19f   : > { %7379 = vst [vmem:[#allocation31_spill] sm:$0xff] %v6048_v11  ;;  %v4419_v11 = vpack.i.bf16 %v5793_v27, %v5686_v9 }
 0x1a0   : > { %4395 = vrot.lane.b32.xlu0 %v4394_v42, %s5226_s14  ;;  %4390 = vrot.lane.b32.xlu1 %v5574_v12, %s5225_s29 }
 0x1a2   : > { %v6057_v7 = vpop.permute.xlu0 %4115  ;;  %v6059_v19 = vpop.permute.xlu1 %4105 }
 0x1a4   : > { %4400 = vrot.lane.b32.xlu0 %v5734_v60, %s5226_s14  ;;  %4405 = vrot.lane.b32.xlu1 %v4314_v58, %s5222_s26  ;;  %v6080_v58 = vpack.i.bf16 %v5671_v55, %v5566_v8  ;;  %v6099_v8 = vpack.i.bf16 %v5636_v16, %v5660_v33 }
 0x1a6   : > { %v6064_v32 = vpop.permute.xlu0 %4120  ;;  %v6066_v1 = vpop.permute.xlu1 %4130 }
 0x1a7   : > { %7380 = vst [vmem:[#allocation32_spill] sm:$0xff] %v6064_v32  ;;  %7381 = vst [vmem:[#allocation33_spill] sm:$0xff] %v6066_v1 }
 0x1a8   : > { %4410 = vrot.lane.b32.xlu0 %v5861_v22, %s5223_s27  ;;  %4415 = vrot.lane.b32.xlu1 %v5989_v23, %s5224_s28 }
 0x1aa   : > { %v6072_v12 = vpop.permute.xlu0 %4125  ;;  %v6074_v49 = vpop.permute.xlu1 %4135 }
 0x1ab   : > { %7382 = vst [vmem:[#allocation34_spill] sm:$0xff] %v6074_v49 }
 0x1ac   : > { %4420 = vrot.lane.b32.xlu0 %v4419_v11, %s5227_s16  ;;  %4425 = vrot.lane.b32.xlu1 %v6080_v58, %s5229_s22  ;;  %v6111_v11 = vpack.i.bf16 %v5893_v21, %v5891_v63 }
 0x1ae   : > { %v6085_v1 = vpop.permute.xlu0 %4145  ;;  %v6087_v32 = vpop.permute.xlu1 %4140 }
 0x1af   : > { %7383 = vst [vmem:[#allocation35_spill] sm:$0xff] %v6085_v1 }
 0x1b0   : > { %4430 = vrot.lane.b32.xlu0 %v5678_v0, %s5225_s29  ;;  %4435 = vrot.lane.b32.xlu1 %v5819_v13, %s5226_s14 }
 0x1b2   : > { %v6093_v9 = vpop.permute.xlu0 %4150  ;;  %v6095_v27 = vpop.permute.xlu1 %4155 }
 0x1b3   : > { %7384 = vst [vmem:[#allocation36_spill] sm:$0xff] %v6093_v9  ;;  %v4444_v9 = vpack.i.bf16 %v5812_v10, %v5786_v40 }
 0x1b4   : > { %4450 = vrot.lane.b32.xlu0 %v6099_v8, %s5229_s22  ;;  %4440 = vrot.lane.b32.xlu1 %v5935_v47, %s5223_s27 }
 0x1b6   : > { %v6105_v55 = vpop.permute.xlu0 %4165  ;;  %v6107_v0 = vpop.permute.xlu1 %4160 }
 0x1b7   : > { %7385 = vst [vmem:[#allocation37_spill] sm:$0xff] %v6105_v55  ;;  %v1642_v55 = vld [vmem:[#allocation2 + $0x1a0] sm:$0xff] }
 0x1b8   : > { %4455 = vrot.lane.b32.xlu0 %v6111_v11, %s5229_s22  ;;  %4445 = vrot.lane.b32.xlu1 %v4444_v9, %s5227_s16  ;;  %v4489_v9 = vpack.i.bf16 %v1642_v55, %v5800_v31  ;;  %v6151_v31 = vpack.i.bf16 %v1651_v59, %v5620_v3 }
 0x1ba   : > { %v6118_v16 = vpop.permute.xlu0 %4175  ;;  %v6120_v33 = vpop.permute.xlu1 %4170 }
 0x1bc   : > { %4470 = vrot.lane.b32.xlu0 %v5778_v17, %s5226_s14  ;;  %4460 = vrot.lane.b32.xlu1 %v4394_v42, %s5225_s29 }
 0x1be   : > { %v6125_v49 = vpop.permute.xlu0 %4200  ;;  %v6127_v1 = vpop.permute.xlu1 %4180 }
 0x1bf   : > { %7386 = vst [vmem:[#allocation38_spill] sm:$0xff] %v6125_v49 }
 0x1c0   : > { %4480 = vrot.lane.b32.xlu0 %v5924_v45, %s5223_s27  ;;  %4465 = vrot.lane.b32.xlu1 %v5641_v26, %s5225_s29 }
 0x1c2   : > { %v6133_v40 = vpop.permute.xlu0 %4205  ;;  %v6135_v10 = vpop.permute.xlu1 %4185 }
 0x1c3   : > { %7387 = vst [vmem:[#allocation39_spill] sm:$0xff] %v6135_v10 }
 0x1c4   : > { %4490 = vrot.lane.b32.xlu0 %v4489_v9, %s5227_s16  ;;  %4475 = vrot.lane.b32.xlu1 %v4364_v57, %s5222_s26 }
 0x1c6   : > { %v6140_v42 = vpop.permute.xlu0 %4210  ;;  %v6142_v49 = vpop.permute.xlu1 %4190 }
 0x1c8   : > { %4500 = vrot.lane.b32.xlu0 %v5757_v44, %s5225_s29  ;;  %4485 = vrot.lane.b32.xlu1 %v6016_v34, %s5224_s28  ;;  %v7389_v44 = vpack.i.bf16 %v5770_v28, %v5780_v20 }
 0x1ca   : > { %v4221_v26 = vpop.permute.xlu0 %4220  ;;  %v6148_v63 = vpop.permute.xlu1 %4195 }
 0x1cc   : > { %4510 = vrot.lane.b32.xlu0 %v5877_v2, %s5222_s26  ;;  %4495 = vrot.lane.b32.xlu1 %v6151_v31, %s5229_s22 }
 0x1ce   : > { %v6157_v57 = vpop.permute.xlu0 %4235  ;;  %v6159_v55 = vpop.permute.xlu1 %4215 }
 0x1cf   : > { %7388 = vst [vmem:[#allocation40_spill] sm:$0xff] %v6159_v55 }
 0x1d0   : > { %4520 = vrot.lane.b32.xlu0 %v7389_v44, %s5224_s28  ;;  %4505 = vrot.lane.b32.xlu1 %v5607_v50, %s5226_s14 }
 0x1d2   : > { %v6167_v3 = vpop.permute.xlu0 %4240  ;;  %v6169_v59 = vpop.permute.xlu1 %4225 }
 0x1d4   : > { %4530 = vrot.lane.b32.xlu0 %v6030_v39, %s5222_s26  ;;  %4515 = vrot.lane.b32.xlu1 %v6000_v43, %s5223_s27  ;;  %v7390_v39 = vpack.i.bf16 %v5681_v5, %v5673_v56 }
 0x1d6   : > { %v6175_v2 = vpop.permute.xlu0 %4255  ;;  %v6177_v9 = vpop.permute.xlu1 %4230 }
 0x1d8   : > { %4535 = vrot.lane.b32.xlu0 %v6111_v11, %s5224_s28  ;;  %4525 = vrot.lane.b32.xlu1 %v6041_v46, %s5227_s16 }
 0x1da   : > { %v6183_v50 = vpop.permute.xlu0 %4265  ;;  %v4246_v44 = vpop.permute.xlu1 %4245 }
 0x1dc   : > { %4540 = vrot.lane.b32.xlu0 %v7390_v39, %s5229_s22  ;;  %4545 = vrot.lane.b32.xlu1 %v5734_v60, %s5225_s29  ;;  %v7393_v60 = vpack.i.bf16 %v5764_v51, %v5762_v15 }
 0x1de   : > { %v6191_v43 = vpop.permute.xlu0 %4280  ;;  %v6193_v55 = vpop.permute.xlu1 %4250 }
 0x1df   : > { %7391 = vst [vmem:[#allocation41_spill] sm:$0xff] %v6191_v43 }
 0x1e0   : > { %4550 = vrot.lane.b32.xlu0 %v5595_v41, %s5226_s14  ;;  %4555 = vrot.lane.b32.xlu1 %v5861_v22, %s5222_s26  ;;  %v7395_v41 = vpack.i.bf16 %v5707_v38, %v5704_v35  ;;  %v4248_v38 = vunpack.i.h.bf16 %v4246_v44 }
 0x1e2   : > { %v6199_v46 = vpop.permute.xlu0 %4285  ;;  %v6201_v10 = vpop.permute.xlu1 %4260 }
 0x1e3   : > { %7392 = vst [vmem:[#allocation42_spill] sm:$0xff] %v6201_v10  ;;  %v1002_v10 = vld [vmem:[#allocation2] sm:$0xff] }
 0x1e4   : > { %4560 = vrot.lane.b32.xlu0 %v5989_v23, %s5223_s27  ;;  %4565 = vrot.lane.b32.xlu1 %v7393_v60, %s5224_s28 }
 0x1e6   : > { %v6209_v39 = vpop.permute.xlu0 %4300  ;;  %v6211_v56 = vpop.permute.xlu1 %4270 }
 0x1e7   : > { %7394 = vst [vmem:[#allocation43_spill] sm:$0xff] %v6209_v39  ;;  %v4223_v39 = vunpack.i.h.bf16 %v4221_v26 }
 0x1e8   : > { %4570 = vrot.lane.b32.xlu0 %v6080_v58, %s5227_s16  ;;  %4575 = vrot.lane.b32.xlu1 %v7395_v41, %s5229_s22  ;;  %v4222_v58 = vunpack.i.l.bf16 %v4221_v26  ;;  %v6240_v26 = vld [vmem:[#allocation2 + $0x111] sm:$0xff] }
 0x1ea   : > { %v4306_v22 = vpop.permute.xlu0 %4305  ;;  %v6219_v5 = vpop.permute.xlu1 %4275  ;;  %v1300_v35 = vsel %vm925_vm2, %v1002_v10, %v4222_v58  ;;  %v4172_v10 = vunpack.i.l.bf16 %v6120_v33 }
 0x1eb   : > { %v4308_v43 = vunpack.i.h.bf16 %v4306_v22  ;;  %v4307_v15 = vunpack.i.l.bf16 %v4306_v22  ;;  %v4247_v22 = vunpack.i.l.bf16 %v4246_v44 }
 0x1ec   : > { %4580 = vrot.lane.b32.xlu0 %v5819_v13, %s5225_s29  ;;  %4585 = vrot.lane.b32.xlu1 %v5645_v36, %s5226_s14  ;;  %v1301_v36 = vsel %vm925_vm2, %v5991_v14, %v4223_v39  ;;  %v4173_v14 = vunpack.i.h.bf16 %v6120_v33  ;;  %v1303_v33 = vsel %vm925_vm2, %v5967_v37, %v4248_v38 }
 0x1ed   : > { %v1309_v51 = vsel %vm1308_vm4, %v1300_v35, %v4307_v15  ;;  %v4634_v35 = vpack.i.bf16 %v6240_v26, %v5944_v29 }
 0x1ee   : > { %v6225_v23 = vpop.permute.xlu0 %4310  ;;  %v6227_v60 = vpop.permute.xlu1 %4290  ;;  %v1318_v15 = vsel %vm1317_vm5, %v1309_v51, %v4172_v10  ;;  %v4158_v51 = vunpack.i.h.bf16 %v6095_v27 }
 0x1f0   : > { %4590 = vrot.lane.b32.xlu0 %v5935_v47, %s5222_s26  ;;  %4600 = vrot.lane.b32.xlu1 %v6099_v8, %s5227_s16  ;;  %v1310_v47 = vsel %vm1308_vm4, %v1301_v36, %v4308_v43  ;;  %v7396_v8 = vpack.i.bf16 %v5807_v62, %v5809_v25  ;;  %v1302_v25 = vsel %vm925_vm2, %v5993_v48, %v4247_v22 }
 0x1f1   : > { %v1319_v44 = vsel %vm1317_vm5, %v1310_v47, %v4173_v14  ;;  %v7397_v62 = vpack.i.bf16 %v5724_v52, %v5717_v30  ;;  %v4157_v47 = vunpack.i.l.bf16 %v6095_v27 }
 0x1f2   : > { %v6233_v41 = vpop.permute.xlu0 %4315  ;;  %v6235_v13 = vpop.permute.xlu1 %4295 }
 0x1f4   : > { %4595 = vrot.lane.b32.xlu0 %v7396_v8, %s5224_s28  ;;  %4610 = vrot.lane.b32.xlu1 %v5778_v17, %s5225_s29  ;;  %v4108_v17 = vunpack.i.h.bf16 %v6059_v19  ;;  %v4107_v8 = vunpack.i.l.bf16 %v6059_v19  ;;  %s3892_s29 = sshll.u32 %s5304_s13, 10 }
 0x1f5   : > { %s7257_s17 = scalar_lea.hbm %s7313_s9, %s3892_s29 }
 0x1f6   : > { %v4331_v39 = vpop.permute.xlu0 %4330  ;;  %v6252_v58 = vpop.permute.xlu1 %4320  ;;  %v1327_v48 = vsel %vm1326_vm6, %v1318_v15, %v4107_v8  ;;  %v1328_v22 = vsel %vm1326_vm6, %v1319_v44, %v4108_v17  ;;  %v4243_v15 = vunpack.i.h.bf16 %v6167_v3 }
 0x1f7   : > { %v4333_v43 = vunpack.i.h.bf16 %v4331_v39  ;;  %v4332_v36 = vunpack.i.l.bf16 %v4331_v39  ;;  %v4092_v39 = vunpack.i.l.bf16 %v6037_v18 }
 0x1f8   : > { %4605 = vrot.lane.b32.xlu0 %v7397_v62, %s5229_s22  ;;  %4620 = vrot.lane.b32.xlu1 %v6111_v11, %s5223_s27  ;;  %v4178_v62 = vunpack.i.h.bf16 %v6118_v16  ;;  %v4177_v11 = vunpack.i.l.bf16 %v6118_v16  ;;  %v4242_v16 = vunpack.i.l.bf16 %v6167_v3  ;;  %v4162_v3 = vunpack.i.l.bf16 %v6107_v0 }
 0x1f9   : > { %v1311_v19 = vsel %vm1308_vm4, %v1302_v25, %v4332_v36  ;;  %v1312_v14 = vsel %vm1308_vm4, %v1303_v33, %v4333_v43  ;;  %v4093_v25 = vunpack.i.h.bf16 %v6037_v18 }
 0x1fa   : > { %v6274_v38 = vpop.permute.xlu0 %4335  ;;  %v4326_v37 = vpop.permute.xlu1 %4325  ;;  %v1320_v10 = vsel %vm1317_vm5, %v1311_v19, %v4157_v47  ;;  %v1321_v27 = vsel %vm1317_vm5, %v1312_v14, %v4158_v51  ;;  %v1336_v44 = vsel %vm1335_vm7, %v1327_v48, %v4177_v11  ;;  %v1337_v17 = vsel %vm1335_vm7, %v1328_v22, %v4178_v62 }
 0x1fb   : > { %v4328_v43 = vunpack.i.h.bf16 %v4326_v37  ;;  %v4327_v36 = vunpack.i.l.bf16 %v4326_v37  ;;  %v1329_v8 = vsel %vm1326_vm6, %v1320_v10, %v4092_v39  ;;  %v1330_v18 = vsel %vm1326_vm6, %v1321_v27, %v4093_v25 }
 0x1fc   : > { %4615 = vrot.lane.b32.xlu0 %v5622_v4, %s5226_s14  ;;  %4625 = vrot.lane.b32.xlu1 %v5924_v45, %s5222_s26  ;;  %v4163_v45 = vunpack.i.h.bf16 %v6107_v0  ;;  %v4268_v37 = vunpack.i.h.bf16 %v6183_v50  ;;  %v4267_v48 = vunpack.i.l.bf16 %v6183_v50  ;;  %v1338_v22 = vsel %vm1335_vm7, %v1329_v8, %v4162_v3  ;;  %v7399_v8 = vld [vmem:[#allocation17_spill] sm:$0xff] }
 0x1fd   : > { %v1345_v33 = vsel %vm1344_vm8, %v1336_v44, %v4327_v36  ;;  %v1346_v51 = vsel %vm1344_vm8, %v1337_v17, %v4328_v43  ;;  %v4318_v11 = vunpack.i.h.bf16 %v6233_v41  ;;  %v4317_v0 = vunpack.i.l.bf16 %v6233_v41  ;;  %v7398_v17 = vld [vmem:[#allocation19_spill] sm:$0xff] }
 0x1fe   : > { %v6296_v4 = vpop.permute.xlu0 %4345  ;;  %v6298_v47 = vpop.permute.xlu1 %4340  ;;  %v1354_v19 = vsel %vm1353_vm9, %v1345_v33, %v4242_v16  ;;  %v1355_v14 = vsel %vm1353_vm9, %v1346_v51, %v4243_v15  ;;  %v1339_v62 = vsel %vm1335_vm7, %v1330_v18, %v4163_v45  ;;  %v4208_v27 = vunpack.i.h.bf16 %v6133_v40 }
 0x1ff   : > { %v2148_v10 = vpack.c.bf16 %v1355_v14, %v1354_v19  ;;  %v4207_v25 = vunpack.i.l.bf16 %v6133_v40  ;;  %v4644_v39 = vpack.i.bf16 %v5730_v53, %v5728_v54  ;;  %v1347_v36 = vsel %vm1344_vm8, %v1338_v22, %v4317_v0 }
 0x200   : > { %4630 = vrot.lane.b32.xlu0 %v6016_v34, %s5223_s27  ;;  %4635 = vrot.lane.b32.xlu1 %v4634_v35, %s5224_s28  ;;  %v1348_v41 = vsel %vm1344_vm8, %v1339_v62, %v4318_v11  ;;  %v4233_v15 = vunpack.i.h.bf16 %v6177_v9  ;;  %v4232_v16 = vunpack.i.l.bf16 %v6177_v9  ;;  %v1305_v40 = vsel %vm925_vm2, %v6020_v24, %v4268_v37 }
 0x201   : > { %2340 = vmatmul.mubr.bf16.vlgmr.msra.gmra.mrb[0].mxu1 %v2148_v10  ;;  %v1304_v44 = vsel %vm925_vm2, %v5969_v61, %v4267_v48  ;;  %v7400_v18 = vpack.c.bf16 %v7398_v17, %v7399_v8  ;;  %v4143_v19 = vunpack.i.h.bf16 %v6087_v32  ;;  %v4142_v14 = vunpack.i.l.bf16 %v6087_v32 }
 0x202   : > { %v6313_v34 = vpop.permute.xlu0 %4350  ;;  %v4356_v35 = vpop.permute.xlu1 %4355  ;;  %v1356_v61 = vsel %vm1353_vm9, %v1347_v36, %v4232_v16  ;;  %v1357_v3 = vsel %vm1353_vm9, %v1348_v41, %v4233_v15  ;;  %v4113_v37 = vunpack.i.h.bf16 %v6050_v6  ;;  %v4112_v48 = vunpack.i.l.bf16 %v6050_v6 }
 0x203   : > { %v4358_v50 = vunpack.i.h.bf16 %v4356_v35  ;;  %v4357_v43 = vunpack.i.l.bf16 %v4356_v35  ;;  %3791 = vmatprep.mubr.msk.bf16.mxu1 %vm925_vm2, %v7400_v18  ;;  %v4118_v22 = vunpack.i.h.bf16 %v6057_v7  ;;  %v2150_v62 = vpack.c.bf16 %v1357_v3, %v1356_v61 }
 0x204   : > { %4640 = vrot.lane.b32.xlu0 %v6151_v31, %s5227_s16  ;;  %4645 = vrot.lane.b32.xlu1 %v4644_v39, %s5229_s22  ;;  %v4313_v32 = vunpack.i.h.bf16 %v6225_v23  ;;  %v4312_v39 = vunpack.i.l.bf16 %v6225_v23  ;;  %v4128_v6 = vunpack.i.h.bf16 %v6072_v12  ;;  %v4183_v41 = vunpack.i.h.bf16 %v6127_v1 }
 0x205   : > { %v1314_v31 = vsel %vm1308_vm4, %v1305_v40, %v4358_v50  ;;  %v1313_v33 = vsel %vm1308_vm4, %v1304_v44, %v4357_v43  ;;  %v4127_v50 = vunpack.i.l.bf16 %v6072_v12  ;;  %v4182_v15 = vunpack.i.l.bf16 %v6127_v1 }
 0x206   : > { %v6336_v51 = vpop.permute.xlu0 %4360  ;;  %v6338_v9 = vpop.permute.xlu1 %4370  ;;  %v1323_v24 = vsel %vm1317_vm5, %v1314_v31, %v4208_v27  ;;  %v1322_v45 = vsel %vm1317_vm5, %v1313_v33, %v4207_v25  ;;  %v4213_v27 = vunpack.i.h.bf16 %v6140_v42  ;;  %v4212_v25 = vunpack.i.l.bf16 %v6140_v42  ;;  %v7401_v42 = vld [vmem:[#allocation24_spill] sm:$0xff] }
 0x207   : > { %v1331_v10 = vsel %vm1326_vm6, %v1322_v45, %v4142_v14  ;;  %v1332_v35 = vsel %vm1326_vm6, %v1323_v24, %v4143_v19  ;;  %v7402_v44 = vpack.c.bf16 %v5893_v21, %v7401_v42  ;;  %v4288_v23 = vunpack.i.h.bf16 %v6199_v46  ;;  %v7403_v24 = vld [vmem:[#allocation16_spill] sm:$0xff]  ;;  %v7404_v45 = vld [vmem:[#allocation15_spill] sm:$0xff] }
 0x208   : > { %v1340_v16 = vsel %vm1335_vm7, %v1331_v10, %v4212_v25  ;;  %v1341_v40 = vsel %vm1335_vm7, %v1332_v35, %v4213_v27  ;;  %v4287_v12 = vunpack.i.l.bf16 %v6199_v46  ;;  %v4228_v31 = vunpack.i.h.bf16 %v6169_v59 }
 0x209   : > { %2348 = vmatmul.mubr.bf16.gmra.mrb[4].mxu1 %v2150_v62  ;;  %v4227_v33 = vunpack.i.l.bf16 %v6169_v59  ;;  %v1579_v21 = vsel %vm925_vm2, %v7403_v24, %v4313_v32  ;;  %v1578_v61 = vsel %vm925_vm2, %v7404_v45, %v4312_v39  ;;  %v4293_v46 = vunpack.i.h.bf16 %v6227_v60  ;;  %v7408_v24 = vld [vmem:[#allocation22_spill] sm:$0xff] }
 0x20a   : > { %v6349_v11 = vpop.permute.xlu0 %4365  ;;  %v4376_v0 = vpop.permute.xlu1 %4375  ;;  %3792 = vmatprep.mubr.msk.bf16.mxu1 %vm925_vm2, %v7402_v44  ;;  %v4292_v3 = vunpack.i.l.bf16 %v6227_v60  ;;  %v4193_v62 = vunpack.i.h.bf16 %v6142_v49  ;;  %v4198_v59 = vunpack.i.h.bf16 %v6148_v63  ;;  %v1587_v27 = vsel %vm1308_vm4, %v1579_v21, %v4228_v31  ;;  %v7405_v44 = vld [vmem:[#allocation28_spill] sm:$0xff] }
 0x20b   : > { %v4378_v43 = vunpack.i.h.bf16 %v4376_v0  ;;  %v4377_v36 = vunpack.i.l.bf16 %v4376_v0  ;;  %v4192_v0 = vunpack.i.l.bf16 %v6142_v49  ;;  %v1586_v35 = vsel %vm1308_vm4, %v1578_v61, %v4227_v33  ;;  %v7407_v33 = vld [vmem:[#allocation23_spill] sm:$0xff]  ;;  %v7410_v21 = vld [vmem:[#allocation20_spill] sm:$0xff]  ;;  %v7411_v61 = vld [vmem:[#allocation21_spill] sm:$0xff] }
 0x20c   : > { %v4343_v25 = vunpack.i.h.bf16 %v6298_v47  ;;  %v4342_v32 = vunpack.i.l.bf16 %v6298_v47  ;;  %v4278_v42 = vunpack.i.h.bf16 %v6219_v5  ;;  %v1594_v47 = vsel %vm1317_vm5, %v1586_v35, %v4112_v48 }
 0x20d   : > { %v1349_v17 = vsel %vm1344_vm8, %v1340_v16, %v4377_v36  ;;  %v1350_v8 = vsel %vm1344_vm8, %v1341_v40, %v4378_v43  ;;  %v4197_v43 = vunpack.i.l.bf16 %v6148_v63  ;;  %v4258_v36 = vunpack.i.h.bf16 %v6175_v2 }
 0x20e   : > { %v6371_v18 = vpop.permute.xlu0 %4385  ;;  %v6373_v1 = vpop.permute.xlu1 %4380  ;;  %v1358_v19 = vsel %vm1353_vm9, %v1349_v17, %v4287_v12  ;;  %v1359_v14 = vsel %vm1353_vm9, %v1350_v8, %v4288_v23  ;;  %v4257_v40 = vunpack.i.l.bf16 %v6175_v2  ;;  %v1307_v23 = vsel %vm925_vm2, %v7405_v44, %v4293_v46  ;;  %v7406_v12 = vld [vmem:[#allocation29_spill] sm:$0xff] }
 0x20f   : > { %v2152_v10 = vpack.c.bf16 %v1359_v14, %v1358_v19  ;;  %v1306_v17 = vsel %vm925_vm2, %v7406_v12, %v4292_v3  ;;  %v1595_v8 = vsel %vm1317_vm5, %v1587_v27, %v4113_v37  ;;  %v7409_v2 = vpack.c.bf16 %v7407_v33, %v7408_v24  ;;  %v7413_v33 = vld [vmem:[#allocation37_spill] sm:$0xff] }
 0x210   : > { %v1581_v45 = vsel %vm925_vm2, %v7410_v21, %v4343_v25  ;;  %v1580_v46 = vsel %vm925_vm2, %v7411_v61, %v4342_v32  ;;  %v4368_v14 = vunpack.i.h.bf16 %v6349_v11  ;;  %v4277_v25 = vunpack.i.l.bf16 %v6219_v5 }
 0x211   : > { %2356 = vmatmul.mubr.bf16.gmra.mrb[8].mxu1 %v2152_v10  ;;  %v4367_v10 = vunpack.i.l.bf16 %v6349_v11  ;;  %v1603_v11 = vsel %vm1326_vm6, %v1595_v8, %v4183_v41  ;;  %v4338_v41 = vunpack.i.h.bf16 %v6274_v38  ;;  %v4168_v24 = vunpack.i.h.bf16 %v7413_v33 }
 0x212   : > { %v4396_v60 = vpop.permute.xlu0 %4395  ;;  %v6392_v39 = vpop.permute.xlu1 %4390  ;;  %3793 = vmatprep.mubr.msk.bf16.mxu1 %vm925_vm2, %v7409_v2  ;;  %v4167_v2 = vunpack.i.l.bf16 %v7413_v33  ;;  %v4253_v21 = vunpack.i.h.bf16 %v6193_v55 }
 0x213   : > { %v4398_v16 = vunpack.i.h.bf16 %v4396_v60  ;;  %v4397_v49 = vunpack.i.l.bf16 %v4396_v60  ;;  %v4117_v60 = vunpack.i.l.bf16 %v6057_v7 }
 0x215   : > { %v1315_v63 = vsel %vm1308_vm4, %v1306_v17, %v4397_v49  ;;  %v1316_v31 = vsel %vm1308_vm4, %v1307_v23, %v4398_v16 }
 0x216   : > { %v1324_v3 = vsel %vm1317_vm5, %v1315_v63, %v4192_v0  ;;  %v1325_v48 = vsel %vm1317_vm5, %v1316_v31, %v4193_v62  ;;  %v6416_v37 = vpop.permute.xlu0 %4400  ;;  %v6418_v19 = vpop.permute.xlu1 %4405  ;;  %v1602_v62 = vsel %vm1326_vm6, %v1594_v47, %v4182_v15  ;;  %v4362_v31 = vunpack.i.l.bf16 %v6336_v51 }
 0x217   : > { %v1333_v35 = vsel %vm1326_vm6, %v1324_v3, %v4127_v50  ;;  %v1334_v27 = vsel %vm1326_vm6, %v1325_v48, %v4128_v6  ;;  %v1589_v50 = vsel %vm1308_vm4, %v1581_v45, %v4258_v36  ;;  %v1588_v6 = vsel %vm1308_vm4, %v1580_v46, %v4257_v40  ;;  %v7414_v45 = vld [vmem:[#allocation31_spill] sm:$0xff] }
 0x218   : > { %v1342_v32 = vsel %vm1335_vm7, %v1333_v35, %v4197_v43  ;;  %v1343_v0 = vsel %vm1335_vm7, %v1334_v27, %v4198_v59  ;;  %v7412_v43 = vld [vmem:[#allocation30_spill] sm:$0xff]  ;;  %v1610_v17 = vsel %vm1335_vm7, %v1602_v62, %v4117_v60  ;;  %v4337_v36 = vunpack.i.l.bf16 %v6274_v38 }
 0x219   : > { %v1351_v16 = vsel %vm1344_vm8, %v1342_v32, %v4367_v10  ;;  %v1352_v49 = vsel %vm1344_vm8, %v1343_v0, %v4368_v14  ;;  %v4098_v23 = vunpack.i.h.bf16 %v7412_v43  ;;  %v4097_v12 = vunpack.i.l.bf16 %v7412_v43  ;;  %v7416_v10 = vld [vmem:[#allocation25_spill] sm:$0xff]  ;;  %v7417_v27 = vld [vmem:[#allocation18_spill] sm:$0xff] }
 0x21a   : > { %v6434_v44 = vpop.permute.xlu0 %4410  ;;  %v6436_v5 = vpop.permute.xlu1 %4415  ;;  %v1360_v59 = vsel %vm1353_vm9, %v1351_v16, %v4277_v25  ;;  %v1361_v15 = vsel %vm1353_vm9, %v1352_v49, %v4278_v42  ;;  %v1611_v40 = vsel %vm1335_vm7, %v1603_v11, %v4118_v22  ;;  %v4363_v42 = vunpack.i.h.bf16 %v6336_v51  ;;  %v7418_v49 = vld [vmem:[#allocation32_spill] sm:$0xff] }
 0x21b   : > { %v2154_v47 = vpack.c.bf16 %v1361_v15, %v1360_v59  ;;  %v1597_v8 = vsel %vm1317_vm5, %v1589_v50, %v4098_v23  ;;  %v1596_v63 = vsel %vm1317_vm5, %v1588_v6, %v4097_v12  ;;  %v4252_v38 = vunpack.i.l.bf16 %v6193_v55 }
 0x21c   : > { %v4103_v61 = vunpack.i.h.bf16 %v7414_v45  ;;  %v4102_v46 = vunpack.i.l.bf16 %v7414_v45  ;;  %v7415_v51 = vpack.c.bf16 %v5770_v28, %v5780_v20  ;;  %v1619_v48 = vsel %vm1344_vm8, %v1611_v40, %v4253_v21 }
 0x21d   : > { %2364 = vmatmul.mubr.bf16.gmra.mrb[12].mxu1 %v2154_v47  ;;  %v1618_v3 = vsel %vm1344_vm8, %v1610_v17, %v4252_v38  ;;  %v1604_v55 = vsel %vm1326_vm6, %v1596_v63, %v4167_v2  ;;  %v1605_v14 = vsel %vm1326_vm6, %v1597_v8, %v4168_v24  ;;  %v1583_v35 = vsel %vm925_vm2, %v7416_v10, %v4363_v42  ;;  %v7419_v17 = vld [vmem:[#allocation33_spill] sm:$0xff]  ;;  %v7421_v63 = vld [vmem:[#allocation39_spill] sm:$0xff] }
 0x21e   : > { %v6456_v7 = vpop.permute.xlu0 %4420  ;;  %v6458_v22 = vpop.permute.xlu1 %4425  ;;  %3794 = vmatprep.mubr.msk.bf16.mxu1 %vm925_vm2, %v7415_v51  ;;  %v1582_v25 = vsel %vm925_vm2, %v7417_v27, %v4362_v31  ;;  %v1626_v32 = vsel %vm1353_vm9, %v1618_v3, %v4337_v36  ;;  %v1627_v28 = vsel %vm1353_vm9, %v1619_v48, %v4338_v41  ;;  %v4273_v20 = vunpack.i.h.bf16 %v6211_v56  ;;  %v7420_v36 = vld [vmem:[#allocation35_spill] sm:$0xff]  ;;  %v5141_v3 = vld [vmem:[#allocation2 + $0x130] sm:$0xff] }
 0x21f   : > { %v4272_v0 = vunpack.i.l.bf16 %v6211_v56  ;;  %v2163_v16 = vpack.c.bf16 %v6240_v26, %v5944_v29  ;;  %v4123_v11 = vunpack.i.h.bf16 %v7418_v49  ;;  %v4238_v50 = vunpack.i.h.bf16 %v6157_v57  ;;  %v5142_v27 = vld [vmem:[#allocation2 + $0x120] sm:$0xff] }
 0x220   : > { %v1612_v6 = vsel %vm1335_vm7, %v1604_v55, %v4102_v46  ;;  %v1613_v59 = vsel %vm1335_vm7, %v1605_v14, %v4103_v61  ;;  %v4237_v15 = vunpack.i.l.bf16 %v6157_v57  ;;  %v1591_v56 = vsel %vm1308_vm4, %v1583_v35, %v4273_v20  ;;  %v7422_v61 = vld [vmem:[#allocation12_spill] sm:$0xff]  ;;  %v7423_v46 = vld [vmem:[#allocation11_spill] sm:$0xff] }
 0x221   : > { %v1590_v43 = vsel %vm1308_vm4, %v1582_v25, %v4272_v0  ;;  %v2156_v23 = vpack.c.bf16 %v1627_v28, %v1626_v32  ;;  %v4122_v12 = vunpack.i.l.bf16 %v7418_v49  ;;  %v4133_v41 = vunpack.i.h.bf16 %v7419_v17  ;;  %v7425_v14 = vld [vmem:[#allocation40_spill] sm:$0xff]  ;;  %v7426_v25 = vld [vmem:[#allocation34_spill] sm:$0xff] }
 0x222   : > { %v6478_v62 = vpop.permute.xlu0 %4430  ;;  %v6480_v60 = vpop.permute.xlu1 %4435  ;;  %v4148_v47 = vunpack.i.h.bf16 %v7420_v36  ;;  %v4147_v40 = vunpack.i.l.bf16 %v7420_v36  ;;  %v4132_v8 = vunpack.i.l.bf16 %v7419_v17  ;;  %v4188_v42 = vunpack.i.h.bf16 %v7421_v63  ;;  %v7427_v49 = vld [vmem:[#allocation36_spill] sm:$0xff] }
 0x223   : > { %v1620_v33 = vsel %vm1344_vm8, %v1612_v6, %v4237_v15  ;;  %v1621_v24 = vsel %vm1344_vm8, %v1613_v59, %v4238_v50  ;;  %v4323_v2 = vunpack.i.h.bf16 %v6252_v58  ;;  %v4322_v21 = vunpack.i.l.bf16 %v6252_v58 }
 0x224   : > { %v1598_v38 = vsel %vm1317_vm5, %v1590_v43, %v4147_v40  ;;  %v1599_v45 = vsel %vm1317_vm5, %v1591_v56, %v4148_v47  ;;  %v7424_v51 = vpack.c.bf16 %v7422_v61, %v7423_v46  ;;  %v1845_v48 = vsel %vm925_vm2, %v5141_v3, %v4123_v11  ;;  %v7428_v56 = vld [vmem:[#allocation38_spill] sm:$0xff]  ;;  %v7429_v40 = vld [vmem:[#allocation41_spill] sm:$0xff] }
 0x225   : > { %2372 = vmatmul.mubr.bf16.gmra.mrb[16].mxu1 %v2156_v23  ;;  %v4187_v55 = vunpack.i.l.bf16 %v7421_v63  ;;  %v4218_v10 = vunpack.i.h.bf16 %v7425_v14  ;;  %v4217_v35 = vunpack.i.l.bf16 %v7425_v14  ;;  %v1844_v58 = vsel %vm925_vm2, %v5142_v27, %v4122_v12 }
 0x226   : > { %v6497_v31 = vpop.permute.xlu0 %4450  ;;  %v6499_v57 = vpop.permute.xlu1 %4440  ;;  %3795 = vmatprep.mubr.msk.bf16.mxu1 %vm925_vm2, %v7424_v51  ;;  %v4138_v32 = vunpack.i.h.bf16 %v7426_v25  ;;  %v1628_v28 = vsel %vm1353_vm9, %v1620_v33, %v4322_v21  ;;  %v1629_v20 = vsel %vm1353_vm9, %v1621_v24, %v4323_v2  ;;  %v4137_v0 = vunpack.i.l.bf16 %v7426_v25  ;;  %v7432_v25 = vld [vmem:[#allocation13_spill] sm:$0xff] }
 0x227   : > { %v4153_v50 = vunpack.i.h.bf16 %v7427_v49  ;;  %v1606_v59 = vsel %vm1326_vm6, %v1598_v38, %v4217_v35  ;;  %v1607_v15 = vsel %vm1326_vm6, %v1599_v45, %v4218_v10  ;;  %v4152_v43 = vunpack.i.l.bf16 %v7427_v49  ;;  %v7431_v10 = vld [vmem:[#allocation43_spill] sm:$0xff] }
 0x228   : > { %v4203_v23 = vunpack.i.h.bf16 %v7428_v56  ;;  %v4202_v12 = vunpack.i.l.bf16 %v7428_v56  ;;  %v1853_v36 = vsel %vm1308_vm4, %v1845_v48, %v4188_v42  ;;  %v1852_v47 = vsel %vm1308_vm4, %v1844_v58, %v4187_v55  ;;  %v7430_v55 = vld [vmem:[#allocation42_spill] sm:$0xff] }
 0x229   : > { %v4283_v63 = vunpack.i.h.bf16 %v7429_v40  ;;  %v4347_v33 = vunpack.i.l.bf16 %v6296_v4  ;;  %v2158_v24 = vpack.c.bf16 %v1629_v20, %v1628_v28  ;;  %v1614_v38 = vsel %vm1335_vm7, %v1606_v59, %v4152_v43  ;;  %v7433_v28 = vld [vmem:[#allocation14_spill] sm:$0xff] }
 0x22a   : > { %v4456_v11 = vpop.permute.xlu0 %4455  ;;  %v6521_v6 = vpop.permute.xlu1 %4445  ;;  %v1615_v45 = vsel %vm1335_vm7, %v1607_v15, %v4153_v50  ;;  %v4282_v61 = vunpack.i.l.bf16 %v7429_v40  ;;  %v4298_v46 = vunpack.i.h.bf16 %v6235_v13  ;;  %v4297_v51 = vunpack.i.l.bf16 %v6235_v13  ;;  %v7436_v15 = vld [vmem:[#allocation27_spill] sm:$0xff] }
 0x22b   : > { %v4458_v2 = vunpack.i.h.bf16 %v4456_v11  ;;  %v4457_v21 = vunpack.i.l.bf16 %v4456_v11  ;;  %v4348_v42 = vunpack.i.h.bf16 %v6296_v4  ;;  %v4262_v14 = vunpack.i.l.bf16 %v7430_v55  ;;  %v7435_v11 = vld [vmem:[#allocation26_spill] sm:$0xff] }
 0x22c   : > { %v4303_v35 = vunpack.i.h.bf16 %v7431_v10  ;;  %v7434_v20 = vpack.c.bf16 %v7432_v25, %v7433_v28  ;;  %v4302_v49 = vunpack.i.l.bf16 %v7431_v10  ;;  %v1860_v13 = vsel %vm1317_vm5, %v1852_v47, %v4347_v33 }
 0x22d   : > { %2380 = vmatmul.mubr.bf16.gmra.mrb[20].mxu1 %v2158_v24  ;;  %v1622_v4 = vsel %vm1344_vm8, %v1614_v38, %v4297_v51  ;;  %v1623_v50 = vsel %vm1344_vm8, %v1615_v45, %v4298_v46  ;;  %v1861_v24 = vsel %vm1317_vm5, %v1853_v36, %v4348_v42  ;;  %v4393_v46 = vunpack.i.h.bf16 %v6392_v39 }
 0x22e   : > { %v6538_v3 = vpop.permute.xlu0 %4470  ;;  %v4461_v48 = vpop.permute.xlu1 %4460  ;;  %3796 = vmatprep.mubr.msk.bf16.mxu1 %vm925_vm2, %v7434_v20  ;;  %v1630_v56 = vsel %vm1353_vm9, %v1622_v4, %v4457_v21  ;;  %v1631_v40 = vsel %vm1353_vm9, %v1623_v50, %v4458_v2  ;;  %v4402_v51 = vunpack.i.l.bf16 %v6416_v37  ;;  %v4403_v21 = vunpack.i.h.bf16 %v6416_v37  ;;  %v5144_v20 = vld [vmem:[#allocation2 + $0x150] sm:$0xff] }
 0x22f   : > { %v4463_v27 = vunpack.i.h.bf16 %v4461_v48  ;;  %v4462_v58 = vunpack.i.l.bf16 %v4461_v48  ;;  %v4392_v48 = vunpack.i.l.bf16 %v6392_v39  ;;  %v2160_v42 = vpack.c.bf16 %v1631_v40, %v1630_v56 }
 0x230   : > { %v4372_v39 = vunpack.i.l.bf16 %v6338_v9  ;;  %v4263_v4 = vunpack.i.h.bf16 %v7430_v55  ;;  %v4413_v50 = vunpack.i.h.bf16 %v6434_v44  ;;  %v4383_v26 = vunpack.i.h.bf16 %v6373_v1 }
 0x231   : > { %v1585_v59 = vsel %vm925_vm2, %v7435_v11, %v4463_v27  ;;  %v1584_v43 = vsel %vm925_vm2, %v7436_v15, %v4462_v58  ;;  %v4373_v27 = vunpack.i.h.bf16 %v6338_v9  ;;  %v1847_v9 = vsel %vm925_vm2, %v5144_v20, %v4393_v46 }
 0x232   : > { %v1593_v47 = vsel %vm1308_vm4, %v1585_v59, %v4303_v35  ;;  %v1592_v33 = vsel %vm1308_vm4, %v1584_v43, %v4302_v49  ;;  %v6560_v38 = vpop.permute.xlu0 %4480  ;;  %v6562_v45 = vpop.permute.xlu1 %4465  ;;  %v4412_v49 = vunpack.i.l.bf16 %v6434_v44  ;;  %v4353_v11 = vunpack.i.h.bf16 %v6313_v34 }
 0x233   : > { %v1600_v2 = vsel %vm1317_vm5, %v1592_v33, %v4132_v8  ;;  %v1601_v36 = vsel %vm1317_vm5, %v1593_v47, %v4133_v41  ;;  %v5143_v8 = vld [vmem:[#allocation2 + $0x140] sm:$0xff]  ;;  %v4407_v41 = vunpack.i.l.bf16 %v6418_v19  ;;  %v4352_v59 = vunpack.i.l.bf16 %v6313_v34 }
 0x234   : > { %v1608_v10 = vsel %vm1326_vm6, %v1600_v2, %v4202_v12  ;;  %v1609_v35 = vsel %vm1326_vm6, %v1601_v36, %v4203_v23  ;;  %v1846_v17 = vsel %vm925_vm2, %v5143_v8, %v4392_v48  ;;  %v1869_v29 = vsel %vm1326_vm6, %v1861_v24, %v4263_v4 }
 0x235   : > { %v1616_v58 = vsel %vm1335_vm7, %v1608_v10, %v4137_v0  ;;  %v1617_v25 = vsel %vm1335_vm7, %v1609_v35, %v4138_v32  ;;  %2388 = vmatmul.mubr.bf16.gmra.mrb[24].mxu1 %v2160_v42  ;;  %v1854_v0 = vsel %vm1308_vm4, %v1846_v17, %v4402_v51  ;;  %v4408_v32 = vunpack.i.h.bf16 %v6418_v19 }
 0x236   : > { %v6581_v37 = vpop.permute.xlu0 %4490  ;;  %v6583_v28 = vpop.permute.xlu1 %4475  ;;  %v1624_v23 = vsel %vm1344_vm8, %v1616_v58, %v4282_v61  ;;  %v1625_v12 = vsel %vm1344_vm8, %v1617_v25, %v4283_v63  ;;  %3797 = vmatprep.mubr.msk.bf16.mxu1 %vm925_vm2, %v2163_v16  ;;  %v1868_v61 = vsel %vm1326_vm6, %v1860_v13, %v4262_v14  ;;  %v1855_v63 = vsel %vm1308_vm4, %v1847_v9, %v4403_v21 }
 0x237   : > { %v1632_v19 = vsel %vm1353_vm9, %v1624_v23, %v4372_v39  ;;  %v1633_v15 = vsel %vm1353_vm9, %v1625_v12, %v4373_v27  ;;  %v4382_v16 = vunpack.i.l.bf16 %v6373_v1  ;;  %v1862_v55 = vsel %vm1317_vm5, %v1854_v0, %v4407_v41  ;;  %v7437_v27 = vld [vmem:[#allocation8_spill] sm:$0xff]  ;;  %v7438_v39 = vld [vmem:[#allocation7_spill] sm:$0xff] }
 0x238   : > { %v1863_v44 = vsel %vm1317_vm5, %v1855_v63, %v4408_v32  ;;  %v1870_v34 = vsel %vm1326_vm6, %v1862_v55, %v4412_v49  ;;  %v4418_v43 = vunpack.i.h.bf16 %v6436_v5  ;;  %v4417_v56 = vunpack.i.l.bf16 %v6436_v5 }
 0x239   : > { %v1871_v40 = vsel %vm1326_vm6, %v1863_v44, %v4413_v50  ;;  %v4423_v24 = vunpack.i.h.bf16 %v6456_v7  ;;  %v4422_v1 = vunpack.i.l.bf16 %v6456_v7  ;;  %v2162_v48 = vpack.c.bf16 %v1633_v15, %v1632_v19  ;;  %v5146_v50 = vld [vmem:[#allocation2 + $0x160] sm:$0xff] }
 0x23a   : > { %v6607_v14 = vpop.permute.xlu0 %4500  ;;  %v6609_v13 = vpop.permute.xlu1 %4485  ;;  %v1876_v47 = vsel %vm1335_vm7, %v1868_v61, %v4352_v59  ;;  %v1877_v33 = vsel %vm1335_vm7, %v1869_v29, %v4353_v11  ;;  %v4388_v46 = vunpack.i.h.bf16 %v6371_v18  ;;  %v4387_v51 = vunpack.i.l.bf16 %v6371_v18  ;;  %v5145_v61 = vld [vmem:[#allocation2 + $0x170] sm:$0xff]  ;;  %v5148_v19 = vld [vmem:[#allocation2 + $0x180] sm:$0xff] }
 0x23b   : > { %v1884_v2 = vsel %vm1344_vm8, %v1876_v47, %v4382_v16  ;;  %v1885_v36 = vsel %vm1344_vm8, %v1877_v33, %v4383_v26  ;;  %v1878_v7 = vsel %vm1335_vm7, %v1870_v34, %v4417_v56  ;;  %v1879_v42 = vsel %vm1335_vm7, %v1871_v40, %v4418_v43  ;;  %v7440_v43 = vld [vmem:[#allocation10_spill] sm:$0xff]  ;;  %v7441_v56 = vld [vmem:[#allocation9_spill] sm:$0xff] }
 0x23c   : > { %v4428_v10 = vunpack.i.h.bf16 %v6458_v22  ;;  %v4427_v35 = vunpack.i.l.bf16 %v6458_v22  ;;  %v7439_v18 = vpack.c.bf16 %v7437_v27, %v7438_v39  ;;  %v1886_v58 = vsel %vm1344_vm8, %v1878_v7, %v4422_v1 }
 0x23d   : > { %2396 = vmatmul.mubr.bf16.gmra.mrb[28].mxu1 %v2162_v48  ;;  %v1887_v25 = vsel %vm1344_vm8, %v1879_v42, %v4423_v24  ;;  %v4433_v8 = vunpack.i.h.bf16 %v6478_v62  ;;  %v4432_v17 = vunpack.i.l.bf16 %v6478_v62  ;;  %v1892_v41 = vsel %vm1353_vm9, %v1884_v2, %v4387_v51 }
 0x23e   : > { %v6624_v5 = vpop.permute.xlu0 %4510  ;;  %v6626_v21 = vpop.permute.xlu1 %4495  ;;  %3798 = vmatprep.mubr.msk.bf16.mxu1 %vm925_vm2, %v7439_v18  ;;  %v1893_v23 = vsel %vm1353_vm9, %v1885_v36, %v4388_v46  ;;  %v4468_v12 = vunpack.i.h.bf16 %v6562_v45  ;;  %v4467_v22 = vunpack.i.l.bf16 %v6562_v45  ;;  %v1894_v0 = vsel %vm1353_vm9, %v1886_v58, %v4427_v35  ;;  %v5147_v45 = vld [vmem:[#allocation2 + $0x190] sm:$0xff] }
 0x23f   : > { %v1895_v32 = vsel %vm1353_vm9, %v1887_v25, %v4428_v10  ;;  %v4438_v49 = vunpack.i.h.bf16 %v6480_v60  ;;  %v4437_v62 = vunpack.i.l.bf16 %v6480_v60  ;;  %v2164_v4 = vpack.c.bf16 %v1893_v23, %v1892_v41 }
 0x240   : > { %v1849_v63 = vsel %vm925_vm2, %v5145_v61, %v4433_v8  ;;  %v1848_v11 = vsel %vm925_vm2, %v5146_v50, %v4432_v17  ;;  %v1851_v59 = vsel %vm925_vm2, %v5147_v45, %v4468_v12  ;;  %v1850_v15 = vsel %vm925_vm2, %v5148_v19, %v4467_v22 }
 0x241   : > { %v2166_v16 = vpack.c.bf16 %v1895_v32, %v1894_v0  ;;  %v4478_v60 = vunpack.i.h.bf16 %v6583_v28  ;;  %v4477_v55 = vunpack.i.l.bf16 %v6583_v28  ;;  %v7442_v40 = vpack.c.bf16 %v7440_v43, %v7441_v56  ;;  %v5150_v43 = vld [vmem:[#allocation2 + $0x1b0] sm:$0xff] }
 0x242   : > { %v6644_v20 = vpop.permute.xlu0 %4520  ;;  %v6646_v9 = vpop.permute.xlu1 %4505  ;;  %v1857_v24 = vsel %vm1308_vm4, %v1849_v63, %v4438_v49  ;;  %v1856_v1 = vsel %vm1308_vm4, %v1848_v11, %v4437_v62  ;;  %v4473_v48 = vunpack.i.h.bf16 %v6538_v3  ;;  %v4472_v47 = vunpack.i.l.bf16 %v6538_v3 }
 0x243   : > { %v4443_v33 = vunpack.i.h.bf16 %v6499_v57  ;;  %v4442_v46 = vunpack.i.l.bf16 %v6499_v57  ;;  %v4448_v2 = vunpack.i.h.bf16 %v6521_v6  ;;  %v4447_v36 = vunpack.i.l.bf16 %v6521_v6 }
 0x244   : > { %v1858_v7 = vsel %vm1308_vm4, %v1850_v15, %v4472_v47  ;;  %v1859_v42 = vsel %vm1308_vm4, %v1851_v59, %v4473_v48  ;;  %v4488_v18 = vunpack.i.h.bf16 %v6609_v13  ;;  %v4487_v58 = vunpack.i.l.bf16 %v6609_v13 }
 0x245   : > { %2404 = vmatmul.mubr.bf16.gmra.mrb[32].mxu1 %v2164_v4  ;;  %v1866_v3 = vsel %vm1317_vm5, %v1858_v7, %v4477_v55  ;;  %v1867_v27 = vsel %vm1317_vm5, %v1859_v42, %v4478_v60  ;;  %v4483_v8 = vunpack.i.h.bf16 %v6560_v38  ;;  %v4482_v17 = vunpack.i.l.bf16 %v6560_v38  ;;  %v5149_v60 = vld [vmem:[#allocation2 + $0x1c0] sm:$0xff] }
 0x246   : > { %v4531_v29 = vpop.permute.xlu0 %4530  ;;  %v6656_v26 = vpop.permute.xlu1 %4515  ;;  %3799 = vmatprep.mubr.msk.bf16.mxu1 %vm925_vm2, %v7442_v40  ;;  %v4453_v12 = vunpack.i.h.bf16 %v6497_v31  ;;  %v4452_v49 = vunpack.i.l.bf16 %v6497_v31  ;;  %v4503_v62 = vunpack.i.h.bf16 %v6607_v14  ;;  %v7443_v61 = vpack.c.bf16 %v5724_v52, %v5717_v30 }
 0x247   : > { %v4533_v44 = vunpack.i.h.bf16 %v4531_v29  ;;  %v4532_v34 = vunpack.i.l.bf16 %v4531_v29  ;;  %v1874_v38 = vsel %vm1326_vm6, %v1866_v3, %v4482_v17  ;;  %v1875_v4 = vsel %vm1326_vm6, %v1867_v27, %v4483_v8  ;;  %v5152_v8 = vld [vmem:[#allocation2 + $0x1e0] sm:$0xff] }
 0x248   : > { %v4502_v63 = vunpack.i.l.bf16 %v6607_v14  ;;  %v1882_v50 = vsel %vm1335_vm7, %v1874_v38, %v4487_v58  ;;  %v1883_v11 = vsel %vm1335_vm7, %v1875_v4, %v4488_v18  ;;  %v4498_v45 = vunpack.i.h.bf16 %v6626_v21  ;;  %v5151_v18 = vld [vmem:[#allocation2 + $0x1d0] sm:$0xff] }
 0x249   : > { %v1864_v28 = vsel %vm1317_vm5, %v1856_v1, %v4532_v34  ;;  %v1865_v51 = vsel %vm1317_vm5, %v1857_v24, %v4533_v44  ;;  %v4497_v31 = vunpack.i.l.bf16 %v6626_v21  ;;  %v4508_v59 = vunpack.i.h.bf16 %v6646_v9 }
 0x24a   : > { %v4536_v10 = vpop.permute.xlu0 %4535  ;;  %v6676_v35 = vpop.permute.xlu1 %4525  ;;  %v1872_v25 = vsel %vm1326_vm6, %v1864_v28, %v4442_v46  ;;  %v1873_v6 = vsel %vm1326_vm6, %v1865_v51, %v4443_v33  ;;  %v4493_v30 = vunpack.i.h.bf16 %v6581_v37  ;;  %v4492_v52 = vunpack.i.l.bf16 %v6581_v37 }
 0x24b   : > { %v4538_v57 = vunpack.i.h.bf16 %v4536_v10  ;;  %v4537_v39 = vunpack.i.l.bf16 %v4536_v10  ;;  %v4507_v14 = vunpack.i.l.bf16 %v6646_v9  ;;  %v2093_v55 = vsel %vm925_vm2, %v5149_v60, %v4503_v62 }
 0x24c   : > { %v1890_v21 = vsel %vm1344_vm8, %v1882_v50, %v4492_v52  ;;  %v1891_v34 = vsel %vm1344_vm8, %v1883_v11, %v4493_v30  ;;  %v2092_v56 = vsel %vm925_vm2, %v5150_v43, %v4502_v63  ;;  %v2101_v40 = vsel %vm1308_vm4, %v2093_v55, %v4508_v59 }
 0x24d   : > { %v1880_v41 = vsel %vm1335_vm7, %v1872_v25, %v4537_v39  ;;  %v1881_v23 = vsel %vm1335_vm7, %v1873_v6, %v4538_v57  ;;  %2412 = vmatmul.mubr.bf16.gmra.mrb[36].mxu1 %v2166_v16  ;;  %v1898_v24 = vsel %vm1353_vm9, %v1890_v21, %v4497_v31  ;;  %v1899_v37 = vsel %vm1353_vm9, %v1891_v34, %v4498_v45  ;;  %v1900_v6 = vld [vmem:[#allocation2 + $0x1c1] sm:$0xff]  ;;  %v1903_v34 = vld [vmem:[#allocation2 + $0x1f1] sm:$0xff] }
 0x24e   : > { %v6689_v22 = vpop.permute.xlu0 %4540  ;;  %v4546_v0 = vpop.permute.xlu1 %4545  ;;  %v1888_v13 = vsel %vm1344_vm8, %v1880_v41, %v4447_v36  ;;  %v1889_v32 = vsel %vm1344_vm8, %v1881_v23, %v4448_v2  ;;  %3800 = vmatprep.mubr.msk.bf16.mxu1 %vm925_vm2, %v7443_v61  ;;  %v2100_v9 = vsel %vm1308_vm4, %v2092_v56, %v4507_v14  ;;  %v4518_v1 = vunpack.i.h.bf16 %v6656_v26 }
 0x24f   : > { %v1896_v19 = vsel %vm1353_vm9, %v1888_v13, %v4452_v49  ;;  %v1897_v15 = vsel %vm1353_vm9, %v1889_v32, %v4453_v12  ;;  %v4517_v48 = vunpack.i.l.bf16 %v6656_v26  ;;  %v4547_v47 = vunpack.i.l.bf16 %v4546_v0  ;;  %v1901_v49 = vld [vmem:[#allocation2 + $0x1d1] sm:$0xff] }
 0x250   : > { %v2168_v44 = vpack.c.bf16 %v1897_v15, %v1896_v19  ;;  %v4513_v28 = vunpack.i.h.bf16 %v6624_v5  ;;  %v4512_v51 = vunpack.i.l.bf16 %v6624_v5  ;;  %v4548_v2 = vunpack.i.h.bf16 %v4546_v0 }
 0x251   : > { %v7444_v7 = vpack.c.bf16 %v5730_v53, %v5728_v54  ;;  %v2170_v10 = vpack.c.bf16 %v1899_v37, %v1898_v24  ;;  %v4523_v3 = vunpack.i.h.bf16 %v6644_v20  ;;  %v4522_v26 = vunpack.i.l.bf16 %v6644_v20 }
 0x252   : > { %v4551_v29 = vpop.permute.xlu0 %4550  ;;  %v4556_v16 = vpop.permute.xlu1 %4555  ;;  %v2108_v27 = vsel %vm1317_vm5, %v2100_v9, %v4512_v51  ;;  %v2109_v57 = vsel %vm1317_vm5, %v2101_v40, %v4513_v28  ;;  %v2094_v58 = vsel %vm925_vm2, %v5151_v18, %v4547_v47  ;;  %v2095_v17 = vsel %vm925_vm2, %v5152_v8, %v4548_v2  ;;  %v5153_v2 = vld [vmem:[#allocation2 + $0x1f0] sm:$0xff] }
 0x253   : > { %v4552_v36 = vunpack.i.l.bf16 %v4551_v29  ;;  %v4553_v42 = vunpack.i.h.bf16 %v4551_v29  ;;  %v2116_v39 = vsel %vm1326_vm6, %v2108_v27, %v4517_v48  ;;  %v2117_v5 = vsel %vm1326_vm6, %v2109_v57, %v4518_v1  ;;  %v1902_v48 = vld [vmem:[#allocation2 + $0x1e1] sm:$0xff] }
 0x254   : > { %v4557_v54 = vunpack.i.l.bf16 %v4556_v16  ;;  %v4558_v41 = vunpack.i.h.bf16 %v4556_v16  ;;  %v4528_v12 = vunpack.i.h.bf16 %v6676_v35  ;;  %v4527_v0 = vunpack.i.l.bf16 %v6676_v35 }
 0x255   : > { %2420 = vmatmul.mubr.bf16.gmra.mrb[40].mxu1 %v2168_v44  ;;  %v2102_v20 = vsel %vm1308_vm4, %v2094_v58, %v4552_v36  ;;  %v2103_v13 = vsel %vm1308_vm4, %v2095_v17, %v4553_v42  ;;  %v4543_v62 = vunpack.i.h.bf16 %v6689_v22  ;;  %v4542_v38 = vunpack.i.l.bf16 %v6689_v22 }
 0x256   : > { %v4561_v33 = vpop.permute.xlu0 %4560  ;;  %v4566_v46 = vpop.permute.xlu1 %4565  ;;  %3801 = vmatprep.mubr.msk.bf16.mxu1 %vm925_vm2, %v7444_v7  ;;  %v2173_v4 = vpack.c.bf16 %v1901_v49, %v1900_v6  ;;  %v2124_v61 = vsel %vm1335_vm7, %v2116_v39, %v4522_v26  ;;  %v2125_v63 = vsel %vm1335_vm7, %v2117_v5, %v4523_v3  ;;  %v2110_v50 = vsel %vm1317_vm5, %v2102_v20, %v4557_v54  ;;  %v1904_v3 = vld [vmem:[#allocation2 + $0x201] sm:$0xff]  ;;  %v1905_v39 = vld [vmem:[#allocation2 + $0x211] sm:$0xff] }
 0x257   : > { %v4562_v23 = vunpack.i.l.bf16 %v4561_v33  ;;  %v4563_v32 = vunpack.i.h.bf16 %v4561_v33  ;;  %v4567_v11 = vunpack.i.l.bf16 %v4566_v46  ;;  %v2111_v35 = vsel %vm1317_vm5, %v2103_v13, %v4558_v41  ;;  %v5154_v26 = vld [vmem:[#allocation2 + $0x200] sm:$0xff] }
 0x258   : > { %v4568_v19 = vunpack.i.h.bf16 %v4566_v46  ;;  %v2132_v22 = vsel %vm1344_vm8, %v2124_v61, %v4527_v0  ;;  %v2133_v30 = vsel %vm1344_vm8, %v2125_v63, %v4528_v12  ;;  %v2175_v47 = vpack.c.bf16 %v1903_v34, %v1902_v48  ;;  %v1906_v34 = vld [vmem:[#allocation2 + $0x221] sm:$0xff] }
 0x259   : > { %v2118_v59 = vsel %vm1326_vm6, %v2110_v50, %v4562_v23  ;;  %v2119_v52 = vsel %vm1326_vm6, %v2111_v35, %v4563_v32  ;;  %v2140_v29 = vsel %vm1353_vm9, %v2132_v22, %v4542_v38  ;;  %v2141_v16 = vsel %vm1353_vm9, %v2133_v30, %v4543_v62  ;;  %v5155_v38 = vld [vmem:[#allocation2 + $0x220] sm:$0xff] }
 0x25a   : > { %v4571_v53 = vpop.permute.xlu0 %4570  ;;  %v4576_v25 = vpop.permute.xlu1 %4575  ;;  %v2126_v60 = vsel %vm1335_vm7, %v2118_v59, %v4567_v11  ;;  %v2127_v43 = vsel %vm1335_vm7, %v2119_v52, %v4568_v19  ;;  %v2172_v1 = vpack.c.bf16 %v2141_v16, %v2140_v29 }
 0x25b   : > { %v4572_v15 = vunpack.i.l.bf16 %v4571_v53  ;;  %v4573_v14 = vunpack.i.h.bf16 %v4571_v53  ;;  %v4577_v55 = vunpack.i.l.bf16 %v4576_v25  ;;  %v4578_v40 = vunpack.i.h.bf16 %v4576_v25 }
 0x25c   : > { %v2177_v25 = vpack.c.bf16 %v1905_v39, %v1904_v3 }
 0x25d   : > { %2428 = vmatmul.mubr.bf16.gmra.mrb[44].mxu1 %v2170_v10  ;;  %v2134_v56 = vsel %vm1344_vm8, %v2126_v60, %v4572_v15  ;;  %v2135_v37 = vsel %vm1344_vm8, %v2127_v43, %v4573_v14  ;;  %v5156_v15 = vld [vmem:[#allocation2 + $0x210] sm:$0xff] }
 0x25e   : > { %v4581_v45 = vpop.permute.xlu0 %4580  ;;  %v4586_v31 = vpop.permute.xlu1 %4585  ;;  %3802 = vmatprep.mubr.msk.bf16.mxu1 %vm925_vm2, %v2173_v4  ;;  %v2142_v51 = vsel %vm1353_vm9, %v2134_v56, %v4577_v55  ;;  %v2143_v10 = vsel %vm1353_vm9, %v2135_v37, %v4578_v40  ;;  %v1907_v43 = vld [vmem:[#allocation2 + $0x231] sm:$0xff] }
 0x25f   : > { %v4582_v24 = vunpack.i.l.bf16 %v4581_v45  ;;  %v4583_v9 = vunpack.i.h.bf16 %v4581_v45  ;;  %v4587_v33 = vunpack.i.l.bf16 %v4586_v31  ;;  %v4588_v7 = vunpack.i.h.bf16 %v4586_v31 }
 0x260   : > { %v2174_v53 = vpack.c.bf16 %v2143_v10, %v2142_v51 }
 0x261   : > { %v2096_v36 = vsel %vm925_vm2, %v5153_v2, %v4582_v24  ;;  %v2097_v27 = vsel %vm925_vm2, %v5154_v26, %v4583_v9 }
 0x262   : > { %v4591_v44 = vpop.permute.xlu0 %4590  ;;  %v6754_v21 = vpop.permute.xlu1 %4600  ;;  %v2104_v5 = vsel %vm1308_vm4, %v2096_v36, %v4587_v33  ;;  %v2105_v6 = vsel %vm1308_vm4, %v2097_v27, %v4588_v7 }
 0x263   : > { %v4592_v42 = vunpack.i.l.bf16 %v4591_v44  ;;  %v4593_v57 = vunpack.i.h.bf16 %v4591_v44  ;;  %v4603_v13 = vunpack.i.h.bf16 %v6754_v21  ;;  %v4602_v32 = vunpack.i.l.bf16 %v6754_v21 }
 0x265   : > { %2436 = vmatmul.mubr.bf16.gmra.mrb[48].mxu1 %v2172_v1  ;;  %v2112_v8 = vsel %vm1317_vm5, %v2104_v5, %v4592_v42  ;;  %v2113_v41 = vsel %vm1317_vm5, %v2105_v6, %v4593_v57 }
 0x266   : > { %v4596_v46 = vpop.permute.xlu0 %4595  ;;  %v4611_v28 = vpop.permute.xlu1 %4610  ;;  %3803 = vmatprep.mubr.msk.bf16.mxu1 %vm925_vm2, %v2175_v47 }
 0x267   : > { %v4613_v18 = vunpack.i.h.bf16 %v4611_v28  ;;  %v4598_v23 = vunpack.i.h.bf16 %v4596_v46  ;;  %v4597_v12 = vunpack.i.l.bf16 %v4596_v46  ;;  %v4612_v0 = vunpack.i.l.bf16 %v4611_v28 }
 0x268   : > { %v2179_v46 = vpack.c.bf16 %v1907_v43, %v1906_v34 }
 0x269   : > { %v2099_v4 = vsel %vm925_vm2, %v5155_v38, %v4613_v18  ;;  %v2098_v22 = vsel %vm925_vm2, %v5156_v15, %v4612_v0  ;;  %v7445_v18 = vmov 0.0  }
 0x26a   : > { %v4606_v58 = vpop.permute.xlu0 %4605  ;;  %v4621_v54 = vpop.permute.xlu1 %4620  ;;  %2740 = vst.msk [vmem:[#allocation3 + $0x120] sm:$0x1] %vm2701_vm10, %v7445_v18  ;;  %2741 = vst.msk [vmem:[#allocation3 + $0x130] sm:$0x1] %vm2701_vm10, %v7445_v18 }
 0x26b   : > { %v4623_v17 = vunpack.i.h.bf16 %v4621_v54  ;;  %v4622_v20 = vunpack.i.l.bf16 %v4621_v54  ;;  %v4608_v61 = vunpack.i.h.bf16 %v4606_v58  ;;  %v4607_v31 = vunpack.i.l.bf16 %v4606_v58  ;;  %2702 = vst.msk [vmem:[#allocation3] sm:$0x1] %vm2701_vm10, %v7445_v18  ;;  %2703 = vst.msk [vmem:[#allocation3 + $0x10] sm:$0x1] %vm2701_vm10, %v7445_v18  ;;  %v6831_v58 = vld [vmem:[%s7308_s4] ss:$0 sm:$0xff] }
 0x26c   : > { %2704 = vst.msk [vmem:[#allocation3 + $0x20] sm:$0x1] %vm2701_vm10, %v7445_v18  ;;  %2705 = vst.msk [vmem:[#allocation3 + $0x30] sm:$0x1] %vm2701_vm10, %v7445_v18 }
 0x26d   : > { %v2120_v49 = vsel %vm1326_vm6, %v2112_v8, %v4622_v20  ;;  %v2121_v62 = vsel %vm1326_vm6, %v2113_v41, %v4623_v17  ;;  %2444 = vmatmul.mubr.bf16.gmra.mrb[52].mxu1 %v2174_v53  ;;  %2706 = vst.msk [vmem:[#allocation3 + $0x40] sm:$0x1] %vm2701_vm10, %v7445_v18  ;;  %2707 = vst.msk [vmem:[#allocation3 + $0x50] sm:$0x1] %vm2701_vm10, %v7445_v18 }
 0x26e   : > { %v2128_v63 = vsel %vm1335_vm7, %v2120_v49, %v4597_v12  ;;  %v2129_v50 = vsel %vm1335_vm7, %v2121_v62, %v4598_v23  ;;  %v4616_v11 = vpop.permute.xlu0 %4615  ;;  %v4626_v45 = vpop.permute.xlu1 %4625  ;;  %3804 = vmatprep.mubr.msk.bf16.mxu1 %vm925_vm2, %v2177_v25  ;;  %2708 = vst.msk [vmem:[#allocation3 + $0x60] sm:$0x1] %vm2701_vm10, %v7445_v18  ;;  %2709 = vst.msk [vmem:[#allocation3 + $0x70] sm:$0x1] %vm2701_vm10, %v7445_v18 }
 0x26f   : > { %v4618_v35 = vunpack.i.h.bf16 %v4616_v11  ;;  %v4617_v59 = vunpack.i.l.bf16 %v4616_v11  ;;  %v4627_v19 = vunpack.i.l.bf16 %v4626_v45  ;;  %v4628_v30 = vunpack.i.h.bf16 %v4626_v45  ;;  %2710 = vst.msk [vmem:[#allocation3 + $0x80] sm:$0x1] %vm2701_vm10, %v7445_v18  ;;  %2742 = vst.msk [vmem:[#allocation3 + $0x140] sm:$0x1] %vm2701_vm10, %v7445_v18 }
 0x270   : > { %v2136_v52 = vsel %vm1344_vm8, %v2128_v63, %v4602_v32  ;;  %v2137_v14 = vsel %vm1344_vm8, %v2129_v50, %v4603_v13  ;;  %2743 = vst.msk [vmem:[#allocation3 + $0x150] sm:$0x1] %vm2701_vm10, %v7445_v18  ;;  %2744 = vst.msk [vmem:[#allocation3 + $0x160] sm:$0x1] %vm2701_vm10, %v7445_v18 }
 0x271   : > { %v2106_v29 = vsel %vm1308_vm4, %v2098_v22, %v4617_v59  ;;  %v2107_v16 = vsel %vm1308_vm4, %v2099_v4, %v4618_v35  ;;  %v2144_v60 = vsel %vm1353_vm9, %v2136_v52, %v4607_v31  ;;  %v2145_v55 = vsel %vm1353_vm9, %v2137_v14, %v4608_v61  ;;  %2745 = vst.msk [vmem:[#allocation3 + $0x170] sm:$0x1] %vm2701_vm10, %v7445_v18 }
 0x272   : > { %v4631_v44 = vpop.permute.xlu0 %4630  ;;  %v4636_v21 = vpop.permute.xlu1 %4635  ;;  %v2114_v56 = vsel %vm1317_vm5, %v2106_v29, %v4627_v19  ;;  %v2115_v37 = vsel %vm1317_vm5, %v2107_v16, %v4628_v30  ;;  %v2176_v48 = vpack.c.bf16 %v2145_v55, %v2144_v60  ;;  %2746 = vst.msk [vmem:[#allocation3 + $0x180] sm:$0x1] %vm2701_vm10, %v7445_v18  ;;  %2747 = vst.msk [vmem:[#allocation3 + $0x190] sm:$0x1] %vm2701_vm10, %v7445_v18 }
 0x273   : > { %v4633_v40 = vunpack.i.h.bf16 %v4631_v44  ;;  %v4632_v24 = vunpack.i.l.bf16 %v4631_v44  ;;  %v4638_v9 = vunpack.i.h.bf16 %v4636_v21  ;;  %v4637_v1 = vunpack.i.l.bf16 %v4636_v21 }
 0x275   : > { %v2122_v47 = vsel %vm1326_vm6, %v2114_v56, %v4632_v24  ;;  %v2123_v33 = vsel %vm1326_vm6, %v2115_v37, %v4633_v40  ;;  %2452 = vmatmul.mubr.bf16.gmra.mrb[56].mxu1 %v2176_v48 }
 0x276   : > { %v4641_v28 = vpop.permute.xlu0 %4640  ;;  %v4646_v36 = vpop.permute.xlu1 %4645  ;;  %3805 = vmatprep.mubr.msk.bf16.mxu1 %vm925_vm2, %v2179_v46  ;;  %v2130_v7 = vsel %vm1335_vm7, %v2122_v47, %v4637_v1  ;;  %v2131_v42 = vsel %vm1335_vm7, %v2123_v33, %v4638_v9 }
 0x277   : > { %v4643_v51 = vunpack.i.h.bf16 %v4641_v28  ;;  %v4642_v2 = vunpack.i.l.bf16 %v4641_v28  ;;  %v4648_v10 = vunpack.i.h.bf16 %v4646_v36  ;;  %v4647_v3 = vunpack.i.l.bf16 %v4646_v36 }
 0x279   : > { %v2138_v26 = vsel %vm1344_vm8, %v2130_v7, %v4642_v2  ;;  %v2139_v27 = vsel %vm1344_vm8, %v2131_v42, %v4643_v51 }
 0x27a   : > { %v2146_v57 = vsel %vm1353_vm9, %v2138_v26, %v4647_v3  ;;  %v2147_v39 = vsel %vm1353_vm9, %v2139_v27, %v4648_v10 }
 0x27b   : > { %v2178_v5 = vpack.c.bf16 %v2147_v39, %v2146_v57 }
 0x27d   : > { %2460 = vmatmul.mubr.bf16.gmra.mrb[60].mxu1 %v2178_v5 }
 0x2d4   : > { %v2341_v54 = vpop.f32.mrb[0].mxu1 }
 0x2d5   : > { %v2342_v53 = vadd.f32 %v6831_v58, %v2341_v54  ;;  %v2343_v25 = vpop.f32.mrb[1].mxu1 }
 0x2d6   : > { %v2344_v6 = vpop.f32.mrb[2].mxu1 }
 0x2d7   : > { %v3806_v8 = vmul.f32 -1.442695, %v2342_v53  ;;  %v2345_v17 = vadd.f32 %v6831_v58, %v2344_v6  ;;  %v2346_v20 = vpop.f32.mrb[3].mxu1 }
 0x2d9   : > { %4949 = vpow2.f32 %v3806_v8  ;;  %v3807_v41 = vmul.f32 -1.442695, %v2345_v17 }
 0x2db   : > { %4951 = vpow2.f32 %v3807_v41 }
 0x2dc   : > { %v2349_v23 = vpop.f32.mrb[4].mxu1 }
 0x2dd   : > { %v2350_v12 = vadd.f32 %v6831_v58, %v2349_v23  ;;  %v2351_v0 = vpop.f32.mrb[5].mxu1 }
 0x2de   : > { %v2352_v13 = vpop.f32.mrb[6].mxu1 }
 0x2df   : > { %v3808_v32 = vmul.f32 -1.442695, %v2350_v12  ;;  %v2353_v49 = vadd.f32 %v6831_v58, %v2352_v13  ;;  %v2354_v62 = vpop.f32.mrb[7].mxu1 }
 0x2e1   : > { %4953 = vpow2.f32 %v3808_v32  ;;  %v3809_v38 = vmul.f32 -1.442695, %v2353_v49 }
 0x2e3   : > { %v4950_v4 = vpop.eup %4949  ;;  %4955 = vpow2.f32 %v3809_v38 }
 0x2e4   : > { %v2564_v61 = vadd.f32 1.0, %v4950_v4  ;;  %v2357_v63 = vpop.f32.mrb[8].mxu1 }
 0x2e5   : > { %v4952_v50 = vpop.eup %4951  ;;  %v6838_v11 = vadd.f32 %v6831_v58, %v2357_v63  ;;  %v2359_v45 = vpop.f32.mrb[9].mxu1 }
 0x2e6   : > { %4957 = vrcp.f32 %v2564_v61  ;;  %v2565_v31 = vadd.f32 1.0, %v4952_v50  ;;  %v2360_v35 = vpop.f32.mrb[10].mxu1 }
 0x2e7   : > { %v3810_v59 = vmul.f32 -1.442695, %v6838_v11  ;;  %v6842_v19 = vadd.f32 %v6831_v58, %v2360_v35  ;;  %v2362_v15 = vpop.f32.mrb[11].mxu1 }
 0x2e8   : > { %4959 = vrcp.f32 %v2565_v31 }
 0x2e9   : > { %4961 = vpow2.f32 %v3810_v59  ;;  %v3811_v22 = vmul.f32 -1.442695, %v6842_v19 }
 0x2eb   : > { %v4954_v30 = vpop.eup %4953  ;;  %4963 = vpow2.f32 %v3811_v22 }
 0x2ec   : > { %v2566_v52 = vadd.f32 1.0, %v4954_v30 }
 0x2ed   : > { %v4956_v14 = vpop.eup %4955 }
 0x2ee   : > { %4965 = vrcp.f32 %v2566_v52  ;;  %v2567_v29 = vadd.f32 1.0, %v4956_v14 }
 0x2f0   : > { %v2365_v16 = vpop.f32.mrb[12].mxu1  ;;  %v4958_v44 = vpop.eup %4957  ;;  %4967 = vrcp.f32 %v2567_v29 }
 0x2f1   : > { %v6846_v60 = vadd.f32 %v6831_v58, %v2365_v16  ;;  %v2367_v55 = vpop.f32.mrb[13].mxu1  ;;  %v2660_v34 = vmul.f32 %v4958_v44, %v2342_v53 }
 0x2f2   : > { %v2368_v21 = vpop.f32.mrb[14].mxu1  ;;  %v4960_v24 = vpop.eup %4959 }
 0x2f3   : > { %v3812_v43 = vmul.f32 -1.442695, %v6846_v60  ;;  %v6850_v56 = vadd.f32 %v6831_v58, %v2368_v21  ;;  %v2370_v40 = vpop.f32.mrb[15].mxu1  ;;  %v4962_v37 = vpop.eup %4961  ;;  %2750 = vst.msk [vmem:[#allocation3 + $0x1b0] sm:$0xff] %vm1308_vm4, %v2660_v34  ;;  %v2661_v9 = vmul.f32 %v4960_v24, %v2345_v17 }
 0x2f4   : > { %v2568_v48 = vadd.f32 1.0, %v4962_v37 }
 0x2f5   : > { %4969 = vpow2.f32 %v3812_v43  ;;  %v3813_v1 = vmul.f32 -1.442695, %v6850_v56  ;;  %v4964_v47 = vpop.eup %4963  ;;  %2751 = vst.msk [vmem:[#allocation3 + $0x1c0] sm:$0xff] %vm1308_vm4, %v2661_v9 }
 0x2f6   : > { %v2569_v33 = vadd.f32 1.0, %v4964_v47 }
 0x2f7   : > { %4971 = vpow2.f32 %v3813_v1 }
 0x2f8   : > { %4973 = vrcp.f32 %v2568_v48  ;;  %v2373_v46 = vpop.f32.mrb[16].mxu1  ;;  %v4966_v2 = vpop.eup %4965 }
 0x2f9   : > { %v6856_v28 = vadd.f32 %v6831_v58, %v2373_v46  ;;  %v2375_v51 = vpop.f32.mrb[17].mxu1  ;;  %4975 = vrcp.f32 %v2569_v33  ;;  %v2662_v7 = vmul.f32 %v4966_v2, %v2350_v12 }
 0x2fa   : > { %v2376_v36 = vpop.f32.mrb[18].mxu1  ;;  %v4968_v26 = vpop.eup %4967 }
 0x2fb   : > { %v3814_v42 = vmul.f32 -1.442695, %v6856_v28  ;;  %v6860_v10 = vadd.f32 %v6831_v58, %v2376_v36  ;;  %v2378_v3 = vpop.f32.mrb[19].mxu1  ;;  %2752 = vst.msk [vmem:[#allocation3 + $0x1d0] sm:$0xff] %vm1308_vm4, %v2662_v7  ;;  %v2663_v27 = vmul.f32 %v4968_v26, %v2353_v49 }
 0x2fd   : > { %4977 = vpow2.f32 %v3814_v42  ;;  %v3815_v57 = vmul.f32 -1.442695, %v6860_v10  ;;  %2753 = vst.msk [vmem:[#allocation3 + $0x1e0] sm:$0xff] %vm1308_vm4, %v2663_v27 }
 0x2ff   : > { %v4970_v39 = vpop.eup %4969  ;;  %4979 = vpow2.f32 %v3815_v57 }
 0x300   : > { %v2570_v5 = vadd.f32 1.0, %v4970_v39  ;;  %v2381_v18 = vpop.f32.mrb[20].mxu1 }
 0x301   : > { %v4972_v54 = vpop.eup %4971  ;;  %v6866_v53 = vadd.f32 %v6831_v58, %v2381_v18  ;;  %v2383_v25 = vpop.f32.mrb[21].mxu1 }
 0x302   : > { %v4974_v6 = vpop.eup %4973  ;;  %4981 = vrcp.f32 %v2570_v5  ;;  %v2571_v8 = vadd.f32 1.0, %v4972_v54  ;;  %v2384_v17 = vpop.f32.mrb[22].mxu1 }
 0x303   : > { %v2664_v20 = vmul.f32 %v4974_v6, %v6838_v11  ;;  %v3816_v41 = vmul.f32 -1.442695, %v6866_v53  ;;  %v6871_v23 = vadd.f32 %v6831_v58, %v2384_v17  ;;  %v2386_v12 = vpop.f32.mrb[23].mxu1  ;;  %v4976_v0 = vpop.eup %4975 }
 0x304   : > { %4983 = vrcp.f32 %v2571_v8  ;;  %v2665_v13 = vmul.f32 %v4976_v0, %v6842_v19 }
 0x305   : > { %2754 = vst.msk [vmem:[#allocation3 + $0x1f0] sm:$0xff] %vm1308_vm4, %v2664_v20  ;;  %4985 = vpow2.f32 %v3816_v41  ;;  %v3817_v32 = vmul.f32 -1.442695, %v6871_v23 }
 0x306   : > { %2755 = vst.msk [vmem:[#allocation3 + $0x200] sm:$0xff] %vm1308_vm4, %v2665_v13  ;;  %v4800_v13 = vld [vmem:[%s7309_s5] sm:$0xff]  }
 0x307   : > { %v4978_v49 = vpop.eup %4977  ;;  %4987 = vpow2.f32 %v3817_v32  ;;  %v4801_v32 = vld [vmem:[%s7309_s5 + $0x48] sm:$0xff]  }
 0x308   : > { %v2572_v62 = vadd.f32 1.0, %v4978_v49  ;;  %v2389_v38 = vpop.f32.mrb[24].mxu1 }
 0x309   : > { %v4980_v4 = vpop.eup %4979  ;;  %v6878_v61 = vadd.f32 %v6831_v58, %v2389_v38  ;;  %v2391_v63 = vpop.f32.mrb[25].mxu1 }
 0x30a   : > { %4989 = vrcp.f32 %v2572_v62  ;;  %v2573_v50 = vadd.f32 1.0, %v4980_v4  ;;  %v2392_v11 = vpop.f32.mrb[26].mxu1 }
 0x30b   : > { %v3818_v45 = vmul.f32 -1.442695, %v6878_v61  ;;  %v6882_v31 = vadd.f32 %v6831_v58, %v2392_v11  ;;  %v2394_v35 = vpop.f32.mrb[27].mxu1  ;;  %v4802_v11 = vld [vmem:[%s7309_s5 + $0x8] sm:$0xff]  }
 0x30c   : > { %v4982_v59 = vpop.eup %4981  ;;  %4991 = vrcp.f32 %v2573_v50 }
 0x30d   : > { %v2666_v19 = vmul.f32 %v4982_v59, %v6846_v60  ;;  %4993 = vpow2.f32 %v3818_v45  ;;  %v3819_v15 = vmul.f32 -1.442695, %v6882_v31  ;;  %v4803_v59 = vld [vmem:[%s7309_s5 + $0x50] sm:$0xff]  }
 0x30e   : > { %v4984_v22 = vpop.eup %4983 }
 0x30f   : > { %v4986_v30 = vpop.eup %4985  ;;  %2756 = vst.msk [vmem:[#allocation3 + $0x210] sm:$0xff] %vm1308_vm4, %v2666_v19  ;;  %v2667_v52 = vmul.f32 %v4984_v22, %v6850_v56  ;;  %4995 = vpow2.f32 %v3819_v15 }
 0x310   : > { %v2574_v14 = vadd.f32 1.0, %v4986_v30  ;;  %v2397_v29 = vpop.f32.mrb[28].mxu1 }
 0x311   : > { %v4988_v16 = vpop.eup %4987  ;;  %2757 = vst.msk [vmem:[#allocation3 + $0x220] sm:$0xff] %vm1308_vm4, %v2667_v52  ;;  %v6890_v55 = vadd.f32 %v6831_v58, %v2397_v29  ;;  %v2399_v44 = vpop.f32.mrb[29].mxu1 }
 0x312   : > { %4997 = vrcp.f32 %v2574_v14  ;;  %v2575_v60 = vadd.f32 1.0, %v4988_v16  ;;  %v2400_v21 = vpop.f32.mrb[30].mxu1 }
 0x313   : > { %v3820_v34 = vmul.f32 -1.442695, %v6890_v55  ;;  %v6894_v43 = vadd.f32 %v6831_v58, %v2400_v21  ;;  %v2402_v40 = vpop.f32.mrb[31].mxu1 }
 0x314   : > { %v4990_v56 = vpop.eup %4989  ;;  %4999 = vrcp.f32 %v2575_v60 }
 0x315   : > { %v2668_v24 = vmul.f32 %v4990_v56, %v6856_v28  ;;  %5001 = vpow2.f32 %v3820_v34  ;;  %v3821_v37 = vmul.f32 -1.442695, %v6894_v43 }
 0x316   : > { %v4992_v9 = vpop.eup %4991 }
 0x317   : > { %v4994_v1 = vpop.eup %4993  ;;  %2731 = vst.msk [vmem:[#allocation3 + $0x121] sm:$0xff] %vm1308_vm4, %v2668_v24  ;;  %v2669_v48 = vmul.f32 %v4992_v9, %v6860_v10  ;;  %5003 = vpow2.f32 %v3821_v37 }
 0x318   : > { %v2576_v47 = vadd.f32 1.0, %v4994_v1  ;;  %v2405_v33 = vpop.f32.mrb[32].mxu1 }
 0x319   : > { %v4996_v46 = vpop.eup %4995  ;;  %2732 = vst.msk [vmem:[#allocation3 + $0x131] sm:$0xff] %vm1308_vm4, %v2669_v48  ;;  %v6902_v51 = vadd.f32 %v6831_v58, %v2405_v33  ;;  %v2407_v2 = vpop.f32.mrb[33].mxu1 }
 0x31a   : > { %5005 = vrcp.f32 %v2576_v47  ;;  %v2577_v28 = vadd.f32 1.0, %v4996_v46  ;;  %v2408_v36 = vpop.f32.mrb[34].mxu1 }
 0x31b   : > { %v3822_v7 = vmul.f32 -1.442695, %v6902_v51  ;;  %v6906_v42 = vadd.f32 %v6831_v58, %v2408_v36  ;;  %v2410_v3 = vpop.f32.mrb[35].mxu1 }
 0x31c   : > { %v4998_v10 = vpop.eup %4997  ;;  %5007 = vrcp.f32 %v2577_v28 }
 0x31d   : > { %v2670_v26 = vmul.f32 %v4998_v10, %v6866_v53  ;;  %5009 = vpow2.f32 %v3822_v7  ;;  %v3823_v27 = vmul.f32 -1.442695, %v6906_v42  ;;  %v4799_v53 = vld [vmem:[%s7309_s5 + $0x40] sm:$0xff]  }
 0x31e   : > { %v5000_v57 = vpop.eup %4999  ;;  %v2808_v18 = vld [vmem:[#allocation3 + $0x121] sm:$0xff]  ;;  %3914 = vmatprep.subr.bf16.mxu0 %v4799_v53  ;;  %v4806_v53 = vld [vmem:[%s7309_s5 + $0x18] sm:$0xff]  }
 0x31f   : > { %v5002_v39 = vpop.eup %5001  ;;  %2733 = vst.msk [vmem:[#allocation3 + $0x141] sm:$0xff] %vm1308_vm4, %v2670_v26  ;;  %v2671_v5 = vmul.f32 %v5000_v57, %v6871_v23  ;;  %5011 = vpow2.f32 %v3823_v27  ;;  %v2792_v54 = vld [vmem:[#allocation3 + $0x120] sm:$0xff]  ;;  %3915 = vmatpush3.bf16.msra.mxu0 %v4800_v13 }
 0x320   : > { %v2578_v25 = vadd.f32 1.0, %v5002_v39  ;;  %v2413_v6 = vpop.f32.mrb[36].mxu1  ;;  %v2809_v8 = vld [vmem:[#allocation3 + $0x131] sm:$0xff]  ;;  %3916 = vmatprep.subr.bf16.mxu0 %v4801_v32 }
 0x321   : > { %v2793_v17 = vld [vmem:[#allocation3 + $0x130] sm:$0xff]  ;;  %v5004_v20 = vpop.eup %5003  ;;  %2734 = vst.msk [vmem:[#allocation3 + $0x151] sm:$0xff] %vm1308_vm4, %v2671_v5  ;;  %v6917_v41 = vadd.f32 %v6831_v58, %v2413_v6  ;;  %v2415_v12 = vpop.f32.mrb[37].mxu1  ;;  %v4649_v0 = vpack.i.bf16 %v2809_v8, %v2808_v18  ;;  %v4805_v6 = vld [vmem:[%s7309_s5 + $0x58] sm:$0xff]  }
 0x322   : > { %v4654_v23 = vpack.i.bf16 %v2793_v17, %v2792_v54  ;;  %5013 = vrcp.f32 %v2578_v25  ;;  %v2579_v49 = vadd.f32 1.0, %v5004_v20  ;;  %v2416_v62 = vpop.f32.mrb[38].mxu1 }
 0x323   : > { %v3824_v38 = vmul.f32 -1.442695, %v6917_v41  ;;  %v6927_v4 = vadd.f32 %v6831_v58, %v2416_v62  ;;  %v2418_v63 = vpop.f32.mrb[39].mxu1  ;;  %4650 = vrot.lane.b32.xlu0 %v4649_v0, %s5226_s14  ;;  %3917 = vmatpush3.bf16.msra.mxu0 %v4802_v11 }
 0x324   : > { %4655 = vrot.lane.b32.xlu1 %v4654_v23, %s5227_s16  ;;  %v5006_v50 = vpop.eup %5005  ;;  %5015 = vrcp.f32 %v2579_v49  ;;  %3918 = vmatprep.subr.bf16.mxu0 %v4803_v59  ;;  %v2776_v63 = vld [vmem:[#allocation3 + $0x90] sm:$0xff]  ;;  %v4807_v59 = vld [vmem:[%s7309_s5 + $0x60] sm:$0xff]  }
 0x325   : > { %v2672_v45 = vmul.f32 %v5006_v50, %v6878_v61  ;;  %5017 = vpow2.f32 %v3824_v38  ;;  %v3825_v35 = vmul.f32 -1.442695, %v6927_v4  ;;  %v4804_v61 = vld [vmem:[%s7309_s5 + $0x10] sm:$0xff]  }
 0x326   : > { %v5008_v19 = vpop.eup %5007  ;;  %v2810_v30 = vld [vmem:[#allocation3 + $0x141] sm:$0xff] }
 0x327   : > { %v5010_v15 = vpop.eup %5009  ;;  %2735 = vst.msk [vmem:[#allocation3 + $0x161] sm:$0xff] %vm1308_vm4, %v2672_v45  ;;  %v2673_v22 = vmul.f32 %v5008_v19, %v6882_v31  ;;  %5019 = vpow2.f32 %v3825_v35  ;;  %v2794_v16 = vld [vmem:[#allocation3 + $0x140] sm:$0xff]  ;;  %3919 = vmatpush3.bf16.msra.mxu0 %v4804_v61 }
 0x328   : > { %v2580_v52 = vadd.f32 1.0, %v5010_v15  ;;  %v2421_v14 = vpop.f32.mrb[40].mxu1  ;;  %v2811_v29 = vld [vmem:[#allocation3 + $0x151] sm:$0xff]  ;;  %3920 = vmatprep.subr.bf16.mxu0 %v4805_v6  ;;  %v4808_v19 = vld [vmem:[%s7309_s5 + $0x20] sm:$0xff]  }
 0x329   : > { %v2795_v44 = vld [vmem:[#allocation3 + $0x150] sm:$0xff]  ;;  %v5012_v60 = vpop.eup %5011  ;;  %2736 = vst.msk [vmem:[#allocation3 + $0x171] sm:$0xff] %vm1308_vm4, %v2673_v22  ;;  %v6946_v21 = vadd.f32 %v6831_v58, %v2421_v14  ;;  %v2423_v34 = vpop.f32.mrb[41].mxu1  ;;  %v4659_v31 = vpack.i.bf16 %v2811_v29, %v2810_v30  ;;  %v4809_v30 = vld [vmem:[%s7309_s5 + $0x68] sm:$0xff]  }
 0x32a   : > { %v4664_v40 = vpack.i.bf16 %v2795_v44, %v2794_v16  ;;  %5021 = vrcp.f32 %v2580_v52  ;;  %v2581_v56 = vadd.f32 1.0, %v5012_v60  ;;  %v2424_v24 = vpop.f32.mrb[42].mxu1  ;;  %v4810_v60 = vld [vmem:[%s7309_s5 + $0x28] sm:$0xff]  }
 0x32b   : > { %v3826_v37 = vmul.f32 -1.442695, %v6946_v21  ;;  %v6950_v9 = vadd.f32 %v6831_v58, %v2424_v24  ;;  %v2426_v1 = vpop.f32.mrb[43].mxu1  ;;  %4660 = vrot.lane.b32.xlu0 %v4659_v31, %s5226_s14  ;;  %3921 = vmatpush3.bf16.msra.mxu0 %v4806_v53 }
 0x32c   : > { %4665 = vrot.lane.b32.xlu1 %v4664_v40, %s5227_s16  ;;  %v5014_v48 = vpop.eup %5013  ;;  %5023 = vrcp.f32 %v2581_v56  ;;  %3922 = vmatprep.subr.bf16.mxu0 %v4807_v59  ;;  %v4811_v40 = vld [vmem:[%s7309_s5 + $0x70] sm:$0xff]  }
 0x32d   : > { %v2674_v47 = vmul.f32 %v5014_v48, %v6890_v55  ;;  %5025 = vpow2.f32 %v3826_v37  ;;  %v3827_v33 = vmul.f32 -1.442695, %v6950_v9 }
 0x32e   : > { %v5016_v46 = vpop.eup %5015 }
 0x32f   : > { %v5018_v2 = vpop.eup %5017  ;;  %2737 = vst.msk [vmem:[#allocation3 + $0x181] sm:$0xff] %vm1308_vm4, %v2674_v47  ;;  %v2675_v28 = vmul.f32 %v5016_v46, %v6894_v43  ;;  %5027 = vpow2.f32 %v3827_v33  ;;  %3923 = vmatpush3.bf16.msra.mxu0 %v4808_v19  ;;  %v4812_v33 = vld [vmem:[%s7309_s5 + $0x30] sm:$0xff]  }
 0x330   : > { %v2582_v36 = vadd.f32 1.0, %v5018_v2  ;;  %v2429_v7 = vpop.f32.mrb[44].mxu1  ;;  %3924 = vmatprep.subr.bf16.mxu0 %v4809_v30 }
 0x331   : > { %v5020_v3 = vpop.eup %5019  ;;  %2738 = vst.msk [vmem:[#allocation3 + $0x191] sm:$0xff] %vm1308_vm4, %v2675_v28  ;;  %v6960_v10 = vadd.f32 %v6831_v58, %v2429_v7  ;;  %v2431_v26 = vpop.f32.mrb[45].mxu1 }
 0x332   : > { %5029 = vrcp.f32 %v2582_v36  ;;  %v2583_v55 = vadd.f32 1.0, %v5020_v3  ;;  %v2432_v27 = vpop.f32.mrb[46].mxu1 }
 0x333   : > { %v3828_v57 = vmul.f32 -1.442695, %v6960_v10  ;;  %v6964_v39 = vadd.f32 %v6831_v58, %v2432_v27  ;;  %v2434_v5 = vpop.f32.mrb[47].mxu1  ;;  %3925 = vmatpush3.bf16.msra.mxu0 %v4810_v60 }
 0x334   : > { %v5022_v43 = vpop.eup %5021  ;;  %5031 = vrcp.f32 %v2583_v55  ;;  %3926 = vmatprep.subr.bf16.mxu0 %v4811_v40 }
 0x335   : > { %v2676_v18 = vmul.f32 %v5022_v43, %v6902_v51  ;;  %5033 = vpow2.f32 %v3828_v57  ;;  %v3829_v54 = vmul.f32 -1.442695, %v6964_v39 }
 0x336   : > { %v5024_v25 = vpop.eup %5023 }
 0x337   : > { %v5026_v8 = vpop.eup %5025  ;;  %2713 = vst.msk [vmem:[#allocation3 + $0xa0] sm:$0xff] %vm1308_vm4, %v2676_v18  ;;  %v2677_v17 = vmul.f32 %v5024_v25, %v6906_v42  ;;  %5035 = vpow2.f32 %v3829_v54  ;;  %3927 = vmatpush3.bf16.msra.mxu0 %v4812_v33 }
 0x338   : > { %v2584_v20 = vadd.f32 1.0, %v5026_v8  ;;  %v2437_v51 = vpop.f32.mrb[48].mxu1 }
 0x339   : > { %v5028_v12 = vpop.eup %5027  ;;  %2714 = vst.msk [vmem:[#allocation3 + $0xb0] sm:$0xff] %vm1308_vm4, %v2677_v17  ;;  %v6978_v0 = vadd.f32 %v6831_v58, %v2437_v51  ;;  %v2439_v23 = vpop.f32.mrb[49].mxu1 }
 0x33a   : > { %5037 = vrcp.f32 %v2584_v20  ;;  %v2585_v13 = vadd.f32 1.0, %v5028_v12  ;;  %v2440_v32 = vpop.f32.mrb[50].mxu1 }
 0x33b   : > { %v3830_v42 = vmul.f32 -1.442695, %v6978_v0  ;;  %v6982_v49 = vadd.f32 %v6831_v58, %v2440_v32  ;;  %v2442_v62 = vpop.f32.mrb[51].mxu1 }
 0x33c   : > { %v5030_v38 = vpop.eup %5029  ;;  %5039 = vrcp.f32 %v2585_v13 }
 0x33d   : > { %v2678_v50 = vmul.f32 %v5030_v38, %v6917_v41  ;;  %5041 = vpow2.f32 %v3830_v42  ;;  %v3831_v11 = vmul.f32 -1.442695, %v6982_v49 }
 0x33e   : > { %v5032_v45 = vpop.eup %5031  ;;  %v2777_v35 = vld [vmem:[#allocation3 + $0xa0] sm:$0xff] }
 0x33f   : > { %v5034_v15 = vpop.eup %5033  ;;  %2715 = vst.msk [vmem:[#allocation3 + $0xc0] sm:$0xff] %vm1308_vm4, %v2678_v50  ;;  %v2679_v22 = vmul.f32 %v5032_v45, %v6927_v4  ;;  %5043 = vpow2.f32 %v3831_v11  ;;  %v4669_v41 = vpack.i.bf16 %v2777_v35, %v2776_v63 }
 0x340   : > { %v2586_v61 = vadd.f32 1.0, %v5034_v15  ;;  %v2445_v52 = vpop.f32.mrb[52].mxu1  ;;  %v2827_v14 = vld [vmem:[#allocation3 + $0xb0] sm:$0xff] }
 0x341   : > { %v5036_v29 = vpop.eup %5035  ;;  %2716 = vst.msk [vmem:[#allocation3 + $0xd0] sm:$0xff] %vm1308_vm4, %v2679_v22  ;;  %v6999_v16 = vadd.f32 %v6831_v58, %v2445_v52  ;;  %v2447_v44 = vpop.f32.mrb[53].mxu1  ;;  %4670 = vrot.lane.b32.xlu1 %v4669_v41, %s5226_s14  ;;  %v4674_v4 = vpack.i.bf16 %v2827_v14, %v2777_v35  ;;  %v4814_v41 = vld [vmem:[%s7309_s5 + $0x38] sm:$0xff]  }
 0x342   : > { %5045 = vrcp.f32 %v2586_v61  ;;  %v2587_v34 = vadd.f32 1.0, %v5036_v29  ;;  %v2448_v31 = vpop.f32.mrb[54].mxu1  ;;  %v2784_v61 = vld [vmem:[#allocation3 + $0x1] sm:$0xff] }
 0x343   : > { %v3832_v56 = vmul.f32 -1.442695, %v6999_v16  ;;  %v7010_v24 = vadd.f32 %v6831_v58, %v2448_v31  ;;  %v2450_v37 = vpop.f32.mrb[55].mxu1  ;;  %4675 = vrot.lane.b32.xlu0 %v4674_v4, %s5227_s16 }
 0x344   : > { %v5038_v1 = vpop.eup %5037  ;;  %5047 = vrcp.f32 %v2587_v34 }
 0x345   : > { %v2680_v48 = vmul.f32 %v5038_v1, %v6946_v21  ;;  %5049 = vpow2.f32 %v3832_v56  ;;  %v3833_v47 = vmul.f32 -1.442695, %v7010_v24 }
 0x346   : > { %v5040_v46 = vpop.eup %5039  ;;  %v2779_v2 = vld [vmem:[#allocation3 + $0xc0] sm:$0xff] }
 0x347   : > { %v5042_v28 = vpop.eup %5041  ;;  %2717 = vst.msk [vmem:[#allocation3 + $0xe0] sm:$0xff] %vm1308_vm4, %v2680_v48  ;;  %v2681_v36 = vmul.f32 %v5040_v46, %v6950_v9  ;;  %5051 = vpow2.f32 %v3833_v47  ;;  %v4679_v7 = vpack.i.bf16 %v2779_v2, %v2827_v14  ;;  %v2813_v47 = vld [vmem:[#allocation3 + $0x171] sm:$0xff] }
 0x348   : > { %v2588_v3 = vadd.f32 1.0, %v5042_v28  ;;  %v2453_v21 = vpop.f32.mrb[56].mxu1  ;;  %v7020_v26 = vld [vmem:[#allocation3 + $0xd0] sm:$0xff] }
 0x349   : > { %v5044_v55 = vpop.eup %5043  ;;  %2718 = vst.msk [vmem:[#allocation3 + $0xf0] sm:$0xff] %vm1308_vm4, %v2681_v36  ;;  %v7024_v27 = vadd.f32 %v6831_v58, %v2453_v21  ;;  %v2455_v57 = vpop.f32.mrb[57].mxu1  ;;  %4680 = vrot.lane.b32.xlu1 %v4679_v7, %s5226_s14  ;;  %v4684_v5 = vpack.i.bf16 %v7020_v26, %v2779_v2  ;;  %v2812_v2 = vld [vmem:[#allocation3 + $0x161] sm:$0xff] }
 0x34a   : > { %5053 = vrcp.f32 %v2588_v3  ;;  %v2589_v9 = vadd.f32 1.0, %v5044_v55  ;;  %v2456_v43 = vpop.f32.mrb[58].mxu1  ;;  %v4699_v36 = vpack.i.bf16 %v2813_v47, %v2812_v2  ;;  %v2797_v55 = vld [vmem:[#allocation3 + $0x170] sm:$0xff]  ;;  %v2768_v47 = vld [vmem:[#allocation3] sm:$0xff] }
 0x34b   : > { %v3834_v18 = vmul.f32 -1.442695, %v7024_v27  ;;  %v7030_v54 = vadd.f32 %v6831_v58, %v2456_v43  ;;  %v2458_v25 = vpop.f32.mrb[59].mxu1  ;;  %4685 = vrot.lane.b32.xlu0 %v4684_v5, %s5227_s16  ;;  %v2801_v2 = vld [vmem:[#allocation3 + $0x1c0] sm:$0xff] }
 0x34c   : > { %v5046_v6 = vpop.eup %5045  ;;  %5055 = vrcp.f32 %v2589_v9 }
 0x34d   : > { %v2682_v8 = vmul.f32 %v5046_v6, %v6960_v10  ;;  %5057 = vpow2.f32 %v3834_v18  ;;  %v3835_v17 = vmul.f32 -1.442695, %v7030_v54  ;;  %v2796_v18 = vld [vmem:[#allocation3 + $0x160] sm:$0xff] }
 0x34e   : > { %v5048_v53 = vpop.eup %5047  ;;  %v2781_v34 = vld [vmem:[#allocation3 + $0xe0] sm:$0xff]  ;;  %v4724_v25 = vpack.i.bf16 %v2797_v55, %v2796_v18 }
 0x34f   : > { %v5050_v20 = vpop.eup %5049  ;;  %2719 = vst.msk [vmem:[#allocation3 + $0x100] sm:$0xff] %vm1308_vm4, %v2682_v8  ;;  %v2683_v51 = vmul.f32 %v5048_v53, %v6964_v39  ;;  %5059 = vpow2.f32 %v3835_v17  ;;  %v4704_v33 = vpack.i.bf16 %v2781_v34, %v7020_v26 }
 0x350   : > { %v2590_v12 = vadd.f32 1.0, %v5050_v20  ;;  %v2461_v23 = vpop.f32.mrb[60].mxu1 }
 0x351   : > { %v5052_v13 = vpop.eup %5051  ;;  %2720 = vst.msk [vmem:[#allocation3 + $0x110] sm:$0xff] %vm1308_vm4, %v2683_v51  ;;  %v7039_v32 = vadd.f32 %v6831_v58, %v2461_v23  ;;  %v2463_v42 = vpop.f32.mrb[61].mxu1 }
 0x352   : > { %5061 = vrcp.f32 %v2590_v12  ;;  %v2591_v10 = vadd.f32 1.0, %v5052_v13  ;;  %v2464_v62 = vpop.f32.mrb[62].mxu1 }
 0x353   : > { %v3836_v38 = vmul.f32 -1.442695, %v7039_v32  ;;  %v7043_v63 = vadd.f32 %v6831_v58, %v2464_v62  ;;  %v2466_v50 = vpop.f32.mrb[63].mxu1  ;;  %v4813_v58 = vld [vmem:[%s7309_s5 + $0x78] sm:$0xff]  }
 0x354   : > { %v5054_v39 = vpop.eup %5053  ;;  %5063 = vrcp.f32 %v2591_v10  ;;  %3928 = vmatprep.subr.bf16.mxu0 %v4813_v58  ;;  %v2814_v50 = vld [vmem:[#allocation3 + $0x181] sm:$0xff] }
 0x355   : > { %v2684_v11 = vmul.f32 %v5054_v39, %v6978_v0  ;;  %5065 = vpow2.f32 %v3836_v38  ;;  %v3837_v45 = vmul.f32 -1.442695, %v7043_v63  ;;  %3929 = vmatpush3.bf16.msra.mxu0 %v4814_v41  ;;  %v2815_v38 = vld [vmem:[#allocation3 + $0x191] sm:$0xff]  ;;  %v2798_v58 = vld [vmem:[#allocation3 + $0x180] sm:$0xff] }
 0x356   : > { %v5056_v35 = vpop.eup %5055  ;;  %v2783_v23 = vld [vmem:[#allocation3 + $0x100] sm:$0xff]  ;;  %v4739_v39 = vpack.i.bf16 %v2815_v38, %v2814_v50 }
 0x357   : > { %v5058_v59 = vpop.eup %5057  ;;  %2693 = vst.msk [vmem:[#allocation3 + $0x11] sm:$0xff] %vm1308_vm4, %v2684_v11  ;;  %v2685_v19 = vmul.f32 %v5056_v35, %v6982_v49  ;;  %5067 = vpow2.f32 %v3837_v45 }
 0x358   : > { %v2592_v15 = vadd.f32 1.0, %v5058_v59 }
 0x359   : > { %v5060_v22 = vpop.eup %5059  ;;  %2694 = vst.msk [vmem:[#allocation3 + $0x21] sm:$0xff] %vm1308_vm4, %v2685_v19  ;;  %v2799_v19 = vld [vmem:[#allocation3 + $0x190] sm:$0xff] }
 0x35a   : > { %5069 = vrcp.f32 %v2592_v15  ;;  %v2593_v0 = vadd.f32 1.0, %v5060_v22  ;;  %v2833_v22 = vld [vmem:[#allocation3 + $0x110] sm:$0xff] }
 0x35b   : > { %v4759_v41 = vpack.i.bf16 %v2833_v22, %v2783_v23 }
 0x35c   : > { %v5062_v30 = vpop.eup %5061  ;;  %5071 = vrcp.f32 %v2593_v0  ;;  %v4764_v0 = vpack.i.bf16 %v2799_v19, %v2798_v58 }
 0x35d   : > { %v2686_v49 = vmul.f32 %v5062_v30, %v6999_v16  ;;  %v7071_v16 = vld [vmem:[%s7309_s5 + $0x80] sm:$0xff]  }
 0x35e   : > { %v5064_v52 = vpop.eup %5063  ;;  %v7057_v14 = vld [vmem:[#allocation3 + $0x11] sm:$0xff]  ;;  %4010 = vmatprep.subr.bf16.mxu0 %v7071_v16 }
 0x35f   : > { %v5066_v29 = vpop.eup %5065  ;;  %2695 = vst.msk [vmem:[#allocation3 + $0x31] sm:$0xff] %vm1308_vm4, %v2686_v49  ;;  %v2687_v44 = vmul.f32 %v5064_v52, %v7010_v24  ;;  %v4689_v4 = vpack.i.bf16 %v7057_v14, %v2784_v61  ;;  %v7062_v60 = vld [vmem:[#allocation3 + $0x10] sm:$0xff] }
 0x360   : > { %v2594_v31 = vadd.f32 1.0, %v5066_v29  ;;  %v7064_v40 = vld [vmem:[#allocation3 + $0x20] sm:$0xff] }
 0x361   : > { %v7066_v56 = vld [vmem:[#allocation3 + $0x21] sm:$0xff]  ;;  %v5068_v37 = vpop.eup %5067  ;;  %2696 = vst.msk [vmem:[#allocation3 + $0x41] sm:$0xff] %vm1308_vm4, %v2687_v44  ;;  %4690 = vrot.lane.b32.xlu1 %v4689_v4, %s5223_s27  ;;  %v4694_v24 = vpack.i.bf16 %v7064_v40, %v7062_v60 }
 0x362   : > { %v3084_v1 = vpack.c.bf16 %v7066_v56, %v7057_v14  ;;  %5073 = vrcp.f32 %v2594_v31  ;;  %v2595_v48 = vadd.f32 1.0, %v5068_v37  ;;  %v4817_v14 = vld [vmem:[%s7311_s7] sm:$0xff]  }
 0x363   : > { %4695 = vrot.lane.b32.xlu0 %v4694_v24, %s5223_s27 }
 0x364   : > { %v5070_v46 = vpop.eup %5069  ;;  %5075 = vrcp.f32 %v2595_v48 }
 0x365   : > { %v2688_v28 = vmul.f32 %v5070_v46, %v7024_v27  ;;  %4705 = vrot.lane.b32.xlu1 %v4704_v33, %s5226_s14  ;;  %v2800_v46 = vld [vmem:[#allocation3 + $0x1b0] sm:$0xff] }
 0x366   : > { %v5072_v7 = vpop.eup %5071  ;;  %v7084_v3 = vld [vmem:[#allocation3 + $0x31] sm:$0xff] }
 0x367   : > { %2697 = vst.msk [vmem:[#allocation3 + $0x51] sm:$0xff] %vm1308_vm4, %v2688_v28  ;;  %v2689_v21 = vmul.f32 %v5072_v7, %v7030_v54  ;;  %4700 = vrot.lane.b32.xlu0 %v4699_v36, %s5226_s14  ;;  %v4709_v26 = vpack.i.bf16 %v7084_v3, %v7066_v56  ;;  %v7091_v57 = vld [vmem:[#allocation3 + $0x30] sm:$0xff]  ;;  %v4818_v56 = vld [vmem:[%s7311_s7 + $0x8] sm:$0xff]  }
 0x368   : > { %v7093_v5 = vld [vmem:[#allocation3 + $0x40] sm:$0xff]  ;;  %v2831_v54 = vld [vmem:[#allocation3 + $0xf0] sm:$0xff] }
 0x369   : > { %v7095_v27 = vld [vmem:[#allocation3 + $0x41] sm:$0xff]  ;;  %2698 = vst.msk [vmem:[#allocation3 + $0x61] sm:$0xff] %vm1308_vm4, %v2689_v21  ;;  %4710 = vrot.lane.b32.xlu1 %v4709_v26, %s5223_s27  ;;  %v4714_v9 = vpack.i.bf16 %v7093_v5, %v7091_v57  ;;  %v4719_v17 = vpack.i.bf16 %v2831_v54, %v2781_v34 }
 0x36a   : > { %v3087_v43 = vpack.c.bf16 %v7095_v27, %v7084_v3  ;;  %v4820_v3 = vld [vmem:[%s7311_s7 + $0x18] sm:$0xff]  }
 0x36b   : > { %4715 = vrot.lane.b32.xlu0 %v4714_v9, %s5223_s27 }
 0x36c   : > { %v5074_v6 = vpop.eup %5073 }
 0x36d   : > { %v2690_v8 = vmul.f32 %v5074_v6, %v7039_v32  ;;  %4725 = vrot.lane.b32.xlu1 %v4724_v25, %s5227_s16 }
 0x36e   : > { %v5076_v53 = vpop.eup %5075  ;;  %v7106_v20 = vld [vmem:[#allocation3 + $0x51] sm:$0xff] }
 0x36f   : > { %2699 = vst.msk [vmem:[#allocation3 + $0x71] sm:$0xff] %vm1308_vm4, %v2690_v8  ;;  %v2691_v51 = vmul.f32 %v5076_v53, %v7043_v63  ;;  %4720 = vrot.lane.b32.xlu0 %v4719_v17, %s5227_s16  ;;  %v4729_v12 = vpack.i.bf16 %v7106_v20, %v7095_v27  ;;  %v7113_v13 = vld [vmem:[#allocation3 + $0x50] sm:$0xff]  ;;  %v4744_v63 = vpack.i.bf16 %v2783_v23, %v2831_v54 }
 0x370   : > { %v7115_v42 = vld [vmem:[#allocation3 + $0x60] sm:$0xff] }
 0x371   : > { %v7117_v32 = vld [vmem:[#allocation3 + $0x61] sm:$0xff]  ;;  %2700 = vst.msk [vmem:[#allocation3 + $0x81] sm:$0xff] %vm1308_vm4, %v2691_v51  ;;  %4730 = vrot.lane.b32.xlu1 %v4729_v12, %s5223_s27  ;;  %v4734_v10 = vpack.i.bf16 %v7115_v42, %v7113_v13 }
 0x372   : > { %v3090_v62 = vpack.c.bf16 %v7117_v32, %v7106_v20 }
 0x373   : > { %4735 = vrot.lane.b32.xlu0 %v4734_v10, %s5223_s27 }
 0x375   : > { %4745 = vrot.lane.b32.xlu1 %v4744_v63, %s5226_s14 }
 0x376   : > { %v7127_v11 = vld [vmem:[#allocation3 + $0x71] sm:$0xff] }
 0x377   : > { %4740 = vrot.lane.b32.xlu0 %v4739_v39, %s5226_s14  ;;  %v4749_v45 = vpack.i.bf16 %v7127_v11, %v7117_v32  ;;  %v7132_v35 = vld [vmem:[#allocation3 + $0x70] sm:$0xff] }
 0x378   : > { %v2824_v59 = vld [vmem:[#allocation3 + $0x80] sm:$0xff] }
 0x379   : > { %4750 = vrot.lane.b32.xlu1 %v4749_v45, %s5223_s27  ;;  %v4754_v15 = vpack.i.bf16 %v2824_v59, %v7132_v35 }
 0x37b   : > { %4755 = vrot.lane.b32.xlu0 %v4754_v15, %s5223_s27  ;;  %s5161_s27 = sshll.u32 %s5230_s23, 4  ;;  %s5162_s27 = int_to_ptr.vmem [resolvable:$false] %s5161_s27 }
 0x37c   : > { %s5163_s14 = scalar_lea.vmem %s5162_s27, 2048 }
 0x37d   : > { %4765 = vrot.lane.b32.xlu1 %v4764_v0, %s5227_s16 }
 0x37f   : > { %4760 = vrot.lane.b32.xlu0 %v4759_v41, %s5227_s16  ;;  %v4816_v41 = vld [vmem:[%s7309_s5 + $0x88] sm:$0xff]   ;;  %s323_s16 = sand.u32 1, %s5211_s10  }
 0x380   : > { %s3707_s26 = sshll.u32 %s323_s16, 6  ;;  %s7263_s13 = scalar_lea.sflag [#allocation5], %s323_s16 }
 0x381   : > { %s325_s28 = scalar_lea.vmem [#allocation4], %s3707_s26 }
 0x382   : > { %s3641_s22 = sshll.u32 %s325_s28, 4  ;;  %s7259_s22 = int_to_ptr.vmem [resolvable:$true] %s3641_s22 }
 0x383   : > { %s5157_s21 = scalar_lea.vmem %s7259_s22, 1024  ;;  %p5164_p0 = scmp.lt.s32.totalorder %s7259_s22, %s5162_s27 }
 0x384   : > { %p5158_p11 = scmp.ne.s32.totalorder %s7259_s22, %s5157_s21  ;;  %p5165_p1 = scmp.lt.s32.totalorder %s5163_s14, %s5157_s21 }
 0x386   : > { %p5159_p12 = pnand %p5158_p11, %p5321_p5  ;;  %p5166_p2 = por %p5165_p1, %p5164_p0 }
 0x388   : > { %p5160_p13 = pneg %p5159_p12 }
 0x38a   : > { %p5167_p3 = pnand %p5166_p2, %p5160_p13 }
 0x395   : > { %v4651_v61 = vpop.permute.xlu0 %4650 }
 0x396   : > { %v4656_v30 = vpop.permute.xlu1 %4655  ;;  %v4653_v34 = vunpack.i.h.bf16 %v4651_v61  ;;  %v4652_v31 = vunpack.i.l.bf16 %v4651_v61  ;;  %v2803_v61 = vld [vmem:[#allocation3 + $0x1e0] sm:$0xff] }
 0x397   : > { %v4658_v28 = vunpack.i.h.bf16 %v4656_v30  ;;  %v4657_v36 = vunpack.i.l.bf16 %v4656_v30  ;;  %v2802_v30 = vld [vmem:[#allocation3 + $0x1d0] sm:$0xff] }
 0x398   : > { %v3058_v26 = vsel %vm1308_vm4, %v2800_v46, %v4652_v31  ;;  %v3059_v55 = vsel %vm1308_vm4, %v2801_v2, %v4653_v34 }
 0x39d   : > { %v4661_v52 = vpop.permute.xlu0 %4660 }
 0x39e   : > { %v7139_v49 = vpop.permute.xlu1 %4665  ;;  %v4663_v53 = vunpack.i.h.bf16 %v4661_v52  ;;  %v4662_v51 = vunpack.i.l.bf16 %v4661_v52 }
 0x39f   : > { %v4668_v52 = vunpack.i.h.bf16 %v7139_v49 }
 0x3a0   : > { %v3060_v34 = vsel %vm1308_vm4, %v2802_v30, %v4662_v51  ;;  %v3061_v31 = vsel %vm1308_vm4, %v2803_v61, %v4663_v53  ;;  %v2804_v53 = vld [vmem:[#allocation3 + $0x1f0] sm:$0xff]  ;;  %v2805_v51 = vld [vmem:[#allocation3 + $0x200] sm:$0xff] }
 0x3b3   : > { %v4671_v29 = vpop.permute.xlu1 %4670 }
 0x3b4   : > { %v4673_v37 = vunpack.i.h.bf16 %v4671_v29  ;;  %v4672_v24 = vunpack.i.l.bf16 %v4671_v29  ;;  %v4667_v29 = vunpack.i.l.bf16 %v7139_v49 }
 0x3b5   : > { %v4676_v44 = vpop.permute.xlu0 %4675 }
 0x3b6   : > { %v3035_v9 = vsel %vm1308_vm4, %v7062_v60, %v4673_v37  ;;  %v3034_v18 = vsel %vm1308_vm4, %v2768_v47, %v4672_v24  ;;  %v4678_v12 = vunpack.i.h.bf16 %v4676_v44  ;;  %v4677_v23 = vunpack.i.l.bf16 %v4676_v44 }
 0x3bb   : > { %v4681_v4 = vpop.permute.xlu1 %4680 }
 0x3bc   : > { %v4683_v39 = vunpack.i.h.bf16 %v4681_v4  ;;  %v4682_v45 = vunpack.i.l.bf16 %v4681_v4 }
 0x3bd   : > { %v7141_v48 = vpop.permute.xlu0 %4685 }
 0x3be   : > { %v3037_v37 = vsel %vm1308_vm4, %v7091_v57, %v4683_v39  ;;  %v3036_v24 = vsel %vm1308_vm4, %v7064_v40, %v4682_v45 }
 0x3d3   : > { %v4691_v33 = vpop.permute.xlu1 %4690 }
 0x3d4   : > { %v4693_v7 = vunpack.i.h.bf16 %v4691_v33  ;;  %v4692_v21 = vunpack.i.l.bf16 %v4691_v33 }
 0x3d5   : > { %v4696_v54 = vpop.permute.xlu0 %4695 }
 0x3d6   : > { %v3042_v25 = vsel %vm1326_vm6, %v3034_v18, %v4692_v21  ;;  %v3043_v6 = vsel %vm1326_vm6, %v3035_v9, %v4693_v7  ;;  %v4698_v8 = vunpack.i.h.bf16 %v4696_v54  ;;  %v4697_v17 = vunpack.i.l.bf16 %v4696_v54 }
 0x3d7   : > { %v4706_v10 = vpop.permute.xlu1 %4705  ;;  %v3050_v38 = vsel %vm1344_vm8, %v3042_v25, %v4657_v36  ;;  %v3051_v63 = vsel %vm1344_vm8, %v3043_v6, %v4658_v28  ;;  %v4688_v28 = vunpack.i.h.bf16 %v7141_v48  ;;  %v4687_v36 = vunpack.i.l.bf16 %v7141_v48 }
 0x3d8   : > { %v3066_v60 = vsel %vm1326_vm6, %v3058_v26, %v4697_v17  ;;  %v3067_v50 = vsel %vm1326_vm6, %v3059_v55, %v4698_v8  ;;  %v3082_v22 = vpack.c.bf16 %v3051_v63, %v3050_v38  ;;  %v4708_v7 = vunpack.i.h.bf16 %v4706_v10 }
 0x3d9   : > { %v4701_v59 = vpop.permute.xlu0 %4700  ;;  %v3074_v19 = vsel %vm1344_vm8, %v3066_v60, %v4677_v23  ;;  %v3075_v15 = vsel %vm1344_vm8, %v3067_v50, %v4678_v12  ;;  %v4707_v21 = vunpack.i.l.bf16 %v4706_v10 }
 0x3da   : > { %v3083_v58 = vpack.c.bf16 %v3075_v15, %v3074_v19  ;;  %v4703_v18 = vunpack.i.h.bf16 %v4701_v59  ;;  %v4702_v54 = vunpack.i.l.bf16 %v4701_v59  ;;  %v3039_v10 = vsel %vm1308_vm4, %v7113_v13, %v4708_v7 }
 0x3db   : > { %v4711_v0 = vpop.permute.xlu1 %4710  ;;  %v3038_v38 = vsel %vm1308_vm4, %v7093_v5, %v4707_v21  ;;  %v2806_v21 = vld [vmem:[#allocation3 + $0x210] sm:$0xff] }
 0x3dc   : > { %v4713_v44 = vunpack.i.h.bf16 %v4711_v0  ;;  %v4712_v4 = vunpack.i.l.bf16 %v4711_v0  ;;  %3289 = vmatprep.mubr.bf16.mxu0 %v3083_v58  ;;  %v3062_v63 = vsel %vm1308_vm4, %v2804_v53, %v4702_v54  ;;  %v3063_v60 = vsel %vm1308_vm4, %v2805_v51, %v4703_v18 }
 0x3dd   : > { %v4716_v47 = vpop.permute.xlu0 %4715  ;;  %3290 = vmatmul.mubr.bf16.vlgmr.msra.gmra.mrb[32].mxu0 %v3082_v22 }
 0x3de   : > { %v3044_v33 = vsel %vm1326_vm6, %v3036_v24, %v4712_v4  ;;  %v3045_v46 = vsel %vm1326_vm6, %v3037_v37, %v4713_v44  ;;  %v4718_v49 = vunpack.i.h.bf16 %v4716_v47  ;;  %v4717_v2 = vunpack.i.l.bf16 %v4716_v47  ;;  %4011 = vmatpush3.bf16.msra.mxu0 %v7071_v16 }
 0x3df   : > { %v4726_v57 = vpop.permute.xlu1 %4725  ;;  %4012 = vmatprep.subr.bf16.mxu0 %v4816_v41  ;;  %v3052_v55 = vsel %vm1344_vm8, %v3044_v33, %v4667_v29  ;;  %v3053_v9 = vsel %vm1344_vm8, %v3045_v46, %v4668_v52 }
 0x3e0   : > { %v3068_v40 = vsel %vm1326_vm6, %v3060_v34, %v4717_v2  ;;  %v3069_v26 = vsel %vm1326_vm6, %v3061_v31, %v4718_v49  ;;  %v3085_v17 = vpack.c.bf16 %v3053_v9, %v3052_v55  ;;  %v4728_v15 = vunpack.i.h.bf16 %v4726_v57 }
 0x3e1   : > { %v4721_v25 = vpop.permute.xlu0 %4720  ;;  %v3076_v16 = vsel %vm1344_vm8, %v3068_v40, %v4687_v36  ;;  %v3077_v6 = vsel %vm1344_vm8, %v3069_v26, %v4688_v28  ;;  %v4727_v58 = vunpack.i.l.bf16 %v4726_v57  ;;  %v2807_v57 = vld [vmem:[#allocation3 + $0x220] sm:$0xff] }
 0x3e2   : > { %v3086_v48 = vpack.c.bf16 %v3077_v6, %v3076_v16  ;;  %4013 = vmatpush3.bf16.msra.mxu0 %v4816_v41  ;;  %v4723_v22 = vunpack.i.h.bf16 %v4721_v25  ;;  %v4722_v0 = vunpack.i.l.bf16 %v4721_v25 }
 0x3e3   : > { %v4731_v8 = vpop.permute.xlu1 %4730  ;;  %4022 = vmatprep.subr.bf16.mxu0 %v4817_v14 }
 0x3e4   : > { %v4733_v12 = vunpack.i.h.bf16 %v4731_v8  ;;  %v4732_v23 = vunpack.i.l.bf16 %v4731_v8  ;;  %3297 = vmatprep.mubr.bf16.mxu0 %v3086_v48 }
 0x3e5   : > { %v4736_v50 = vpop.permute.xlu0 %4735  ;;  %3298 = vmatmul.mubr.bf16.gmra.mrb[36].mxu0 %v3085_v17 }
 0x3e6   : > { %v3046_v39 = vsel %vm1326_vm6, %v3038_v38, %v4732_v23  ;;  %v3047_v45 = vsel %vm1326_vm6, %v3039_v10, %v4733_v12  ;;  %v4738_v59 = vunpack.i.h.bf16 %v4736_v50  ;;  %v4737_v19 = vunpack.i.l.bf16 %v4736_v50  ;;  %v2841_v38 = vld [vmem:[#allocation3 + $0x81] sm:$0xff] }
 0x3e7   : > { %v4746_v13 = vpop.permute.xlu1 %4745  ;;  %v3054_v29 = vsel %vm1344_vm8, %v3046_v39, %v4727_v58  ;;  %v3055_v44 = vsel %vm1344_vm8, %v3047_v45, %v4728_v15 }
 0x3e8   : > { %v3070_v41 = vsel %vm1326_vm6, %v3062_v63, %v4737_v19  ;;  %v3071_v5 = vsel %vm1326_vm6, %v3063_v60, %v4738_v59  ;;  %v3088_v31 = vpack.c.bf16 %v3055_v44, %v3054_v29  ;;  %v4748_v37 = vunpack.i.h.bf16 %v4746_v13 }
 0x3e9   : > { %v4741_v30 = vpop.permute.xlu0 %4740  ;;  %v3078_v61 = vsel %vm1344_vm8, %v3070_v41, %v4722_v0  ;;  %v3079_v52 = vsel %vm1344_vm8, %v3071_v5, %v4723_v22  ;;  %v4747_v24 = vunpack.i.l.bf16 %v4746_v13  ;;  %v3093_v63 = vpack.c.bf16 %v2841_v38, %v7127_v11 }
 0x3ea   : > { %v3089_v34 = vpack.c.bf16 %v3079_v52, %v3078_v61  ;;  %v4743_v47 = vunpack.i.h.bf16 %v4741_v30  ;;  %v4742_v33 = vunpack.i.l.bf16 %v4741_v30  ;;  %v3041_v55 = vsel %vm1308_vm4, %v7132_v35, %v4748_v37 }
 0x3eb   : > { %v4751_v4 = vpop.permute.xlu1 %4750  ;;  %v3040_v9 = vsel %vm1308_vm4, %v7115_v42, %v4747_v24 }
 0x3ec   : > { %3305 = vmatprep.mubr.bf16.mxu0 %v3089_v34  ;;  %v4753_v49 = vunpack.i.h.bf16 %v4751_v4  ;;  %v4752_v2 = vunpack.i.l.bf16 %v4751_v4  ;;  %v3064_v18 = vsel %vm1308_vm4, %v2806_v21, %v4742_v33  ;;  %v3065_v54 = vsel %vm1308_vm4, %v2807_v57, %v4743_v47  ;;  %v3838_v4 = vld [vmem:[%s7310_s6] ss:$0 sm:$0xff] }
 0x3ed   : > { %v4756_v46 = vpop.permute.xlu0 %4755  ;;  %3306 = vmatmul.mubr.bf16.gmra.mrb[40].mxu0 %v3088_v31 }
 0x3ee   : > { %v4758_v28 = vunpack.i.h.bf16 %v4756_v46  ;;  %v4757_v36 = vunpack.i.l.bf16 %v4756_v46  ;;  %v3048_v16 = vsel %vm1326_vm6, %v3040_v9, %v4752_v2  ;;  %v3049_v6 = vsel %vm1326_vm6, %v3041_v55, %v4753_v49 }
 0x3ef   : > { %v4766_v7 = vpop.permute.xlu1 %4765 }
 0x3f0   : > { %v4768_v40 = vunpack.i.h.bf16 %v4766_v7  ;;  %v4767_v26 = vunpack.i.l.bf16 %v4766_v7  ;;  %v3072_v17 = vsel %vm1326_vm6, %v3064_v18, %v4757_v36  ;;  %v3073_v53 = vsel %vm1326_vm6, %v3065_v54, %v4758_v28 }
 0x3f1   : > { %v4761_v25 = vpop.permute.xlu0 %4760 }
 0x3f2   : > { %v4763_v48 = vunpack.i.h.bf16 %v4761_v25  ;;  %v4762_v8 = vunpack.i.l.bf16 %v4761_v25  ;;  %v3056_v35 = vsel %vm1344_vm8, %v3048_v16, %v4767_v26  ;;  %v3057_v51 = vsel %vm1344_vm8, %v3049_v6, %v4768_v40 }
 0x3f3   : > { %v3091_v10 = vpack.c.bf16 %v3057_v51, %v3056_v35 }
 0x3f4   : > { %v3080_v42 = vsel %vm1344_vm8, %v3072_v17, %v4762_v8  ;;  %v3081_v12 = vsel %vm1344_vm8, %v3073_v53, %v4763_v48 }
 0x3f5   : > { %v3092_v23 = vpack.c.bf16 %v3081_v12, %v3080_v42 }
 0x3f7   : > { %3313 = vmatprep.mubr.bf16.mxu0 %v3092_v23 }
 0x3f8   : > { %3314 = vmatmul.mubr.bf16.gmra.mrb[44].mxu0 %v3091_v10 }
 0x3f9   : > { %4014 = vmatprep.mubr.msk.bf16.mxu0 %vm1308_vm4, %v3084_v1  ;;  %v4819_v1 = vld [vmem:[%s7311_s7 + $0x10] sm:$0xff]  }
 0x400   : > { %4015 = vmatmul.mubr.msk.bf16.vlgmr.msra.gmra.mrb[48].mxu0 %vm1308_vm4, %v3087_v43 }
 0x401   : > { %4018 = vmatprep.mubr.msk.bf16.mxu0 %vm1308_vm4, %v3090_v62  ;;  %4023 = vmatpush3.bf16.msra.mxu0 %v4817_v14 }
 0x402   : > { %4024 = vmatprep.subr.bf16.mxu0 %v4818_v56 }
 0x405   : > { %4025 = vmatpush3.bf16.msra.mxu0 %v4818_v56 }
 0x406   : > { %4026 = vmatprep.subr.bf16.mxu0 %v4819_v1 }
 0x408   : > { %4019 = vmatmul.mubr.msk.bf16.gmra.mrb[52].mxu0 %vm1308_vm4, %v3093_v63 }
 0x409   : > { %4027 = vmatpush3.bf16.msra.mxu0 %v4819_v1 }
 0x40a   : > { %4028 = vmatprep.subr.bf16.mxu0 %v4820_v3 }
 0x40d   : > { %4029 = vmatpush3.bf16.msra.mxu0 %v4820_v3 }
 0x4b0   : > { %v3930_v27 = vpop.f32.mrb[32].mxu0 }
 0x4b1   : > { %v3931_v43 = vpop.f32.mrb[33].mxu0 }
 0x4b2   : > { %v3932_v20 = vadd.f32 %v3931_v43, %v3930_v27  ;;  %v3933_v32 = vpop.f32.mrb[34].mxu0 }
 0x4b3   : > { %v3934_v62 = vpop.f32.mrb[35].mxu0 }
 0x4b4   : > { %v3935_v11 = vadd.f32 %v3934_v62, %v3933_v32  ;;  %v3292_v37 = vadd.f32 %v3932_v20, %v3838_v4 }
 0x4b6   : > { %v3295_v2 = vadd.f32 %v3935_v11, %v3838_v4 }
 0x4b8   : > { %v3936_v60 = vpop.f32.mrb[36].mxu0 }
 0x4b9   : > { %v3937_v50 = vpop.f32.mrb[37].mxu0 }
 0x4ba   : > { %v3938_v39 = vadd.f32 %v3937_v50, %v3936_v60  ;;  %v3939_v45 = vpop.f32.mrb[38].mxu0 }
 0x4bb   : > { %v3940_v59 = vpop.f32.mrb[39].mxu0 }
 0x4bc   : > { %v3941_v19 = vadd.f32 %v3940_v59, %v3939_v45  ;;  %v3300_v34 = vadd.f32 %v3938_v39, %v3838_v4 }
 0x4be   : > { %v3303_v33 = vadd.f32 %v3941_v19, %v3838_v4 }
 0x4c0   : > { %v3942_v15 = vpop.f32.mrb[40].mxu0 }
 0x4c1   : > { %v3943_v58 = vpop.f32.mrb[41].mxu0 }
 0x4c2   : > { %v3944_v22 = vadd.f32 %v3943_v58, %v3942_v15  ;;  %v3945_v0 = vpop.f32.mrb[42].mxu0 }
 0x4c3   : > { %v3946_v13 = vpop.f32.mrb[43].mxu0 }
 0x4c4   : > { %v3947_v41 = vadd.f32 %v3946_v13, %v3945_v0  ;;  %v3308_v18 = vadd.f32 %v3944_v22, %v3838_v4 }
 0x4c6   : > { %v3311_v8 = vadd.f32 %v3947_v41, %v3838_v4 }
 0x4cb   : > { %v3948_v5 = vpop.f32.mrb[44].mxu0 }
 0x4cc   : > { %v3949_v30 = vpop.f32.mrb[45].mxu0 }
 0x4cd   : > { %v3950_v61 = vadd.f32 %v3949_v30, %v3948_v5  ;;  %v3951_v52 = vpop.f32.mrb[46].mxu0 }
 0x4ce   : > { %v3952_v29 = vpop.f32.mrb[47].mxu0 }
 0x4cf   : > { %v3953_v44 = vadd.f32 %v3952_v29, %v3951_v52  ;;  %v3316_v55 = vadd.f32 %v3950_v61, %v3838_v4 }
 0x4d1   : > { %v3319_v16 = vadd.f32 %v3953_v44, %v3838_v4 }
 0x4d3   : > { %v4016_v31 = vpop.f32.mrb[48].mxu0 }
 0x4d4   : > { %v7235_v24 = vadd.f32 %v4016_v31, %v3300_v34  ;;  %v3356_v47 = vpop.f32.mrb[49].mxu0 }
 0x4d5   : > { %v7237_v46 = vadd.f32 %v3356_v47, %v3292_v37  ;;  %v4017_v49 = vpop.f32.mrb[50].mxu0  ;;  %v3869_v47 = vld [vmem:[%s7312_s8] ss:$0 sm:$0xff] }
 0x4d6   : > { %v3863_v28 = vmul.f32 -1.442695, %v7235_v24  ;;  %v3368_v36 = vadd.f32 %v4017_v49, %v3303_v33  ;;  %v3359_v7 = vpop.f32.mrb[51].mxu0 }
 0x4d7   : > { %v3861_v21 = vmul.f32 -1.442695, %v7237_v46  ;;  %v3360_v57 = vadd.f32 %v3359_v7, %v3295_v2 }
 0x4d8   : > { %5077 = vpow2.f32 %v3863_v28  ;;  %v3864_v40 = vmul.f32 -1.442695, %v3368_v36 }
 0x4d9   : > { %5079 = vpow2.f32 %v3861_v21  ;;  %v3862_v26 = vmul.f32 -1.442695, %v3360_v57 }
 0x4da   : > { %5081 = vpow2.f32 %v3864_v40 }
 0x4db   : > { %5083 = vpow2.f32 %v3862_v26  ;;  %v4020_v9 = vpop.f32.mrb[52].mxu0 }
 0x4dc   : > { %v3381_v54 = vadd.f32 %v4020_v9, %v3316_v55  ;;  %v3372_v25 = vpop.f32.mrb[53].mxu0 }
 0x4dd   : > { %v3373_v6 = vadd.f32 %v3372_v25, %v3308_v18  ;;  %v4021_v48 = vpop.f32.mrb[54].mxu0 }
 0x4de   : > { %v3867_v17 = vmul.f32 -1.442695, %v3381_v54  ;;  %v3384_v53 = vadd.f32 %v4021_v48, %v3319_v16  ;;  %v3375_v35 = vpop.f32.mrb[55].mxu0 }
 0x4df   : > { %v3865_v51 = vmul.f32 -1.442695, %v3373_v6  ;;  %v3376_v42 = vadd.f32 %v3375_v35, %v3311_v8 }
 0x4e0   : > { %5085 = vpow2.f32 %v3867_v17  ;;  %v3868_v12 = vmul.f32 -1.442695, %v3384_v53 }
 0x4e1   : > { %5087 = vpow2.f32 %v3865_v51  ;;  %v3866_v23 = vmul.f32 -1.442695, %v3376_v42 }
 0x4e2   : > { %v5078_v10 = vpop.eup %5077  ;;  %5089 = vpow2.f32 %v3868_v12 }
 0x4e3   : > { %v5080_v38 = vpop.eup %5079  ;;  %v3413_v63 = vadd.f32 1.0, %v5078_v10  ;;  %5091 = vpow2.f32 %v3866_v23 }
 0x4e4   : > { %v5082_v14 = vpop.eup %5081  ;;  %v3411_v56 = vadd.f32 1.0, %v5080_v38 }
 0x4e5   : > { %v5084_v1 = vpop.eup %5083  ;;  %5093 = vrcp.f32 %v3413_v63  ;;  %v3414_v3 = vadd.f32 1.0, %v5082_v14 }
 0x4e6   : > { %5095 = vrcp.f32 %v3411_v56  ;;  %v3412_v27 = vadd.f32 1.0, %v5084_v1 }
 0x4e7   : > { %5097 = vrcp.f32 %v3414_v3 }
 0x4e8   : > { %5099 = vrcp.f32 %v3412_v27 }
 0x4ea   : > { %v5086_v43 = vpop.eup %5085 }
 0x4eb   : > { %v5088_v20 = vpop.eup %5087  ;;  %v3417_v32 = vadd.f32 1.0, %v5086_v43 }
 0x4ec   : > { %v5090_v62 = vpop.eup %5089  ;;  %v3415_v11 = vadd.f32 1.0, %v5088_v20 }
 0x4ed   : > { %v5092_v60 = vpop.eup %5091  ;;  %5101 = vrcp.f32 %v3417_v32  ;;  %v3418_v50 = vadd.f32 1.0, %v5090_v62 }
 0x4ee   : > { %5103 = vrcp.f32 %v3415_v11  ;;  %v3416_v39 = vadd.f32 1.0, %v5092_v60 }
 0x4ef   : > { %v5094_v45 = vpop.eup %5093  ;;  %5105 = vrcp.f32 %v3418_v50 }
 0x4f0   : > { %v5096_v59 = vpop.eup %5095  ;;  %5107 = vrcp.f32 %v3416_v39  ;;  %v3437_v58 = vmul.f32 %v5094_v45, %v7235_v24 }
 0x4f1   : > { %v5098_v19 = vpop.eup %5097  ;;  %v3435_v0 = vmul.f32 %v5096_v59, %v7237_v46 }
 0x4f2   : > { %v5100_v15 = vpop.eup %5099  ;;  %v3438_v22 = vmul.f32 %v5098_v19, %v3368_v36 }
 0x4f3   : > { %v3436_v13 = vmul.f32 %v5100_v15, %v3360_v57 }
 0x4f4   : > { %v3444_v41 = vpack.c.bf16 %v3438_v22, %v3437_v58 }
 0x4f5   : > { %v3443_v5 = vpack.c.bf16 %v3436_v13, %v3435_v0 }
 0x4f7   : > { %v5102_v30 = vpop.eup %5101  ;;  %4030 = vmatprep.mubr.msk.bf16.mxu0 %vm1326_vm6, %v3443_v5 }
 0x4f8   : > { %v5104_v61 = vpop.eup %5103  ;;  %4031 = vmatmul.mubr.msk.bf16.vlgmr.msra.gmra.mrb[56].mxu0 %vm1326_vm6, %v3444_v41  ;;  %v3441_v44 = vmul.f32 %v5102_v30, %v3381_v54 }
 0x4f9   : > { %v5106_v52 = vpop.eup %5105  ;;  %v3439_v34 = vmul.f32 %v5104_v61, %v3373_v6 }
 0x4fa   : > { %v5108_v29 = vpop.eup %5107  ;;  %v3442_v4 = vmul.f32 %v5106_v52, %v3384_v53 }
 0x4fb   : > { %v3440_v31 = vmul.f32 %v5108_v29, %v3376_v42 }
 0x4fc   : > { %v3446_v37 = vpack.c.bf16 %v3442_v4, %v3441_v44 }
 0x4fd   : > { %v3445_v24 = vpack.c.bf16 %v3440_v31, %v3439_v34 }
 0x4ff   : > { %4034 = vmatprep.mubr.msk.bf16.mxu0 %vm1326_vm6, %v3445_v24 }
 0x500   : > { %4035 = vmatmul.mubr.msk.bf16.gmra.mrb[60].mxu0 %vm1326_vm6, %v3446_v37 }
 0x5cb   : > { %v4032_v33 = vpop.f32.mrb[56].mxu0 }
 0x5cc   : > { %v3541_v46 = vadd.f32 %v4032_v33, %v3869_v47  ;;  %v3532_v49 = vpop.f32.mrb[57].mxu0 }
 0x5cd   : > { %v3533_v2 = vadd.f32 %v3869_v47, %v3532_v49  ;;  %v4033_v28 = vpop.f32.mrb[58].mxu0 }
 0x5ce   : > { %v3880_v36 = vmul.f32 -1.442695, %v3541_v46  ;;  %v3544_v7 = vadd.f32 %v4033_v28, %v3869_v47  ;;  %v3535_v21 = vpop.f32.mrb[59].mxu0 }
 0x5cf   : > { %v3878_v57 = vmul.f32 -1.442695, %v3533_v2  ;;  %v3536_v40 = vadd.f32 %v3869_v47, %v3535_v21 }
 0x5d0   : > { %5109 = vpow2.f32 %v3880_v36  ;;  %v3881_v26 = vmul.f32 -1.442695, %v3544_v7 }
 0x5d1   : > { %5111 = vpow2.f32 %v3878_v57  ;;  %v3879_v55 = vmul.f32 -1.442695, %v3536_v40 }
 0x5d2   : > { %5113 = vpow2.f32 %v3881_v26 }
 0x5d3   : > { %5115 = vpow2.f32 %v3879_v55  ;;  %v4036_v9 = vpop.f32.mrb[60].mxu0 }
 0x5d4   : > { %v3557_v18 = vadd.f32 %v4036_v9, %v3869_v47  ;;  %v3548_v54 = vpop.f32.mrb[61].mxu0 }
 0x5d5   : > { %v3549_v25 = vadd.f32 %v3869_v47, %v3548_v54  ;;  %v4037_v16 = vpop.f32.mrb[62].mxu0 }
 0x5d6   : > { %v3884_v6 = vmul.f32 -1.442695, %v3557_v18  ;;  %v3560_v48 = vadd.f32 %v4037_v16, %v3869_v47  ;;  %v3551_v8 = vpop.f32.mrb[63].mxu0 }
 0x5d7   : > { %v3882_v17 = vmul.f32 -1.442695, %v3549_v25  ;;  %v3552_v53 = vadd.f32 %v3869_v47, %v3551_v8 }
 0x5d8   : > { %5117 = vpow2.f32 %v3884_v6  ;;  %v3885_v35 = vmul.f32 -1.442695, %v3560_v48 }
 0x5d9   : > { %5119 = vpow2.f32 %v3882_v17  ;;  %v3883_v51 = vmul.f32 -1.442695, %v3552_v53 }
 0x5da   : > { %v5110_v42 = vpop.eup %5109  ;;  %5121 = vpow2.f32 %v3885_v35 }
 0x5db   : > { %v5112_v12 = vpop.eup %5111  ;;  %v3589_v23 = vadd.f32 1.0, %v5110_v42  ;;  %5123 = vpow2.f32 %v3883_v51 }
 0x5dc   : > { %v5114_v10 = vpop.eup %5113  ;;  %v3587_v38 = vadd.f32 1.0, %v5112_v12 }
 0x5dd   : > { %v5116_v63 = vpop.eup %5115  ;;  %5125 = vrcp.f32 %v3589_v23  ;;  %v3590_v14 = vadd.f32 1.0, %v5114_v10 }
 0x5de   : > { %5127 = vrcp.f32 %v3587_v38  ;;  %v3588_v56 = vadd.f32 1.0, %v5116_v63 }
 0x5df   : > { %5129 = vrcp.f32 %v3590_v14 }
 0x5e0   : > { %5131 = vrcp.f32 %v3588_v56 }
 0x5e2   : > { %v5118_v1 = vpop.eup %5117 }
 0x5e3   : > { %v5120_v3 = vpop.eup %5119  ;;  %v3593_v27 = vadd.f32 1.0, %v5118_v1 }
 0x5e4   : > { %v5122_v43 = vpop.eup %5121  ;;  %v3591_v20 = vadd.f32 1.0, %v5120_v3 }
 0x5e5   : > { %v5124_v32 = vpop.eup %5123  ;;  %5133 = vrcp.f32 %v3593_v27  ;;  %v3594_v62 = vadd.f32 1.0, %v5122_v43 }
 0x5e6   : > { %5135 = vrcp.f32 %v3591_v20  ;;  %v3592_v11 = vadd.f32 1.0, %v5124_v32 }
 0x5e7   : > { %v5126_v60 = vpop.eup %5125  ;;  %5137 = vrcp.f32 %v3594_v62 }
 0x5e8   : > { %v5128_v50 = vpop.eup %5127  ;;  %v3613_v39 = vmul.f32 %v5126_v60, %v3541_v46  ;;  %5139 = vrcp.f32 %v3592_v11 }
 0x5e9   : > { %v5130_v45 = vpop.eup %5129  ;;  %v3611_v59 = vmul.f32 %v5128_v50, %v3533_v2 }
 0x5ea   : > { %v5132_v19 = vpop.eup %5131  ;;  %3621 = vst [vmem:[%s325_s28 + $0x10] sm:$0xff] %v3613_v39  ;;  %v3614_v15 = vmul.f32 %v5130_v45, %v3544_v7 }
 0x5eb   : > { %3619 = vst [vmem:[%s325_s28] sm:$0xff] %v3611_v59  ;;  %v3612_v58 = vmul.f32 %v5132_v19, %v3536_v40 }
 0x5ec   : > { %3622 = vst [vmem:[%s325_s28 + $0x18] sm:$0xff] %v3614_v15 }
 0x5ed   : > { %3620 = vst [vmem:[%s325_s28 + $0x8] sm:$0xff] %v3612_v58 }
 0x5ef   : > { %v5134_v22 = vpop.eup %5133 }
 0x5f0   : > { %v5136_v0 = vpop.eup %5135  ;;  %v3617_v13 = vmul.f32 %v5134_v22, %v3557_v18 }
 0x5f1   : > { %v5138_v41 = vpop.eup %5137  ;;  %v3615_v5 = vmul.f32 %v5136_v0, %v3549_v25 }
 0x5f2   : > { %v5140_v30 = vpop.eup %5139  ;;  %3625 = vst [vmem:[%s325_s28 + $0x30] sm:$0xff] %v3617_v13  ;;  %v3618_v61 = vmul.f32 %v5138_v41, %v3560_v48 }
 0x5f3   : > { %3623 = vst [vmem:[%s325_s28 + $0x20] sm:$0xff] %v3615_v5  ;;  %v3616_v52 = vmul.f32 %v5140_v30, %v3552_v53 }
 0x5f4   : > { %3626 = vst [vmem:[%s325_s28 + $0x38] sm:$0xff] %v3618_v61 }
 0x5f5   : > { %3624 = vst [vmem:[%s325_s28 + $0x28] sm:$0xff] %v3616_v52 }
 0x5f6   : > { %5170 = shalt.err (!%p5167_p3)
}
 0x5f7   : > { %s5171_s16 = scalar_lea.hbm %s7257_s17, 1024  ;;  %s5175_s29 = scalar_lea.hbm %s7313_s9, 2048 }
 0x5f8   : > { %p5172_p4 = scmp.ne.s32.totalorder %s7257_s17, %s5171_s16  ;;  %p5176_p9 = scmp.lt.u32.totalorder %s7257_s17, %s7313_s9 }
 0x5f9   : > { %p5177_p10 = scmp.lt.u32.totalorder %s5175_s29, %s5171_s16  ;;  %p5179_p12 = scmp.lt.u32.totalorder %s5171_s16, %s7257_s17 }
 0x5fa   : > { %p5173_p7 = pnand %p5172_p4, %p5321_p5 }
 0x5fb   : > { %p5178_p11 = por %p5177_p10, %p5176_p9 }
 0x5fc   : > { %p5174_p8 = pneg %p5173_p7 }
 0x5fd   : > { %p5180_p13 = por %p5179_p12, %p5178_p11 }
 0x5ff   : > { %p5181_p0 = pnand %p5180_p13, %p5174_p8 }
 0x601   : > { %5184 = shalt.err (!%p5181_p0)
}
 0x602   : > { %s5231_s21 = smov 128   ;;  %s5232_s23 = smov 8  }
 0x603   : > { %4039 = dma.vmem_to_hbm [thread:$0]  (%p5321_p5), %s7259_s22, 1024, %s7257_s17, %s7263_s13, %s5231_s21, %s5231_s21, %s5232_s23  }
 0x604 PF: > { %p4045_p1 = scmp.ge.s32.totalorder %s5219_s12, 2  ;;  %s3656_s27 = sand.u32 1, %s5207_s30  }
 0x605   : > { %s3657_s14 = scalar_lea.sflag [#allocation5], %s3656_s27 }
 0x606   : > { %p4042_p2 = pnand %p4045_p1, %p5325_p6 }
 0x608   : > { %5202 = dma.done.wait (!%p4042_p2), %s3657_s14, 1024  }
 0x609   : > { %5204 = vsyncadd (!%p4042_p2), %s3657_s14, 4294966272  ;;  %p19_p3 = scmp.ge.s32.totalorder %s5308_s15, 4   ;;  %s7446_s30 = smov %s5211_s10 }
 0x60a   : > { %s7447_s10 = smov %s5215_s11  ;;  %s7448_s11 = smov %s5319_s18 }
 0x60b   : > { %s7449_s12 = smov %s5308_s15  ;;  %21 = sbr.rel (!%p19_p3) target bundleno = 3 (0x3), region = 103 }
 0x612   :  { %3662 = vsyncpa [#allocation5], 1 }
 0x613   :  { %3664 = vsyncpa [#allocation5 + $0x1], 1 }

</bundles_post_ra>
